<compile_context>
chip_gen: v7x
topology: tpu7x:2x2x1
jax: 0.10.0
libtpu: 0.0.40
codegen_flags: <defaults>
</compile_context>

<pallas_src>
import math
import functools
import jax
import jax.numpy as jnp
from jax import lax
from jax.experimental import pallas as pl
from jax.experimental.pallas import tpu as pltpu


# ----------------------------- in-kernel helpers ------------------------------

def _layer_norm(y, g, b):
    # biased variance, eps=1e-12 (matches the custom LayerNorm in the reference)
    mean = jnp.mean(y, axis=-1, keepdims=True)
    var = jnp.mean((y - mean) ** 2, axis=-1, keepdims=True)
    return (y - mean) * lax.rsqrt(var + 1e-12) * g + b


def _mha(q, k, v, bias, wo, bo, n_head):
    """Multi-head attention on packed (S, D) activations.

    q (Sq,D) f32, k/v (Sk,D) f32, bias (Sq,Sk) f32 additive mask bias
    (0 = attend, -10000 = masked), wo (D,D) bf16, bo (1,D) f32.
    Head-concat + output projection folded into an accumulation over row slices
    of w_o:  concat(heads) @ w_o == sum_h head_h @ w_o[h*Dh:(h+1)*Dh, :].
    """
    Sq, D = q.shape
    Dh = D // n_head
    q = q * (1.0 / math.sqrt(Dh))          # fold 1/sqrt(d_k) once, not per head
    acc = jnp.zeros((Sq, D), jnp.float32)
    for h in range(n_head):
        sl = slice(h * Dh, (h + 1) * Dh)
        qh = q[:, sl].astype(jnp.bfloat16)
        kh = k[:, sl].astype(jnp.bfloat16)
        vh = v[:, sl].astype(jnp.bfloat16)
        # q @ k^T without an explicit transpose (contract last dims), bf16 MXU.
        s = lax.dot_general(qh, kh, (((1,), (1,)), ((), ())),
                            preferred_element_type=jnp.float32) + bias
        s = s - jnp.max(s, axis=-1, keepdims=True)           # stabilized softmax
        p = jnp.exp(s)
        p = p * pl.reciprocal(jnp.sum(p, axis=-1, keepdims=True), approx=True)
        oh = jnp.dot(p.astype(jnp.bfloat16), vh, preferred_element_type=jnp.float32)
        acc = acc + jnp.dot(oh.astype(jnp.bfloat16), wo[sl, :],
                            preferred_element_type=jnp.float32)
    return acc + bo


# ----------------------------- fused stack kernels ------------------------------

def _encoder_stack_kernel(x_ref, bias_ref,
                          wqkv_ref, bqkv_ref, wo_ref, bo_ref, g1_ref, be1_ref,
                          w1_ref, bb1_ref, w2_ref, bb2_ref, g2_ref, be2_ref,
                          o_ref, act_ref, *, n_head):
    """One grid step = (batch element b, encoder layer l).  The activation is
    carried in VMEM scratch across the layer axis; HBM output written once."""
    l = pl.program_id(1)

    @pl.when(l == 0)
    def _():
        act_ref[...] = x_ref[0]           # (S, D) f32 embedded input

    x = act_ref[...]                      # (S, D) f32
    bias = bias_ref[0]                    # (S, S) f32 additive mask bias
    D = x.shape[-1]

    # --- self-attention sublayer: packed Q|K|V projection (one MXU push) ---
    qkv = jnp.dot(x.astype(jnp.bfloat16), wqkv_ref[0],
                  preferred_element_type=jnp.float32) + bqkv_ref[0]
    att = _mha(qkv[:, :D], qkv[:, D:2 * D], qkv[:, 2 * D:], bias,
               wo_ref[0], bo_ref[0], n_head)
    x = _layer_norm(att + x, g1_ref[0], be1_ref[0])

    # --- position-wise FFN sublayer ---
    h = jnp.maximum(jnp.dot(x.astype(jnp.bfloat16), w1_ref[0],
                            preferred_element_type=jnp.float32) + bb1_ref[0], 0.0)
    y = jnp.dot(h.astype(jnp.bfloat16), w2_ref[0],
                preferred_element_type=jnp.float32) + bb2_ref[0] + x
    x = _layer_norm(y, g2_ref[0], be2_ref[0])
    act_ref[...] = x

    @pl.when(l == pl.num_programs(1) - 1)
    def _():
        o_ref[0] = x                      # single HBM writeback per batch element


def _decoder_stack_kernel(y_ref, enc_ref, bs_ref, bc_ref,
                          wqkv_ref, bqkv_ref, wo1_ref, bo1_ref, g1_ref, be1_ref,
                          wq_ref, bq_ref, wkv_ref, bkv_ref, wo2_ref, bo2_ref,
                          g2_ref, be2_ref,
                          w1_ref, bb1_ref, w2_ref, bb2_ref, g3_ref, be3_ref,
                          ow_ref, ob_ref,
                          logits_ref, act_ref, *, n_head):
    """One grid step = (batch element b, decoder layer l).  The final logits
    projection is fused into the last layer step (lane-dense 128-wide output)."""
    l = pl.program_id(1)

    @pl.when(l == 0)
    def _():
        act_ref[...] = y_ref[0]

    x = act_ref[...]                      # (S_trg, D) f32
    enc = enc_ref[0]                      # (S_src, D) f32
    D = x.shape[-1]

    # --- masked self-attention + add&norm ---
    qkv = jnp.dot(x.astype(jnp.bfloat16), wqkv_ref[0],
                  preferred_element_type=jnp.float32) + bqkv_ref[0]
    att = _mha(qkv[:, :D], qkv[:, D:2 * D], qkv[:, 2 * D:], bs_ref[0],
               wo1_ref[0], bo1_ref[0], n_head)
    x = _layer_norm(att + x, g1_ref[0], be1_ref[0])

    # --- encoder-decoder cross attention + add&norm ---
    q = jnp.dot(x.astype(jnp.bfloat16), wq_ref[0],
                preferred_element_type=jnp.float32) + bq_ref[0]
    kv = jnp.dot(enc.astype(jnp.bfloat16), wkv_ref[0],
                 preferred_element_type=jnp.float32) + bkv_ref[0]
    att = _mha(q, kv[:, :D], kv[:, D:], bc_ref[0], wo2_ref[0], bo2_ref[0], n_head)
    x = _layer_norm(att + x, g2_ref[0], be2_ref[0])

    # --- position-wise FFN + add&norm ---
    h = jnp.maximum(jnp.dot(x.astype(jnp.bfloat16), w1_ref[0],
                            preferred_element_type=jnp.float32) + bb1_ref[0], 0.0)
    y = jnp.dot(h.astype(jnp.bfloat16), w2_ref[0],
                preferred_element_type=jnp.float32) + bb2_ref[0] + x
    x = _layer_norm(y, g3_ref[0], be3_ref[0])
    act_ref[...] = x

    # fused final logits projection at the last layer (padded-to-128 lane-dense store)
    @pl.when(l == pl.num_programs(1) - 1)
    def _():
        logits_ref[0] = (jnp.dot(x.astype(jnp.bfloat16), ow_ref[...],
                                 preferred_element_type=jnp.float32) + ob_ref[...])


# ----------------------------- kernel wrappers ------------------------------

def encoder_stack(x_emb, bias, ep, n_head):
    """Whole encoder stack in ONE pallas_call.  grid=(B, n_layers)."""
    B, S, D = x_emb.shape
    L = ep["wqkv"].shape[0]
    F = ep["w1"].shape[-1]
    kern = functools.partial(_encoder_stack_kernel, n_head=n_head)
    wspec = lambda shape: pl.BlockSpec((1,) + shape, lambda b, l: (l, 0, 0))
    return pl.pallas_call(
        kern,
        out_shape=jax.ShapeDtypeStruct((B, S, D), jnp.float32),
        grid=(B, L),
        in_specs=[
            pl.BlockSpec((1, S, D), lambda b, l: (b, 0, 0)),   # embedded src
            pl.BlockSpec((1, S, S), lambda b, l: (b, 0, 0)),   # additive mask bias
            wspec((D, 3 * D)),   # packed Q|K|V weight (bf16)
            wspec((1, 3 * D)),   # packed Q|K|V bias
            wspec((D, D)),       # w_o (bf16)
            wspec((1, D)),       # b_o
            wspec((1, D)),       # ln1 gamma
            wspec((1, D)),       # ln1 beta
            wspec((D, F)),       # ffn w1 (bf16)
            wspec((1, F)),       # ffn b1
            wspec((F, D)),       # ffn w2 (bf16)
            wspec((1, D)),       # ffn b2
            wspec((1, D)),       # ln2 gamma
            wspec((1, D)),       # ln2 beta
        ],
        out_specs=pl.BlockSpec((1, S, D), lambda b, l: (b, 0, 0)),
        scratch_shapes=[pltpu.VMEM((S, D), jnp.float32)],
        compiler_params=pltpu.CompilerParams(
            dimension_semantics=("parallel", "arbitrary")),
    )(x_emb, bias,
      ep["wqkv"], ep["bqkv"], ep["wo"], ep["bo"], ep["g1"], ep["be1"],
      ep["w1"], ep["b1"], ep["w2"], ep["b2"], ep["g2"], ep["be2"])


def decoder_stack(y_emb, enc, bias_self, bias_cross, dp, out_w_pad, out_b_pad, n_head):
    """Whole decoder stack + final logits projection in ONE pallas_call."""
    B, S, D = y_emb.shape
    Sk = enc.shape[1]
    L = dp["wqkv"].shape[0]
    F = dp["w1"].shape[-1]
    Np = out_w_pad.shape[-1]
    kern = functools.partial(_decoder_stack_kernel, n_head=n_head)
    wspec = lambda shape: pl.BlockSpec((1,) + shape, lambda b, l: (l, 0, 0))
    return pl.pallas_call(
        kern,
        out_shape=jax.ShapeDtypeStruct((B, S, Np), jnp.float32),
        grid=(B, L),
        in_specs=[
            pl.BlockSpec((1, S, D), lambda b, l: (b, 0, 0)),    # embedded trg
            pl.BlockSpec((1, Sk, D), lambda b, l: (b, 0, 0)),   # encoder output
            pl.BlockSpec((1, S, S), lambda b, l: (b, 0, 0)),    # self-attn mask bias
            pl.BlockSpec((1, S, Sk), lambda b, l: (b, 0, 0)),   # cross-attn mask bias
            # self-attention + ln1
            wspec((D, 3 * D)), wspec((1, 3 * D)), wspec((D, D)), wspec((1, D)),
            wspec((1, D)), wspec((1, D)),
            # cross-attention + ln2
            wspec((D, D)), wspec((1, D)), wspec((D, 2 * D)), wspec((1, 2 * D)),
            wspec((D, D)), wspec((1, D)), wspec((1, D)), wspec((1, D)),
            # ffn + ln3
            wspec((D, F)), wspec((1, F)), wspec((F, D)), wspec((1, D)),
            wspec((1, D)), wspec((1, D)),
            # padded logits projection (constant across the grid)
            pl.BlockSpec((D, Np), lambda b, l: (0, 0)),
            pl.BlockSpec((1, Np), lambda b, l: (0, 0)),
        ],
        out_specs=pl.BlockSpec((1, S, Np), lambda b, l: (b, 0, 0)),
        scratch_shapes=[pltpu.VMEM((S, D), jnp.float32)],
        compiler_params=pltpu.CompilerParams(
            dimension_semantics=("parallel", "arbitrary")),
    )(y_emb, enc, bias_self, bias_cross,
      dp["wqkv"], dp["bqkv"], dp["wo1"], dp["bo1"], dp["g1"], dp["be1"],
      dp["wq"], dp["bq"], dp["wkv"], dp["bkv"], dp["wo2"], dp["bo2"],
      dp["g2"], dp["be2"],
      dp["w1"], dp["b1"], dp["w2"], dp["b2"], dp["g3"], dp["be3"],
      out_w_pad, out_b_pad)


# ----------------------------- model (JAX glue) ------------------------------

def transformer_embedding(tok, emb_table, pos_enc):
    # TODO(synk): token-embedding gather stays in XLA (jnp.take); no Pallas win at this scale.
    S = tok.shape[1]
    tok_emb = jnp.take(emb_table, tok, axis=0)
    return tok_emb + pos_enc[:S][None, :, :]


def make_pad_mask(q_tok, k_tok, pad_q, pad_k):
    q_ne = (q_tok != pad_q)[:, :, None]     # (B, Sq, 1)
    k_ne = (k_tok != pad_k)[:, None, :]     # (B, 1, Sk)
    return q_ne & k_ne                      # (B, Sq, Sk) bool


def make_casual_mask(Sq, Sk):
    # matches torch.triu(torch.ones(len_q, len_k)).bool() -- faithful to the reference
    # (the reference really uses triu, not tril)
    return jnp.triu(jnp.ones((Sq, Sk), dtype=bool))


def transformer_forward(params, src, trg, cfg):
    src_pad, trg_pad, n_head = cfg["src_pad_idx"], cfg["trg_pad_idx"], cfg["n_head"]
    S_trg = trg.shape[1]

    # masks converted once to additive f32 bias (0 attend / -10000 masked) in the
    # wrapper so kernels add instead of compare+select per head.
    to_bias = lambda m: jnp.where(m, 0.0, -10000.0).astype(jnp.float32)
    src_bias = to_bias(make_pad_mask(src, src, src_pad, src_pad))
    trg_bias = to_bias(make_casual_mask(S_trg, S_trg)[None]
                       & make_pad_mask(trg, trg, trg_pad, trg_pad))
    src_trg_bias = to_bias(make_pad_mask(trg, src, trg_pad, src_pad))

    # ------ encoder (one pallas_call) ------
    x = transformer_embedding(src, params["src_emb"], params["pos_enc"])
    enc = encoder_stack(x, src_bias, params["enc"], n_head)

    # ------ decoder + fused logits projection (one pallas_call) ------
    y = transformer_embedding(trg, params["trg_emb"], params["pos_enc"])
    logits_pad = decoder_stack(y, enc, trg_bias, src_trg_bias, params["dec"],
                               params["out_w_pad"], params["out_b_pad"], n_head)
    return logits_pad[..., :cfg["trg_vocab_size"]]   # single slice at the very end


# ----------------------------- parameter init ------------------------------

def _init_linear(key, d_in, d_out):
    w = jax.random.normal(key, (d_in, d_out), jnp.float32) * 0.02
    b = jnp.zeros((d_out,), jnp.float32)
    return w, b


def _sinusoidal_pos_encoding(max_len, d_model):
    pos = jnp.arange(max_len, dtype=jnp.float32)[:, None]
    i = jnp.arange(0, d_model, 2, dtype=jnp.float32)
    div = jnp.power(10000.0, i / d_model)
    pe = jnp.zeros((max_len, d_model), jnp.float32)
    pe = pe.at[:, 0::2].set(jnp.sin(pos / div))
    pe = pe.at[:, 1::2].set(jnp.cos(pos / div))
    return pe


def init_params(key, cfg):
    D, F, L = cfg["d_model"], cfg["ffn_hidden"], cfg["n_layers"]
    keys = iter(jax.random.split(key, 256))
    ones = jnp.ones((1, D), jnp.float32)
    zeros = jnp.zeros((1, D), jnp.float32)

    src_emb = jax.random.normal(next(keys), (cfg["src_vocab_size"], D), jnp.float32) * 0.02
    trg_emb = jax.random.normal(next(keys), (cfg["trg_vocab_size"], D), jnp.float32) * 0.02
    # padding_idx row zeroed (nn.Embedding padding_idx behavior)
    src_emb = src_emb.at[cfg["src_pad_idx"]].set(0.0)
    trg_emb = trg_emb.at[cfg["trg_pad_idx"]].set(0.0)

    # ---- encoder layers, stacked along a leading n_layers axis ----
    e = {k: [] for k in ["wqkv", "bqkv", "wo", "bo", "g1", "be1",
                         "w1", "b1", "w2", "b2", "g2", "be2"]}
    for _ in range(L):
        wq, bq = _init_linear(next(keys), D, D)
        wk, bk = _init_linear(next(keys), D, D)
        wv, bv = _init_linear(next(keys), D, D)
        wo, bo = _init_linear(next(keys), D, D)
        e["wqkv"].append(jnp.concatenate([wq, wk, wv], axis=1))
        e["bqkv"].append(jnp.concatenate([bq, bk, bv], axis=0).reshape(1, -1))
        e["wo"].append(wo); e["bo"].append(bo.reshape(1, -1))
        e["g1"].append(ones); e["be1"].append(zeros)
        w1, b1 = _init_linear(next(keys), D, F)
        w2, b2 = _init_linear(next(keys), F, D)
        e["w1"].append(w1); e["b1"].append(b1.reshape(1, -1))
        e["w2"].append(w2); e["b2"].append(b2.reshape(1, -1))
        e["g2"].append(ones); e["be2"].append(zeros)
    e_bf16 = {"wqkv", "wo", "w1", "w2"}       # MXU operands stored bf16
    enc_stacked = {k: (jnp.stack(v).astype(jnp.bfloat16) if k in e_bf16 else jnp.stack(v))
                   for k, v in e.items()}

    # ---- decoder layers, stacked along a leading n_layers axis ----
    d = {k: [] for k in ["wqkv", "bqkv", "wo1", "bo1", "g1", "be1",
                         "wq", "bq", "wkv", "bkv", "wo2", "bo2", "g2", "be2",
                         "w1", "b1", "w2", "b2", "g3", "be3"]}
    for _ in range(L):
        # masked self-attention (packed Q|K|V)
        wq, bq = _init_linear(next(keys), D, D)
        wk, bk = _init_linear(next(keys), D, D)
        wv, bv = _init_linear(next(keys), D, D)
        wo, bo = _init_linear(next(keys), D, D)
        d["wqkv"].append(jnp.concatenate([wq, wk, wv], axis=1))
        d["bqkv"].append(jnp.concatenate([bq, bk, bv], axis=0).reshape(1, -1))
        d["wo1"].append(wo); d["bo1"].append(bo.reshape(1, -1))
        d["g1"].append(ones); d["be1"].append(zeros)
        # cross-attention (separate Q, packed K|V)
        wq, bq = _init_linear(next(keys), D, D)
        wk, bk = _init_linear(next(keys), D, D)
        wv, bv = _init_linear(next(keys), D, D)
        wo, bo = _init_linear(next(keys), D, D)
        d["wq"].append(wq); d["bq"].append(bq.reshape(1, -1))
        d["wkv"].append(jnp.concatenate([wk, wv], axis=1))
        d["bkv"].append(jnp.concatenate([bk, bv], axis=0).reshape(1, -1))
        d["wo2"].append(wo); d["bo2"].append(bo.reshape(1, -1))
        d["g2"].append(ones); d["be2"].append(zeros)
        # FFN
        w1, b1 = _init_linear(next(keys), D, F)
        w2, b2 = _init_linear(next(keys), F, D)
        d["w1"].append(w1); d["b1"].append(b1.reshape(1, -1))
        d["w2"].append(w2); d["b2"].append(b2.reshape(1, -1))
        d["g3"].append(ones); d["be3"].append(zeros)
    d_bf16 = {"wqkv", "wo1", "wq", "wkv", "wo2", "w1", "w2"}
    dec_stacked = {k: (jnp.stack(v).astype(jnp.bfloat16) if k in d_bf16 else jnp.stack(v))
                   for k, v in d.items()}

    # ---- final logits projection, padded to 128 lanes ONCE here (lane-dense store) ----
    out_w, out_b = _init_linear(next(keys), D, cfg["trg_vocab_size"])
    Np = ((cfg["trg_vocab_size"] + 127) // 128) * 128
    out_w_pad = (jnp.zeros((D, Np), jnp.float32)
                 .at[:, :cfg["trg_vocab_size"]].set(out_w).astype(jnp.bfloat16))
    out_b_pad = jnp.zeros((1, Np), jnp.float32).at[:, :cfg["trg_vocab_size"]].set(out_b)

    return {
        "src_emb": src_emb, "trg_emb": trg_emb,
        "pos_enc": _sinusoidal_pos_encoding(cfg["max_len"], D),
        "enc": enc_stacked, "dec": dec_stacked,
        "out_w_pad": out_w_pad, "out_b_pad": out_b_pad,
    }


# ----------------------------------- main -----------------------------------

if __name__ == "__main__":
    cfg = dict(
        src_pad_idx=0, trg_pad_idx=0,
        src_vocab_size=50, trg_vocab_size=48,
        d_model=32, max_len=16, n_layers=2, n_head=4,
        ffn_hidden=64, drop_prob=0.0,   # dropout is identity here (eval semantics)
    )
    B, S_src, S_trg = 2, 8, 8

    key = jax.random.PRNGKey(0)
    k_params, k_src, k_trg = jax.random.split(key, 3)

    params = init_params(k_params, cfg)

    src = jax.random.randint(k_src, (B, S_src), 2, cfg["src_vocab_size"], dtype=jnp.int32)
    trg = jax.random.randint(k_trg, (B, S_trg), 2, cfg["trg_vocab_size"], dtype=jnp.int32)
    # add some padding tokens to exercise the pad masks
    src = src.at[1, -2:].set(cfg["src_pad_idx"])
    trg = trg.at[1, -3:].set(cfg["trg_pad_idx"])

    fwd = jax.jit(functools.partial(transformer_forward, cfg=cfg))
    out = fwd(params, src, trg)
    out = jax.block_until_ready(out)

    assert out.shape == (B, S_trg, cfg["trg_vocab_size"])
    assert bool(jnp.all(jnp.isfinite(out)))
    print("KERNEL_OK")
</pallas_src>

<mosaic_0001>
module attributes {stable_mosaic.version = 11 : i64} {
  func.func @_encoder_stack_kernel(%arg0: i32, %arg1: i32, %arg2: memref<1x8x32xf32, #tpu.memory_space<vmem>>, %arg3: memref<1x8x8xf32, #tpu.memory_space<vmem>>, %arg4: memref<1x32x96xbf16, #tpu.memory_space<vmem>>, %arg5: memref<1x1x96xf32, #tpu.memory_space<vmem>>, %arg6: memref<1x32x32xbf16, #tpu.memory_space<vmem>>, %arg7: memref<1x1x32xf32, #tpu.memory_space<vmem>>, %arg8: memref<1x1x32xf32, #tpu.memory_space<vmem>>, %arg9: memref<1x1x32xf32, #tpu.memory_space<vmem>>, %arg10: memref<1x32x64xbf16, #tpu.memory_space<vmem>>, %arg11: memref<1x1x64xf32, #tpu.memory_space<vmem>>, %arg12: memref<1x64x32xbf16, #tpu.memory_space<vmem>>, %arg13: memref<1x1x32xf32, #tpu.memory_space<vmem>>, %arg14: memref<1x1x32xf32, #tpu.memory_space<vmem>>, %arg15: memref<1x1x32xf32, #tpu.memory_space<vmem>>, %arg16: memref<1x8x32xf32, #tpu.memory_space<vmem>>, %arg17: memref<8x32xf32, #tpu.memory_space<vmem>>) attributes {dimension_semantics = [#tpu.dimension_semantics<parallel>, #tpu.dimension_semantics<arbitrary>], iteration_bounds = array<i64: 2, 2>, scalar_prefetch = 0 : i64, scratch_operands = 1 : i64, tpu.core_type = #tpu.core_type<tc>, window_params = [{transform_indices = @transform_0, window_bounds = array<i64: 1, 8, 32>}, {transform_indices = @transform_1, window_bounds = array<i64: 1, 8, 8>}, {transform_indices = @transform_2, window_bounds = array<i64: 1, 32, 96>}, {transform_indices = @transform_3, window_bounds = array<i64: 1, 1, 96>}, {transform_indices = @transform_4, window_bounds = array<i64: 1, 32, 32>}, {transform_indices = @transform_5, window_bounds = array<i64: 1, 1, 32>}, {transform_indices = @transform_6, window_bounds = array<i64: 1, 1, 32>}, {transform_indices = @transform_7, window_bounds = array<i64: 1, 1, 32>}, {transform_indices = @transform_8, window_bounds = array<i64: 1, 32, 64>}, {transform_indices = @transform_9, window_bounds = array<i64: 1, 1, 64>}, {transform_indices = @transform_10, window_bounds = array<i64: 1, 64, 32>}, {transform_indices = @transform_11, window_bounds = array<i64: 1, 1, 32>}, {transform_indices = @transform_12, window_bounds = array<i64: 1, 1, 32>}, {transform_indices = @transform_13, window_bounds = array<i64: 1, 1, 32>}, {transform_indices = @transform_14, window_bounds = array<i64: 1, 8, 32>}]} {
    %c0_i32 = arith.constant 0 : i32
    %0 = arith.cmpi eq, %arg1, %c0_i32 : i32
    %1 = arith.extui %0 : i1 to i32
    %c0_i32_0 = arith.constant 0 : i32
    %2 = arith.cmpi ne, %1, %c0_i32_0 : i32
    scf.if %2 {
      %c0_79 = arith.constant 0 : index
      %c0_80 = arith.constant 0 : index
      %c0_81 = arith.constant 0 : index
      %198 = vector.load %arg2[%c0_79, %c0_80, %c0_81] : memref<1x8x32xf32, #tpu.memory_space<vmem>>, vector<1x8x32xf32>
      %199 = vector.shape_cast %198 : vector<1x8x32xf32> to vector<8x32xf32>
      %c0_82 = arith.constant 0 : index
      %c0_83 = arith.constant 0 : index
      %200 = vector.load %arg17[%c0_82, %c0_83] : memref<8x32xf32, #tpu.memory_space<vmem>>, vector<8x32xf32>
      tpu.vector_store %arg17[%c0_82, %c0_83], %199 {strides = array<i32>} : memref<8x32xf32, #tpu.memory_space<vmem>>, vector<8x32xf32>,
    } else {
    }
    %c0 = arith.constant 0 : index
    %c0_1 = arith.constant 0 : index
    %3 = vector.load %arg17[%c0, %c0_1] : memref<8x32xf32, #tpu.memory_space<vmem>>, vector<8x32xf32>
    %c0_2 = arith.constant 0 : index
    %c0_3 = arith.constant 0 : index
    %c0_4 = arith.constant 0 : index
    %4 = vector.load %arg3[%c0_2, %c0_3, %c0_4] : memref<1x8x8xf32, #tpu.memory_space<vmem>>, vector<1x8x8xf32>
    %5 = vector.shape_cast %4 : vector<1x8x8xf32> to vector<8x8xf32>
    %6 = arith.truncf %3 : vector<8x32xf32> to vector<8x32xbf16>
    %c0_5 = arith.constant 0 : index
    %c0_6 = arith.constant 0 : index
    %c0_7 = arith.constant 0 : index
    %7 = vector.load %arg4[%c0_5, %c0_6, %c0_7] : memref<1x32x96xbf16, #tpu.memory_space<vmem>>, vector<1x32x96xbf16>
    %8 = vector.shape_cast %7 : vector<1x32x96xbf16> to vector<32x96xbf16>
    %cst = arith.constant dense<0.000000e+00> : vector<8x96xf32>
    %9 = tpu.matmul %6, %8, %cst {dimension_numbers = #tpu.dot_dimension_numbers<[1], [0], [0], [1], [0, 0, 1, 1], [], []>} : vector<8x32xbf16>, vector<32x96xbf16>, vector<8x96xf32> -> vector<8x96xf32>
    %c0_8 = arith.constant 0 : index
    %c0_9 = arith.constant 0 : index
    %c0_10 = arith.constant 0 : index
    %10 = vector.load %arg5[%c0_8, %c0_9, %c0_10] : memref<1x1x96xf32, #tpu.memory_space<vmem>>, vector<1x1x96xf32>
    %11 = vector.shape_cast %10 : vector<1x1x96xf32> to vector<1x96xf32>
    %12 = vector.broadcast %11 : vector<1x96xf32> to vector<8x96xf32>
    %13 = arith.addf %9, %12 : vector<8x96xf32>
    %14 = vector.extract_strided_slice %13 {offsets = [0, 0], sizes = [8, 32], strides = [1, 1]} : vector<8x96xf32> to vector<8x32xf32>
    %15 = vector.extract_strided_slice %13 {offsets = [0, 32], sizes = [8, 32], strides = [1, 1]} : vector<8x96xf32> to vector<8x32xf32>
    %16 = vector.extract_strided_slice %13 {offsets = [0, 64], sizes = [8, 32], strides = [1, 1]} : vector<8x96xf32> to vector<8x32xf32>
    %c0_11 = arith.constant 0 : index
    %c0_12 = arith.constant 0 : index
    %c0_13 = arith.constant 0 : index
    %17 = vector.load %arg6[%c0_11, %c0_12, %c0_13] : memref<1x32x32xbf16, #tpu.memory_space<vmem>>, vector<1x32x32xbf16>
    %18 = vector.shape_cast %17 : vector<1x32x32xbf16> to vector<32x32xbf16>
    %c0_14 = arith.constant 0 : index
    %c0_15 = arith.constant 0 : index
    %c0_16 = arith.constant 0 : index
    %19 = vector.load %arg7[%c0_14, %c0_15, %c0_16] : memref<1x1x32xf32, #tpu.memory_space<vmem>>, vector<1x1x32xf32>
    %20 = vector.shape_cast %19 : vector<1x1x32xf32> to vector<1x32xf32>
    %cst_17 = arith.constant 0.353553385 : f32
    %21 = vector.broadcast %cst_17 : f32 to vector<8x32xf32>
    %22 = arith.mulf %14, %21 : vector<8x32xf32>
    %cst_18 = arith.constant 0.000000e+00 : f32
    %23 = vector.broadcast %cst_18 : f32 to vector<8x32xf32>
    %24 = vector.extract_strided_slice %22 {offsets = [0, 0], sizes = [8, 8], strides = [1, 1]} : vector<8x32xf32> to vector<8x8xf32>
    %25 = arith.truncf %24 : vector<8x8xf32> to vector<8x8xbf16>
    %26 = vector.extract_strided_slice %15 {offsets = [0, 0], sizes = [8, 8], strides = [1, 1]} : vector<8x32xf32> to vector<8x8xf32>
    %27 = arith.truncf %26 : vector<8x8xf32> to vector<8x8xbf16>
    %28 = vector.extract_strided_slice %16 {offsets = [0, 0], sizes = [8, 8], strides = [1, 1]} : vector<8x32xf32> to vector<8x8xf32>
    %29 = arith.truncf %28 : vector<8x8xf32> to vector<8x8xbf16>
    %cst_19 = arith.constant dense<0.000000e+00> : vector<8x8xf32>
    %30 = tpu.matmul %25, %27, %cst_19 {dimension_numbers = #tpu.dot_dimension_numbers<[1], [1], [0], [0], [0, 0, 1, 0], [], []>} : vector<8x8xbf16>, vector<8x8xbf16>, vector<8x8xf32> -> vector<8x8xf32>
    %31 = arith.addf %30, %5 : vector<8x8xf32>
    %cst_20 = arith.constant dense<0xFF800000> : vector<8xf32>
    %32 = vector.multi_reduction <maximumf>, %31, %cst_20 [1] : vector<8x8xf32> to vector<8xf32>
    %33 = vector.shape_cast %32 : vector<8xf32> to vector<8x1xf32>
    %34 = vector.broadcast %33 : vector<8x1xf32> to vector<8x8xf32>
    %35 = arith.subf %31, %34 : vector<8x8xf32>
    %36 = math.exp %35 : vector<8x8xf32>
    %cst_21 = arith.constant dense<0.000000e+00> : vector<8xf32>
    %37 = vector.multi_reduction <add>, %36, %cst_21 [1] : vector<8x8xf32> to vector<8xf32>
    %38 = vector.shape_cast %37 : vector<8xf32> to vector<8x1xf32>
    %39 = tpu.reciprocal %38 {approx = true} : vector<8x1xf32> -> vector<8x1xf32>
    %40 = vector.broadcast %39 : vector<8x1xf32> to vector<8x8xf32>
    %41 = arith.mulf %36, %40 : vector<8x8xf32>
    %42 = arith.truncf %41 : vector<8x8xf32> to vector<8x8xbf16>
    %cst_22 = arith.constant dense<0.000000e+00> : vector<8x8xf32>
    %43 = tpu.matmul %42, %29, %cst_22 {dimension_numbers = #tpu.dot_dimension_numbers<[1], [0], [0], [1], [0, 0, 1, 1], [], []>} : vector<8x8xbf16>, vector<8x8xbf16>, vector<8x8xf32> -> vector<8x8xf32>
    %44 = arith.truncf %43 : vector<8x8xf32> to vector<8x8xbf16>
    %45 = vector.extract_strided_slice %18 {offsets = [0, 0], sizes = [8, 32], strides = [1, 1]} : vector<32x32xbf16> to vector<8x32xbf16>
    %cst_23 = arith.constant dense<0.000000e+00> : vector<8x32xf32>
    %46 = tpu.matmul %44, %45, %cst_23 {dimension_numbers = #tpu.dot_dimension_numbers<[1], [0], [0], [1], [0, 0, 1, 1], [], []>} : vector<8x8xbf16>, vector<8x32xbf16>, vector<8x32xf32> -> vector<8x32xf32>
    %47 = arith.addf %23, %46 : vector<8x32xf32>
    %48 = vector.extract_strided_slice %22 {offsets = [0, 8], sizes = [8, 8], strides = [1, 1]} : vector<8x32xf32> to vector<8x8xf32>
    %49 = arith.truncf %48 : vector<8x8xf32> to vector<8x8xbf16>
    %50 = vector.extract_strided_slice %15 {offsets = [0, 8], sizes = [8, 8], strides = [1, 1]} : vector<8x32xf32> to vector<8x8xf32>
    %51 = arith.truncf %50 : vector<8x8xf32> to vector<8x8xbf16>
    %52 = vector.extract_strided_slice %16 {offsets = [0, 8], sizes = [8, 8], strides = [1, 1]} : vector<8x32xf32> to vector<8x8xf32>
    %53 = arith.truncf %52 : vector<8x8xf32> to vector<8x8xbf16>
    %cst_24 = arith.constant dense<0.000000e+00> : vector<8x8xf32>
    %54 = tpu.matmul %49, %51, %cst_24 {dimension_numbers = #tpu.dot_dimension_numbers<[1], [1], [0], [0], [0, 0, 1, 0], [], []>} : vector<8x8xbf16>, vector<8x8xbf16>, vector<8x8xf32> -> vector<8x8xf32>
    %55 = arith.addf %54, %5 : vector<8x8xf32>
    %cst_25 = arith.constant dense<0xFF800000> : vector<8xf32>
    %56 = vector.multi_reduction <maximumf>, %55, %cst_25 [1] : vector<8x8xf32> to vector<8xf32>
    %57 = vector.shape_cast %56 : vector<8xf32> to vector<8x1xf32>
    %58 = vector.broadcast %57 : vector<8x1xf32> to vector<8x8xf32>
    %59 = arith.subf %55, %58 : vector<8x8xf32>
    %60 = math.exp %59 : vector<8x8xf32>
    %cst_26 = arith.constant dense<0.000000e+00> : vector<8xf32>
    %61 = vector.multi_reduction <add>, %60, %cst_26 [1] : vector<8x8xf32> to vector<8xf32>
    %62 = vector.shape_cast %61 : vector<8xf32> to vector<8x1xf32>
    %63 = tpu.reciprocal %62 {approx = true} : vector<8x1xf32> -> vector<8x1xf32>
    %64 = vector.broadcast %63 : vector<8x1xf32> to vector<8x8xf32>
    %65 = arith.mulf %60, %64 : vector<8x8xf32>
    %66 = arith.truncf %65 : vector<8x8xf32> to vector<8x8xbf16>
    %cst_27 = arith.constant dense<0.000000e+00> : vector<8x8xf32>
    %67 = tpu.matmul %66, %53, %cst_27 {dimension_numbers = #tpu.dot_dimension_numbers<[1], [0], [0], [1], [0, 0, 1, 1], [], []>} : vector<8x8xbf16>, vector<8x8xbf16>, vector<8x8xf32> -> vector<8x8xf32>
    %68 = arith.truncf %67 : vector<8x8xf32> to vector<8x8xbf16>
    %69 = vector.extract_strided_slice %18 {offsets = [8, 0], sizes = [8, 32], strides = [1, 1]} : vector<32x32xbf16> to vector<8x32xbf16>
    %cst_28 = arith.constant dense<0.000000e+00> : vector<8x32xf32>
    %70 = tpu.matmul %68, %69, %cst_28 {dimension_numbers = #tpu.dot_dimension_numbers<[1], [0], [0], [1], [0, 0, 1, 1], [], []>} : vector<8x8xbf16>, vector<8x32xbf16>, vector<8x32xf32> -> vector<8x32xf32>
    %71 = arith.addf %47, %70 : vector<8x32xf32>
    %72 = vector.extract_strided_slice %22 {offsets = [0, 16], sizes = [8, 8], strides = [1, 1]} : vector<8x32xf32> to vector<8x8xf32>
    %73 = arith.truncf %72 : vector<8x8xf32> to vector<8x8xbf16>
    %74 = vector.extract_strided_slice %15 {offsets = [0, 16], sizes = [8, 8], strides = [1, 1]} : vector<8x32xf32> to vector<8x8xf32>
    %75 = arith.truncf %74 : vector<8x8xf32> to vector<8x8xbf16>
    %76 = vector.extract_strided_slice %16 {offsets = [0, 16], sizes = [8, 8], strides = [1, 1]} : vector<8x32xf32> to vector<8x8xf32>
    %77 = arith.truncf %76 : vector<8x8xf32> to vector<8x8xbf16>
    %cst_29 = arith.constant dense<0.000000e+00> : vector<8x8xf32>
    %78 = tpu.matmul %73, %75, %cst_29 {dimension_numbers = #tpu.dot_dimension_numbers<[1], [1], [0], [0], [0, 0, 1, 0], [], []>} : vector<8x8xbf16>, vector<8x8xbf16>, vector<8x8xf32> -> vector<8x8xf32>
    %79 = arith.addf %78, %5 : vector<8x8xf32>
    %cst_30 = arith.constant dense<0xFF800000> : vector<8xf32>
    %80 = vector.multi_reduction <maximumf>, %79, %cst_30 [1] : vector<8x8xf32> to vector<8xf32>
    %81 = vector.shape_cast %80 : vector<8xf32> to vector<8x1xf32>
    %82 = vector.broadcast %81 : vector<8x1xf32> to vector<8x8xf32>
    %83 = arith.subf %79, %82 : vector<8x8xf32>
    %84 = math.exp %83 : vector<8x8xf32>
    %cst_31 = arith.constant dense<0.000000e+00> : vector<8xf32>
    %85 = vector.multi_reduction <add>, %84, %cst_31 [1] : vector<8x8xf32> to vector<8xf32>
    %86 = vector.shape_cast %85 : vector<8xf32> to vector<8x1xf32>
    %87 = tpu.reciprocal %86 {approx = true} : vector<8x1xf32> -> vector<8x1xf32>
    %88 = vector.broadcast %87 : vector<8x1xf32> to vector<8x8xf32>
    %89 = arith.mulf %84, %88 : vector<8x8xf32>
    %90 = arith.truncf %89 : vector<8x8xf32> to vector<8x8xbf16>
    %cst_32 = arith.constant dense<0.000000e+00> : vector<8x8xf32>
    %91 = tpu.matmul %90, %77, %cst_32 {dimension_numbers = #tpu.dot_dimension_numbers<[1], [0], [0], [1], [0, 0, 1, 1], [], []>} : vector<8x8xbf16>, vector<8x8xbf16>, vector<8x8xf32> -> vector<8x8xf32>
    %92 = arith.truncf %91 : vector<8x8xf32> to vector<8x8xbf16>
    %93 = vector.extract_strided_slice %18 {offsets = [16, 0], sizes = [8, 32], strides = [1, 1]} : vector<32x32xbf16> to vector<8x32xbf16>
    %cst_33 = arith.constant dense<0.000000e+00> : vector<8x32xf32>
    %94 = tpu.matmul %92, %93, %cst_33 {dimension_numbers = #tpu.dot_dimension_numbers<[1], [0], [0], [1], [0, 0, 1, 1], [], []>} : vector<8x8xbf16>, vector<8x32xbf16>, vector<8x32xf32> -> vector<8x32xf32>
    %95 = arith.addf %71, %94 : vector<8x32xf32>
    %96 = vector.extract_strided_slice %22 {offsets = [0, 24], sizes = [8, 8], strides = [1, 1]} : vector<8x32xf32> to vector<8x8xf32>
    %97 = arith.truncf %96 : vector<8x8xf32> to vector<8x8xbf16>
    %98 = vector.extract_strided_slice %15 {offsets = [0, 24], sizes = [8, 8], strides = [1, 1]} : vector<8x32xf32> to vector<8x8xf32>
    %99 = arith.truncf %98 : vector<8x8xf32> to vector<8x8xbf16>
    %100 = vector.extract_strided_slice %16 {offsets = [0, 24], sizes = [8, 8], strides = [1, 1]} : vector<8x32xf32> to vector<8x8xf32>
    %101 = arith.truncf %100 : vector<8x8xf32> to vector<8x8xbf16>
    %cst_34 = arith.constant dense<0.000000e+00> : vector<8x8xf32>
    %102 = tpu.matmul %97, %99, %cst_34 {dimension_numbers = #tpu.dot_dimension_numbers<[1], [1], [0], [0], [0, 0, 1, 0], [], []>} : vector<8x8xbf16>, vector<8x8xbf16>, vector<8x8xf32> -> vector<8x8xf32>
    %103 = arith.addf %102, %5 : vector<8x8xf32>
    %cst_35 = arith.constant dense<0xFF800000> : vector<8xf32>
    %104 = vector.multi_reduction <maximumf>, %103, %cst_35 [1] : vector<8x8xf32> to vector<8xf32>
    %105 = vector.shape_cast %104 : vector<8xf32> to vector<8x1xf32>
    %106 = vector.broadcast %105 : vector<8x1xf32> to vector<8x8xf32>
    %107 = arith.subf %103, %106 : vector<8x8xf32>
    %108 = math.exp %107 : vector<8x8xf32>
    %cst_36 = arith.constant dense<0.000000e+00> : vector<8xf32>
    %109 = vector.multi_reduction <add>, %108, %cst_36 [1] : vector<8x8xf32> to vector<8xf32>
    %110 = vector.shape_cast %109 : vector<8xf32> to vector<8x1xf32>
    %111 = tpu.reciprocal %110 {approx = true} : vector<8x1xf32> -> vector<8x1xf32>
    %112 = vector.broadcast %111 : vector<8x1xf32> to vector<8x8xf32>
    %113 = arith.mulf %108, %112 : vector<8x8xf32>
    %114 = arith.truncf %113 : vector<8x8xf32> to vector<8x8xbf16>
    %cst_37 = arith.constant dense<0.000000e+00> : vector<8x8xf32>
    %115 = tpu.matmul %114, %101, %cst_37 {dimension_numbers = #tpu.dot_dimension_numbers<[1], [0], [0], [1], [0, 0, 1, 1], [], []>} : vector<8x8xbf16>, vector<8x8xbf16>, vector<8x8xf32> -> vector<8x8xf32>
    %116 = arith.truncf %115 : vector<8x8xf32> to vector<8x8xbf16>
    %117 = vector.extract_strided_slice %18 {offsets = [24, 0], sizes = [8, 32], strides = [1, 1]} : vector<32x32xbf16> to vector<8x32xbf16>
    %cst_38 = arith.constant dense<0.000000e+00> : vector<8x32xf32>
    %118 = tpu.matmul %116, %117, %cst_38 {dimension_numbers = #tpu.dot_dimension_numbers<[1], [0], [0], [1], [0, 0, 1, 1], [], []>} : vector<8x8xbf16>, vector<8x32xbf16>, vector<8x32xf32> -> vector<8x32xf32>
    %119 = arith.addf %95, %118 : vector<8x32xf32>
    %120 = vector.broadcast %20 : vector<1x32xf32> to vector<8x32xf32>
    %121 = arith.addf %119, %120 : vector<8x32xf32>
    %122 = arith.addf %121, %3 : vector<8x32xf32>
    %c0_39 = arith.constant 0 : index
    %c0_40 = arith.constant 0 : index
    %c0_41 = arith.constant 0 : index
    %123 = vector.load %arg8[%c0_39, %c0_40, %c0_41] : memref<1x1x32xf32, #tpu.memory_space<vmem>>, vector<1x1x32xf32>
    %124 = vector.shape_cast %123 : vector<1x1x32xf32> to vector<1x32xf32>
    %c0_42 = arith.constant 0 : index
    %c0_43 = arith.constant 0 : index
    %c0_44 = arith.constant 0 : index
    %125 = vector.load %arg9[%c0_42, %c0_43, %c0_44] : memref<1x1x32xf32, #tpu.memory_space<vmem>>, vector<1x1x32xf32>
    %126 = vector.shape_cast %125 : vector<1x1x32xf32> to vector<1x32xf32>
    %cst_45 = arith.constant dense<0.000000e+00> : vector<8xf32>
    %127 = vector.multi_reduction <add>, %122, %cst_45 [1] : vector<8x32xf32> to vector<8xf32>
    %128 = vector.shape_cast %127 : vector<8xf32> to vector<8x1xf32>
    %cst_46 = arith.constant 3.200000e+01 : f32
    %129 = vector.broadcast %cst_46 : f32 to vector<8x1xf32>
    %130 = arith.divf %128, %129 : vector<8x1xf32>
    %131 = vector.broadcast %130 : vector<8x1xf32> to vector<8x32xf32>
    %132 = arith.subf %122, %131 : vector<8x32xf32>
    %133 = arith.mulf %132, %132 : vector<8x32xf32>
    %cst_47 = arith.constant dense<0.000000e+00> : vector<8xf32>
    %134 = vector.multi_reduction <add>, %133, %cst_47 [1] : vector<8x32xf32> to vector<8xf32>
    %135 = vector.shape_cast %134 : vector<8xf32> to vector<8x1xf32>
    %cst_48 = arith.constant 3.200000e+01 : f32
    %136 = vector.broadcast %cst_48 : f32 to vector<8x1xf32>
    %137 = arith.divf %135, %136 : vector<8x1xf32>
    %138 = vector.broadcast %130 : vector<8x1xf32> to vector<8x32xf32>
    %139 = arith.subf %122, %138 : vector<8x32xf32>
    %cst_49 = arith.constant 9.99999996E-13 : f32
    %140 = vector.broadcast %cst_49 : f32 to vector<8x1xf32>
    %141 = arith.addf %137, %140 : vector<8x1xf32>
    %142 = math.rsqrt %141 : vector<8x1xf32>
    %143 = vector.broadcast %142 : vector<8x1xf32> to vector<8x32xf32>
    %144 = arith.mulf %139, %143 : vector<8x32xf32>
    %145 = vector.broadcast %124 : vector<1x32xf32> to vector<8x32xf32>
    %146 = arith.mulf %144, %145 : vector<8x32xf32>
    %147 = vector.broadcast %126 : vector<1x32xf32> to vector<8x32xf32>
    %148 = arith.addf %146, %147 : vector<8x32xf32>
    %149 = arith.truncf %148 : vector<8x32xf32> to vector<8x32xbf16>
    %c0_50 = arith.constant 0 : index
    %c0_51 = arith.constant 0 : index
    %c0_52 = arith.constant 0 : index
    %150 = vector.load %arg10[%c0_50, %c0_51, %c0_52] : memref<1x32x64xbf16, #tpu.memory_space<vmem>>, vector<1x32x64xbf16>
    %151 = vector.shape_cast %150 : vector<1x32x64xbf16> to vector<32x64xbf16>
    %cst_53 = arith.constant dense<0.000000e+00> : vector<8x64xf32>
    %152 = tpu.matmul %149, %151, %cst_53 {dimension_numbers = #tpu.dot_dimension_numbers<[1], [0], [0], [1], [0, 0, 1, 1], [], []>} : vector<8x32xbf16>, vector<32x64xbf16>, vector<8x64xf32> -> vector<8x64xf32>
    %c0_54 = arith.constant 0 : index
    %c0_55 = arith.constant 0 : index
    %c0_56 = arith.constant 0 : index
    %153 = vector.load %arg11[%c0_54, %c0_55, %c0_56] : memref<1x1x64xf32, #tpu.memory_space<vmem>>, vector<1x1x64xf32>
    %154 = vector.shape_cast %153 : vector<1x1x64xf32> to vector<1x64xf32>
    %155 = vector.broadcast %154 : vector<1x64xf32> to vector<8x64xf32>
    %156 = arith.addf %152, %155 : vector<8x64xf32>
    %cst_57 = arith.constant 0.000000e+00 : f32
    %157 = vector.broadcast %cst_57 : f32 to vector<8x64xf32>
    %158 = arith.maximumf %156, %157 : vector<8x64xf32>
    %159 = arith.truncf %158 : vector<8x64xf32> to vector<8x64xbf16>
    %c0_58 = arith.constant 0 : index
    %c0_59 = arith.constant 0 : index
    %c0_60 = arith.constant 0 : index
    %160 = vector.load %arg12[%c0_58, %c0_59, %c0_60] : memref<1x64x32xbf16, #tpu.memory_space<vmem>>, vector<1x64x32xbf16>
    %161 = vector.shape_cast %160 : vector<1x64x32xbf16> to vector<64x32xbf16>
    %cst_61 = arith.constant dense<0.000000e+00> : vector<8x32xf32>
    %162 = tpu.matmul %159, %161, %cst_61 {dimension_numbers = #tpu.dot_dimension_numbers<[1], [0], [0], [1], [0, 0, 1, 1], [], []>} : vector<8x64xbf16>, vector<64x32xbf16>, vector<8x32xf32> -> vector<8x32xf32>
    %c0_62 = arith.constant 0 : index
    %c0_63 = arith.constant 0 : index
    %c0_64 = arith.constant 0 : index
    %163 = vector.load %arg13[%c0_62, %c0_63, %c0_64] : memref<1x1x32xf32, #tpu.memory_space<vmem>>, vector<1x1x32xf32>
    %164 = vector.shape_cast %163 : vector<1x1x32xf32> to vector<1x32xf32>
    %165 = vector.broadcast %164 : vector<1x32xf32> to vector<8x32xf32>
    %166 = arith.addf %162, %165 : vector<8x32xf32>
    %167 = arith.addf %166, %148 : vector<8x32xf32>
    %c0_65 = arith.constant 0 : index
    %c0_66 = arith.constant 0 : index
    %c0_67 = arith.constant 0 : index
    %168 = vector.load %arg14[%c0_65, %c0_66, %c0_67] : memref<1x1x32xf32, #tpu.memory_space<vmem>>, vector<1x1x32xf32>
    %169 = vector.shape_cast %168 : vector<1x1x32xf32> to vector<1x32xf32>
    %c0_68 = arith.constant 0 : index
    %c0_69 = arith.constant 0 : index
    %c0_70 = arith.constant 0 : index
    %170 = vector.load %arg15[%c0_68, %c0_69, %c0_70] : memref<1x1x32xf32, #tpu.memory_space<vmem>>, vector<1x1x32xf32>
    %171 = vector.shape_cast %170 : vector<1x1x32xf32> to vector<1x32xf32>
    %cst_71 = arith.constant dense<0.000000e+00> : vector<8xf32>
    %172 = vector.multi_reduction <add>, %167, %cst_71 [1] : vector<8x32xf32> to vector<8xf32>
    %173 = vector.shape_cast %172 : vector<8xf32> to vector<8x1xf32>
    %cst_72 = arith.constant 3.200000e+01 : f32
    %174 = vector.broadcast %cst_72 : f32 to vector<8x1xf32>
    %175 = arith.divf %173, %174 : vector<8x1xf32>
    %176 = vector.broadcast %175 : vector<8x1xf32> to vector<8x32xf32>
    %177 = arith.subf %167, %176 : vector<8x32xf32>
    %178 = arith.mulf %177, %177 : vector<8x32xf32>
    %cst_73 = arith.constant dense<0.000000e+00> : vector<8xf32>
    %179 = vector.multi_reduction <add>, %178, %cst_73 [1] : vector<8x32xf32> to vector<8xf32>
    %180 = vector.shape_cast %179 : vector<8xf32> to vector<8x1xf32>
    %cst_74 = arith.constant 3.200000e+01 : f32
    %181 = vector.broadcast %cst_74 : f32 to vector<8x1xf32>
    %182 = arith.divf %180, %181 : vector<8x1xf32>
    %183 = vector.broadcast %175 : vector<8x1xf32> to vector<8x32xf32>
    %184 = arith.subf %167, %183 : vector<8x32xf32>
    %cst_75 = arith.constant 9.99999996E-13 : f32
    %185 = vector.broadcast %cst_75 : f32 to vector<8x1xf32>
    %186 = arith.addf %182, %185 : vector<8x1xf32>
    %187 = math.rsqrt %186 : vector<8x1xf32>
    %188 = vector.broadcast %187 : vector<8x1xf32> to vector<8x32xf32>
    %189 = arith.mulf %184, %188 : vector<8x32xf32>
    %190 = vector.broadcast %169 : vector<1x32xf32> to vector<8x32xf32>
    %191 = arith.mulf %189, %190 : vector<8x32xf32>
    %192 = vector.broadcast %171 : vector<1x32xf32> to vector<8x32xf32>
    %193 = arith.addf %191, %192 : vector<8x32xf32>
    %c0_76 = arith.constant 0 : index
    %c0_77 = arith.constant 0 : index
    %194 = vector.load %arg17[%c0_76, %c0_77] : memref<8x32xf32, #tpu.memory_space<vmem>>, vector<8x32xf32>
    tpu.vector_store %arg17[%c0_76, %c0_77], %193 {strides = array<i32>} : memref<8x32xf32, #tpu.memory_space<vmem>>, vector<8x32xf32>,
    %c1_i32 = arith.constant 1 : i32
    %195 = arith.cmpi eq, %arg1, %c1_i32 : i32
    %196 = arith.extui %195 : i1 to i32
    %c0_i32_78 = arith.constant 0 : i32
    %197 = arith.cmpi ne, %196, %c0_i32_78 : i32
    scf.if %197 {
      %c0_79 = arith.constant 0 : index
      %c0_80 = arith.constant 0 : index
      %c0_81 = arith.constant 0 : index
      %198 = vector.load %arg16[%c0_79, %c0_80, %c0_81] : memref<1x8x32xf32, #tpu.memory_space<vmem>>, vector<1x8x32xf32>
      %199 = vector.shape_cast %198 : vector<1x8x32xf32> to vector<8x32xf32>
      %200 = vector.shape_cast %193 : vector<8x32xf32> to vector<1x8x32xf32>
      tpu.vector_store %arg16[%c0_79, %c0_80, %c0_81], %200 {strides = array<i32>} : memref<1x8x32xf32, #tpu.memory_space<vmem>>, vector<1x8x32xf32>,
    } else {
    }
    return
  }
  func.func @transform_0(%arg0: i32, %arg1: i32) -> (i32, i32, i32) {
    %c0_i32 = arith.constant 0 : i32
    %c0_i32_0 = arith.constant 0 : i32
    %c0_i32_1 = arith.constant 0 : i32
    return %arg0, %c0_i32, %c0_i32_0 : i32, i32, i32
  }
  func.func @transform_1(%arg0: i32, %arg1: i32) -> (i32, i32, i32) {
    %c0_i32 = arith.constant 0 : i32
    %c0_i32_0 = arith.constant 0 : i32
    %c0_i32_1 = arith.constant 0 : i32
    return %arg0, %c0_i32, %c0_i32_0 : i32, i32, i32
  }
  func.func @transform_2(%arg0: i32, %arg1: i32) -> (i32, i32, i32) {
    %c0_i32 = arith.constant 0 : i32
    %c0_i32_0 = arith.constant 0 : i32
    %c0_i32_1 = arith.constant 0 : i32
    return %arg1, %c0_i32, %c0_i32_0 : i32, i32, i32
  }
  func.func @transform_3(%arg0: i32, %arg1: i32) -> (i32, i32, i32) {
    %c0_i32 = arith.constant 0 : i32
    %c0_i32_0 = arith.constant 0 : i32
    %c0_i32_1 = arith.constant 0 : i32
    return %arg1, %c0_i32, %c0_i32_0 : i32, i32, i32
  }
  func.func @transform_4(%arg0: i32, %arg1: i32) -> (i32, i32, i32) {
    %c0_i32 = arith.constant 0 : i32
    %c0_i32_0 = arith.constant 0 : i32
    %c0_i32_1 = arith.constant 0 : i32
    return %arg1, %c0_i32, %c0_i32_0 : i32, i32, i32
  }
  func.func @transform_5(%arg0: i32, %arg1: i32) -> (i32, i32, i32) {
    %c0_i32 = arith.constant 0 : i32
    %c0_i32_0 = arith.constant 0 : i32
    %c0_i32_1 = arith.constant 0 : i32
    return %arg1, %c0_i32, %c0_i32_0 : i32, i32, i32
  }
  func.func @transform_6(%arg0: i32, %arg1: i32) -> (i32, i32, i32) {
    %c0_i32 = arith.constant 0 : i32
    %c0_i32_0 = arith.constant 0 : i32
    %c0_i32_1 = arith.constant 0 : i32
    return %arg1, %c0_i32, %c0_i32_0 : i32, i32, i32
  }
  func.func @transform_7(%arg0: i32, %arg1: i32) -> (i32, i32, i32) {
    %c0_i32 = arith.constant 0 : i32
    %c0_i32_0 = arith.constant 0 : i32
    %c0_i32_1 = arith.constant 0 : i32
    return %arg1, %c0_i32, %c0_i32_0 : i32, i32, i32
  }
  func.func @transform_8(%arg0: i32, %arg1: i32) -> (i32, i32, i32) {
    %c0_i32 = arith.constant 0 : i32
    %c0_i32_0 = arith.constant 0 : i32
    %c0_i32_1 = arith.constant 0 : i32
    return %arg1, %c0_i32, %c0_i32_0 : i32, i32, i32
  }
  func.func @transform_9(%arg0: i32, %arg1: i32) -> (i32, i32, i32) {
    %c0_i32 = arith.constant 0 : i32
    %c0_i32_0 = arith.constant 0 : i32
    %c0_i32_1 = arith.constant 0 : i32
    return %arg1, %c0_i32, %c0_i32_0 : i32, i32, i32
  }
  func.func @transform_10(%arg0: i32, %arg1: i32) -> (i32, i32, i32) {
    %c0_i32 = arith.constant 0 : i32
    %c0_i32_0 = arith.constant 0 : i32
    %c0_i32_1 = arith.constant 0 : i32
    return %arg1, %c0_i32, %c0_i32_0 : i32, i32, i32
  }
  func.func @transform_11(%arg0: i32, %arg1: i32) -> (i32, i32, i32) {
    %c0_i32 = arith.constant 0 : i32
    %c0_i32_0 = arith.constant 0 : i32
    %c0_i32_1 = arith.constant 0 : i32
    return %arg1, %c0_i32, %c0_i32_0 : i32, i32, i32
  }
  func.func @transform_12(%arg0: i32, %arg1: i32) -> (i32, i32, i32) {
    %c0_i32 = arith.constant 0 : i32
    %c0_i32_0 = arith.constant 0 : i32
    %c0_i32_1 = arith.constant 0 : i32
    return %arg1, %c0_i32, %c0_i32_0 : i32, i32, i32
  }
  func.func @transform_13(%arg0: i32, %arg1: i32) -> (i32, i32, i32) {
    %c0_i32 = arith.constant 0 : i32
    %c0_i32_0 = arith.constant 0 : i32
    %c0_i32_1 = arith.constant 0 : i32
    return %arg1, %c0_i32, %c0_i32_0 : i32, i32, i32
  }
  func.func @transform_14(%arg0: i32, %arg1: i32) -> (i32, i32, i32) {
    %c0_i32 = arith.constant 0 : i32
    %c0_i32_0 = arith.constant 0 : i32
    %c0_i32_1 = arith.constant 0 : i32
    return %arg0, %c0_i32, %c0_i32_0 : i32, i32, i32
  }
}

module attributes {stable_mosaic.version = 11 : i64} {
  func.func @_decoder_stack_kernel(%arg0: i32, %arg1: i32, %arg2: memref<1x8x32xf32, #tpu.memory_space<vmem>>, %arg3: memref<1x8x32xf32, #tpu.memory_space<vmem>>, %arg4: memref<1x8x8xf32, #tpu.memory_space<vmem>>, %arg5: memref<1x8x8xf32, #tpu.memory_space<vmem>>, %arg6: memref<1x32x96xbf16, #tpu.memory_space<vmem>>, %arg7: memref<1x1x96xf32, #tpu.memory_space<vmem>>, %arg8: memref<1x32x32xbf16, #tpu.memory_space<vmem>>, %arg9: memref<1x1x32xf32, #tpu.memory_space<vmem>>, %arg10: memref<1x1x32xf32, #tpu.memory_space<vmem>>, %arg11: memref<1x1x32xf32, #tpu.memory_space<vmem>>, %arg12: memref<1x32x32xbf16, #tpu.memory_space<vmem>>, %arg13: memref<1x1x32xf32, #tpu.memory_space<vmem>>, %arg14: memref<1x32x64xbf16, #tpu.memory_space<vmem>>, %arg15: memref<1x1x64xf32, #tpu.memory_space<vmem>>, %arg16: memref<1x32x32xbf16, #tpu.memory_space<vmem>>, %arg17: memref<1x1x32xf32, #tpu.memory_space<vmem>>, %arg18: memref<1x1x32xf32, #tpu.memory_space<vmem>>, %arg19: memref<1x1x32xf32, #tpu.memory_space<vmem>>, %arg20: memref<1x32x64xbf16, #tpu.memory_space<vmem>>, %arg21: memref<1x1x64xf32, #tpu.memory_space<vmem>>, %arg22: memref<1x64x32xbf16, #tpu.memory_space<vmem>>, %arg23: memref<1x1x32xf32, #tpu.memory_space<vmem>>, %arg24: memref<1x1x32xf32, #tpu.memory_space<vmem>>, %arg25: memref<1x1x32xf32, #tpu.memory_space<vmem>>, %arg26: memref<32x128xbf16, #tpu.memory_space<vmem>>, %arg27: memref<1x128xf32, #tpu.memory_space<vmem>>, %arg28: memref<1x8x128xf32, #tpu.memory_space<vmem>>, %arg29: memref<8x32xf32, #tpu.memory_space<vmem>>) attributes {dimension_semantics = [#tpu.dimension_semantics<parallel>, #tpu.dimension_semantics<arbitrary>], iteration_bounds = array<i64: 2, 2>, scalar_prefetch = 0 : i64, scratch_operands = 1 : i64, tpu.core_type = #tpu.core_type<tc>, window_params = [{transform_indices = @transform_0, window_bounds = array<i64: 1, 8, 32>}, {transform_indices = @transform_1, window_bounds = array<i64: 1, 8, 32>}, {transform_indices = @transform_2, window_bounds = array<i64: 1, 8, 8>}, {transform_indices = @transform_3, window_bounds = array<i64: 1, 8, 8>}, {transform_indices = @transform_4, window_bounds = array<i64: 1, 32, 96>}, {transform_indices = @transform_5, window_bounds = array<i64: 1, 1, 96>}, {transform_indices = @transform_6, window_bounds = array<i64: 1, 32, 32>}, {transform_indices = @transform_7, window_bounds = array<i64: 1, 1, 32>}, {transform_indices = @transform_8, window_bounds = array<i64: 1, 1, 32>}, {transform_indices = @transform_9, window_bounds = array<i64: 1, 1, 32>}, {transform_indices = @transform_10, window_bounds = array<i64: 1, 32, 32>}, {transform_indices = @transform_11, window_bounds = array<i64: 1, 1, 32>}, {transform_indices = @transform_12, window_bounds = array<i64: 1, 32, 64>}, {transform_indices = @transform_13, window_bounds = array<i64: 1, 1, 64>}, {transform_indices = @transform_14, window_bounds = array<i64: 1, 32, 32>}, {transform_indices = @transform_15, window_bounds = array<i64: 1, 1, 32>}, {transform_indices = @transform_16, window_bounds = array<i64: 1, 1, 32>}, {transform_indices = @transform_17, window_bounds = array<i64: 1, 1, 32>}, {transform_indices = @transform_18, window_bounds = array<i64: 1, 32, 64>}, {transform_indices = @transform_19, window_bounds = array<i64: 1, 1, 64>}, {transform_indices = @transform_20, window_bounds = array<i64: 1, 64, 32>}, {transform_indices = @transform_21, window_bounds = array<i64: 1, 1, 32>}, {transform_indices = @transform_22, window_bounds = array<i64: 1, 1, 32>}, {transform_indices = @transform_23, window_bounds = array<i64: 1, 1, 32>}, {pipeline_mode = #tpu.pipeline_mode<synchronous>, transform_indices = @transform_24, window_bounds = array<i64: 32, 128>}, {pipeline_mode = #tpu.pipeline_mode<synchronous>, transform_indices = @transform_25, window_bounds = array<i64: 1, 128>}, {transform_indices = @transform_26, window_bounds = array<i64: 1, 8, 128>}]} {
    %c0_i32 = arith.constant 0 : i32
    %0 = arith.cmpi eq, %arg1, %c0_i32 : i32
    %1 = arith.extui %0 : i1 to i32
    %c0_i32_0 = arith.constant 0 : i32
    %2 = arith.cmpi ne, %1, %c0_i32_0 : i32
    scf.if %2 {
      %c0_138 = arith.constant 0 : index
      %c0_139 = arith.constant 0 : index
      %c0_140 = arith.constant 0 : index
      %352 = vector.load %arg2[%c0_138, %c0_139, %c0_140] : memref<1x8x32xf32, #tpu.memory_space<vmem>>, vector<1x8x32xf32>
      %353 = vector.shape_cast %352 : vector<1x8x32xf32> to vector<8x32xf32>
      %c0_141 = arith.constant 0 : index
      %c0_142 = arith.constant 0 : index
      %354 = vector.load %arg29[%c0_141, %c0_142] : memref<8x32xf32, #tpu.memory_space<vmem>>, vector<8x32xf32>
      tpu.vector_store %arg29[%c0_141, %c0_142], %353 {strides = array<i32>} : memref<8x32xf32, #tpu.memory_space<vmem>>, vector<8x32xf32>,
    } else {
    }
    %c0 = arith.constant 0 : index
    %c0_1 = arith.constant 0 : index
    %3 = vector.load %arg29[%c0, %c0_1] : memref<8x32xf32, #tpu.memory_space<vmem>>, vector<8x32xf32>
    %c0_2 = arith.constant 0 : index
    %c0_3 = arith.constant 0 : index
    %c0_4 = arith.constant 0 : index
    %4 = vector.load %arg3[%c0_2, %c0_3, %c0_4] : memref<1x8x32xf32, #tpu.memory_space<vmem>>, vector<1x8x32xf32>
    %5 = vector.shape_cast %4 : vector<1x8x32xf32> to vector<8x32xf32>
    %6 = arith.truncf %3 : vector<8x32xf32> to vector<8x32xbf16>
    %c0_5 = arith.constant 0 : index
    %c0_6 = arith.constant 0 : index
    %c0_7 = arith.constant 0 : index
    %7 = vector.load %arg6[%c0_5, %c0_6, %c0_7] : memref<1x32x96xbf16, #tpu.memory_space<vmem>>, vector<1x32x96xbf16>
    %8 = vector.shape_cast %7 : vector<1x32x96xbf16> to vector<32x96xbf16>
    %cst = arith.constant dense<0.000000e+00> : vector<8x96xf32>
    %9 = tpu.matmul %6, %8, %cst {dimension_numbers = #tpu.dot_dimension_numbers<[1], [0], [0], [1], [0, 0, 1, 1], [], []>} : vector<8x32xbf16>, vector<32x96xbf16>, vector<8x96xf32> -> vector<8x96xf32>
    %c0_8 = arith.constant 0 : index
    %c0_9 = arith.constant 0 : index
    %c0_10 = arith.constant 0 : index
    %10 = vector.load %arg7[%c0_8, %c0_9, %c0_10] : memref<1x1x96xf32, #tpu.memory_space<vmem>>, vector<1x1x96xf32>
    %11 = vector.shape_cast %10 : vector<1x1x96xf32> to vector<1x96xf32>
    %12 = vector.broadcast %11 : vector<1x96xf32> to vector<8x96xf32>
    %13 = arith.addf %9, %12 : vector<8x96xf32>
    %14 = vector.extract_strided_slice %13 {offsets = [0, 0], sizes = [8, 32], strides = [1, 1]} : vector<8x96xf32> to vector<8x32xf32>
    %15 = vector.extract_strided_slice %13 {offsets = [0, 32], sizes = [8, 32], strides = [1, 1]} : vector<8x96xf32> to vector<8x32xf32>
    %16 = vector.extract_strided_slice %13 {offsets = [0, 64], sizes = [8, 32], strides = [1, 1]} : vector<8x96xf32> to vector<8x32xf32>
    %c0_11 = arith.constant 0 : index
    %c0_12 = arith.constant 0 : index
    %c0_13 = arith.constant 0 : index
    %17 = vector.load %arg4[%c0_11, %c0_12, %c0_13] : memref<1x8x8xf32, #tpu.memory_space<vmem>>, vector<1x8x8xf32>
    %18 = vector.shape_cast %17 : vector<1x8x8xf32> to vector<8x8xf32>
    %c0_14 = arith.constant 0 : index
    %c0_15 = arith.constant 0 : index
    %c0_16 = arith.constant 0 : index
    %19 = vector.load %arg8[%c0_14, %c0_15, %c0_16] : memref<1x32x32xbf16, #tpu.memory_space<vmem>>, vector<1x32x32xbf16>
    %20 = vector.shape_cast %19 : vector<1x32x32xbf16> to vector<32x32xbf16>
    %c0_17 = arith.constant 0 : index
    %c0_18 = arith.constant 0 : index
    %c0_19 = arith.constant 0 : index
    %21 = vector.load %arg9[%c0_17, %c0_18, %c0_19] : memref<1x1x32xf32, #tpu.memory_space<vmem>>, vector<1x1x32xf32>
    %22 = vector.shape_cast %21 : vector<1x1x32xf32> to vector<1x32xf32>
    %cst_20 = arith.constant 0.353553385 : f32
    %23 = vector.broadcast %cst_20 : f32 to vector<8x32xf32>
    %24 = arith.mulf %14, %23 : vector<8x32xf32>
    %cst_21 = arith.constant 0.000000e+00 : f32
    %25 = vector.broadcast %cst_21 : f32 to vector<8x32xf32>
    %26 = vector.extract_strided_slice %24 {offsets = [0, 0], sizes = [8, 8], strides = [1, 1]} : vector<8x32xf32> to vector<8x8xf32>
    %27 = arith.truncf %26 : vector<8x8xf32> to vector<8x8xbf16>
    %28 = vector.extract_strided_slice %15 {offsets = [0, 0], sizes = [8, 8], strides = [1, 1]} : vector<8x32xf32> to vector<8x8xf32>
    %29 = arith.truncf %28 : vector<8x8xf32> to vector<8x8xbf16>
    %30 = vector.extract_strided_slice %16 {offsets = [0, 0], sizes = [8, 8], strides = [1, 1]} : vector<8x32xf32> to vector<8x8xf32>
    %31 = arith.truncf %30 : vector<8x8xf32> to vector<8x8xbf16>
    %cst_22 = arith.constant dense<0.000000e+00> : vector<8x8xf32>
    %32 = tpu.matmul %27, %29, %cst_22 {dimension_numbers = #tpu.dot_dimension_numbers<[1], [1], [0], [0], [0, 0, 1, 0], [], []>} : vector<8x8xbf16>, vector<8x8xbf16>, vector<8x8xf32> -> vector<8x8xf32>
    %33 = arith.addf %32, %18 : vector<8x8xf32>
    %cst_23 = arith.constant dense<0xFF800000> : vector<8xf32>
    %34 = vector.multi_reduction <maximumf>, %33, %cst_23 [1] : vector<8x8xf32> to vector<8xf32>
    %35 = vector.shape_cast %34 : vector<8xf32> to vector<8x1xf32>
    %36 = vector.broadcast %35 : vector<8x1xf32> to vector<8x8xf32>
    %37 = arith.subf %33, %36 : vector<8x8xf32>
    %38 = math.exp %37 : vector<8x8xf32>
    %cst_24 = arith.constant dense<0.000000e+00> : vector<8xf32>
    %39 = vector.multi_reduction <add>, %38, %cst_24 [1] : vector<8x8xf32> to vector<8xf32>
    %40 = vector.shape_cast %39 : vector<8xf32> to vector<8x1xf32>
    %41 = tpu.reciprocal %40 {approx = true} : vector<8x1xf32> -> vector<8x1xf32>
    %42 = vector.broadcast %41 : vector<8x1xf32> to vector<8x8xf32>
    %43 = arith.mulf %38, %42 : vector<8x8xf32>
    %44 = arith.truncf %43 : vector<8x8xf32> to vector<8x8xbf16>
    %cst_25 = arith.constant dense<0.000000e+00> : vector<8x8xf32>
    %45 = tpu.matmul %44, %31, %cst_25 {dimension_numbers = #tpu.dot_dimension_numbers<[1], [0], [0], [1], [0, 0, 1, 1], [], []>} : vector<8x8xbf16>, vector<8x8xbf16>, vector<8x8xf32> -> vector<8x8xf32>
    %46 = arith.truncf %45 : vector<8x8xf32> to vector<8x8xbf16>
    %47 = vector.extract_strided_slice %20 {offsets = [0, 0], sizes = [8, 32], strides = [1, 1]} : vector<32x32xbf16> to vector<8x32xbf16>
    %cst_26 = arith.constant dense<0.000000e+00> : vector<8x32xf32>
    %48 = tpu.matmul %46, %47, %cst_26 {dimension_numbers = #tpu.dot_dimension_numbers<[1], [0], [0], [1], [0, 0, 1, 1], [], []>} : vector<8x8xbf16>, vector<8x32xbf16>, vector<8x32xf32> -> vector<8x32xf32>
    %49 = arith.addf %25, %48 : vector<8x32xf32>
    %50 = vector.extract_strided_slice %24 {offsets = [0, 8], sizes = [8, 8], strides = [1, 1]} : vector<8x32xf32> to vector<8x8xf32>
    %51 = arith.truncf %50 : vector<8x8xf32> to vector<8x8xbf16>
    %52 = vector.extract_strided_slice %15 {offsets = [0, 8], sizes = [8, 8], strides = [1, 1]} : vector<8x32xf32> to vector<8x8xf32>
    %53 = arith.truncf %52 : vector<8x8xf32> to vector<8x8xbf16>
    %54 = vector.extract_strided_slice %16 {offsets = [0, 8], sizes = [8, 8], strides = [1, 1]} : vector<8x32xf32> to vector<8x8xf32>
    %55 = arith.truncf %54 : vector<8x8xf32> to vector<8x8xbf16>
    %cst_27 = arith.constant dense<0.000000e+00> : vector<8x8xf32>
    %56 = tpu.matmul %51, %53, %cst_27 {dimension_numbers = #tpu.dot_dimension_numbers<[1], [1], [0], [0], [0, 0, 1, 0], [], []>} : vector<8x8xbf16>, vector<8x8xbf16>, vector<8x8xf32> -> vector<8x8xf32>
    %57 = arith.addf %56, %18 : vector<8x8xf32>
    %cst_28 = arith.constant dense<0xFF800000> : vector<8xf32>
    %58 = vector.multi_reduction <maximumf>, %57, %cst_28 [1] : vector<8x8xf32> to vector<8xf32>
    %59 = vector.shape_cast %58 : vector<8xf32> to vector<8x1xf32>
    %60 = vector.broadcast %59 : vector<8x1xf32> to vector<8x8xf32>
    %61 = arith.subf %57, %60 : vector<8x8xf32>
    %62 = math.exp %61 : vector<8x8xf32>
    %cst_29 = arith.constant dense<0.000000e+00> : vector<8xf32>
    %63 = vector.multi_reduction <add>, %62, %cst_29 [1] : vector<8x8xf32> to vector<8xf32>
    %64 = vector.shape_cast %63 : vector<8xf32> to vector<8x1xf32>
    %65 = tpu.reciprocal %64 {approx = true} : vector<8x1xf32> -> vector<8x1xf32>
    %66 = vector.broadcast %65 : vector<8x1xf32> to vector<8x8xf32>
    %67 = arith.mulf %62, %66 : vector<8x8xf32>
    %68 = arith.truncf %67 : vector<8x8xf32> to vector<8x8xbf16>
    %cst_30 = arith.constant dense<0.000000e+00> : vector<8x8xf32>
    %69 = tpu.matmul %68, %55, %cst_30 {dimension_numbers = #tpu.dot_dimension_numbers<[1], [0], [0], [1], [0, 0, 1, 1], [], []>} : vector<8x8xbf16>, vector<8x8xbf16>, vector<8x8xf32> -> vector<8x8xf32>
    %70 = arith.truncf %69 : vector<8x8xf32> to vector<8x8xbf16>
    %71 = vector.extract_strided_slice %20 {offsets = [8, 0], sizes = [8, 32], strides = [1, 1]} : vector<32x32xbf16> to vector<8x32xbf16>
    %cst_31 = arith.constant dense<0.000000e+00> : vector<8x32xf32>
    %72 = tpu.matmul %70, %71, %cst_31 {dimension_numbers = #tpu.dot_dimension_numbers<[1], [0], [0], [1], [0, 0, 1, 1], [], []>} : vector<8x8xbf16>, vector<8x32xbf16>, vector<8x32xf32> -> vector<8x32xf32>
    %73 = arith.addf %49, %72 : vector<8x32xf32>
    %74 = vector.extract_strided_slice %24 {offsets = [0, 16], sizes = [8, 8], strides = [1, 1]} : vector<8x32xf32> to vector<8x8xf32>
    %75 = arith.truncf %74 : vector<8x8xf32> to vector<8x8xbf16>
    %76 = vector.extract_strided_slice %15 {offsets = [0, 16], sizes = [8, 8], strides = [1, 1]} : vector<8x32xf32> to vector<8x8xf32>
    %77 = arith.truncf %76 : vector<8x8xf32> to vector<8x8xbf16>
    %78 = vector.extract_strided_slice %16 {offsets = [0, 16], sizes = [8, 8], strides = [1, 1]} : vector<8x32xf32> to vector<8x8xf32>
    %79 = arith.truncf %78 : vector<8x8xf32> to vector<8x8xbf16>
    %cst_32 = arith.constant dense<0.000000e+00> : vector<8x8xf32>
    %80 = tpu.matmul %75, %77, %cst_32 {dimension_numbers = #tpu.dot_dimension_numbers<[1], [1], [0], [0], [0, 0, 1, 0], [], []>} : vector<8x8xbf16>, vector<8x8xbf16>, vector<8x8xf32> -> vector<8x8xf32>
    %81 = arith.addf %80, %18 : vector<8x8xf32>
    %cst_33 = arith.constant dense<0xFF800000> : vector<8xf32>
    %82 = vector.multi_reduction <maximumf>, %81, %cst_33 [1] : vector<8x8xf32> to vector<8xf32>
    %83 = vector.shape_cast %82 : vector<8xf32> to vector<8x1xf32>
    %84 = vector.broadcast %83 : vector<8x1xf32> to vector<8x8xf32>
    %85 = arith.subf %81, %84 : vector<8x8xf32>
    %86 = math.exp %85 : vector<8x8xf32>
    %cst_34 = arith.constant dense<0.000000e+00> : vector<8xf32>
    %87 = vector.multi_reduction <add>, %86, %cst_34 [1] : vector<8x8xf32> to vector<8xf32>
    %88 = vector.shape_cast %87 : vector<8xf32> to vector<8x1xf32>
    %89 = tpu.reciprocal %88 {approx = true} : vector<8x1xf32> -> vector<8x1xf32>
    %90 = vector.broadcast %89 : vector<8x1xf32> to vector<8x8xf32>
    %91 = arith.mulf %86, %90 : vector<8x8xf32>
    %92 = arith.truncf %91 : vector<8x8xf32> to vector<8x8xbf16>
    %cst_35 = arith.constant dense<0.000000e+00> : vector<8x8xf32>
    %93 = tpu.matmul %92, %79, %cst_35 {dimension_numbers = #tpu.dot_dimension_numbers<[1], [0], [0], [1], [0, 0, 1, 1], [], []>} : vector<8x8xbf16>, vector<8x8xbf16>, vector<8x8xf32> -> vector<8x8xf32>
    %94 = arith.truncf %93 : vector<8x8xf32> to vector<8x8xbf16>
    %95 = vector.extract_strided_slice %20 {offsets = [16, 0], sizes = [8, 32], strides = [1, 1]} : vector<32x32xbf16> to vector<8x32xbf16>
    %cst_36 = arith.constant dense<0.000000e+00> : vector<8x32xf32>
    %96 = tpu.matmul %94, %95, %cst_36 {dimension_numbers = #tpu.dot_dimension_numbers<[1], [0], [0], [1], [0, 0, 1, 1], [], []>} : vector<8x8xbf16>, vector<8x32xbf16>, vector<8x32xf32> -> vector<8x32xf32>
    %97 = arith.addf %73, %96 : vector<8x32xf32>
    %98 = vector.extract_strided_slice %24 {offsets = [0, 24], sizes = [8, 8], strides = [1, 1]} : vector<8x32xf32> to vector<8x8xf32>
    %99 = arith.truncf %98 : vector<8x8xf32> to vector<8x8xbf16>
    %100 = vector.extract_strided_slice %15 {offsets = [0, 24], sizes = [8, 8], strides = [1, 1]} : vector<8x32xf32> to vector<8x8xf32>
    %101 = arith.truncf %100 : vector<8x8xf32> to vector<8x8xbf16>
    %102 = vector.extract_strided_slice %16 {offsets = [0, 24], sizes = [8, 8], strides = [1, 1]} : vector<8x32xf32> to vector<8x8xf32>
    %103 = arith.truncf %102 : vector<8x8xf32> to vector<8x8xbf16>
    %cst_37 = arith.constant dense<0.000000e+00> : vector<8x8xf32>
    %104 = tpu.matmul %99, %101, %cst_37 {dimension_numbers = #tpu.dot_dimension_numbers<[1], [1], [0], [0], [0, 0, 1, 0], [], []>} : vector<8x8xbf16>, vector<8x8xbf16>, vector<8x8xf32> -> vector<8x8xf32>
    %105 = arith.addf %104, %18 : vector<8x8xf32>
    %cst_38 = arith.constant dense<0xFF800000> : vector<8xf32>
    %106 = vector.multi_reduction <maximumf>, %105, %cst_38 [1] : vector<8x8xf32> to vector<8xf32>
    %107 = vector.shape_cast %106 : vector<8xf32> to vector<8x1xf32>
    %108 = vector.broadcast %107 : vector<8x1xf32> to vector<8x8xf32>
    %109 = arith.subf %105, %108 : vector<8x8xf32>
    %110 = math.exp %109 : vector<8x8xf32>
    %cst_39 = arith.constant dense<0.000000e+00> : vector<8xf32>
    %111 = vector.multi_reduction <add>, %110, %cst_39 [1] : vector<8x8xf32> to vector<8xf32>
    %112 = vector.shape_cast %111 : vector<8xf32> to vector<8x1xf32>
    %113 = tpu.reciprocal %112 {approx = true} : vector<8x1xf32> -> vector<8x1xf32>
    %114 = vector.broadcast %113 : vector<8x1xf32> to vector<8x8xf32>
    %115 = arith.mulf %110, %114 : vector<8x8xf32>
    %116 = arith.truncf %115 : vector<8x8xf32> to vector<8x8xbf16>
    %cst_40 = arith.constant dense<0.000000e+00> : vector<8x8xf32>
    %117 = tpu.matmul %116, %103, %cst_40 {dimension_numbers = #tpu.dot_dimension_numbers<[1], [0], [0], [1], [0, 0, 1, 1], [], []>} : vector<8x8xbf16>, vector<8x8xbf16>, vector<8x8xf32> -> vector<8x8xf32>
    %118 = arith.truncf %117 : vector<8x8xf32> to vector<8x8xbf16>
    %119 = vector.extract_strided_slice %20 {offsets = [24, 0], sizes = [8, 32], strides = [1, 1]} : vector<32x32xbf16> to vector<8x32xbf16>
    %cst_41 = arith.constant dense<0.000000e+00> : vector<8x32xf32>
    %120 = tpu.matmul %118, %119, %cst_41 {dimension_numbers = #tpu.dot_dimension_numbers<[1], [0], [0], [1], [0, 0, 1, 1], [], []>} : vector<8x8xbf16>, vector<8x32xbf16>, vector<8x32xf32> -> vector<8x32xf32>
    %121 = arith.addf %97, %120 : vector<8x32xf32>
    %122 = vector.broadcast %22 : vector<1x32xf32> to vector<8x32xf32>
    %123 = arith.addf %121, %122 : vector<8x32xf32>
    %124 = arith.addf %123, %3 : vector<8x32xf32>
    %c0_42 = arith.constant 0 : index
    %c0_43 = arith.constant 0 : index
    %c0_44 = arith.constant 0 : index
    %125 = vector.load %arg10[%c0_42, %c0_43, %c0_44] : memref<1x1x32xf32, #tpu.memory_space<vmem>>, vector<1x1x32xf32>
    %126 = vector.shape_cast %125 : vector<1x1x32xf32> to vector<1x32xf32>
    %c0_45 = arith.constant 0 : index
    %c0_46 = arith.constant 0 : index
    %c0_47 = arith.constant 0 : index
    %127 = vector.load %arg11[%c0_45, %c0_46, %c0_47] : memref<1x1x32xf32, #tpu.memory_space<vmem>>, vector<1x1x32xf32>
    %128 = vector.shape_cast %127 : vector<1x1x32xf32> to vector<1x32xf32>
    %cst_48 = arith.constant dense<0.000000e+00> : vector<8xf32>
    %129 = vector.multi_reduction <add>, %124, %cst_48 [1] : vector<8x32xf32> to vector<8xf32>
    %130 = vector.shape_cast %129 : vector<8xf32> to vector<8x1xf32>
    %cst_49 = arith.constant 3.200000e+01 : f32
    %131 = vector.broadcast %cst_49 : f32 to vector<8x1xf32>
    %132 = arith.divf %130, %131 : vector<8x1xf32>
    %133 = vector.broadcast %132 : vector<8x1xf32> to vector<8x32xf32>
    %134 = arith.subf %124, %133 : vector<8x32xf32>
    %135 = arith.mulf %134, %134 : vector<8x32xf32>
    %cst_50 = arith.constant dense<0.000000e+00> : vector<8xf32>
    %136 = vector.multi_reduction <add>, %135, %cst_50 [1] : vector<8x32xf32> to vector<8xf32>
    %137 = vector.shape_cast %136 : vector<8xf32> to vector<8x1xf32>
    %cst_51 = arith.constant 3.200000e+01 : f32
    %138 = vector.broadcast %cst_51 : f32 to vector<8x1xf32>
    %139 = arith.divf %137, %138 : vector<8x1xf32>
    %140 = vector.broadcast %132 : vector<8x1xf32> to vector<8x32xf32>
    %141 = arith.subf %124, %140 : vector<8x32xf32>
    %cst_52 = arith.constant 9.99999996E-13 : f32
    %142 = vector.broadcast %cst_52 : f32 to vector<8x1xf32>
    %143 = arith.addf %139, %142 : vector<8x1xf32>
    %144 = math.rsqrt %143 : vector<8x1xf32>
    %145 = vector.broadcast %144 : vector<8x1xf32> to vector<8x32xf32>
    %146 = arith.mulf %141, %145 : vector<8x32xf32>
    %147 = vector.broadcast %126 : vector<1x32xf32> to vector<8x32xf32>
    %148 = arith.mulf %146, %147 : vector<8x32xf32>
    %149 = vector.broadcast %128 : vector<1x32xf32> to vector<8x32xf32>
    %150 = arith.addf %148, %149 : vector<8x32xf32>
    %151 = arith.truncf %150 : vector<8x32xf32> to vector<8x32xbf16>
    %c0_53 = arith.constant 0 : index
    %c0_54 = arith.constant 0 : index
    %c0_55 = arith.constant 0 : index
    %152 = vector.load %arg12[%c0_53, %c0_54, %c0_55] : memref<1x32x32xbf16, #tpu.memory_space<vmem>>, vector<1x32x32xbf16>
    %153 = vector.shape_cast %152 : vector<1x32x32xbf16> to vector<32x32xbf16>
    %cst_56 = arith.constant dense<0.000000e+00> : vector<8x32xf32>
    %154 = tpu.matmul %151, %153, %cst_56 {dimension_numbers = #tpu.dot_dimension_numbers<[1], [0], [0], [1], [0, 0, 1, 1], [], []>} : vector<8x32xbf16>, vector<32x32xbf16>, vector<8x32xf32> -> vector<8x32xf32>
    %c0_57 = arith.constant 0 : index
    %c0_58 = arith.constant 0 : index
    %c0_59 = arith.constant 0 : index
    %155 = vector.load %arg13[%c0_57, %c0_58, %c0_59] : memref<1x1x32xf32, #tpu.memory_space<vmem>>, vector<1x1x32xf32>
    %156 = vector.shape_cast %155 : vector<1x1x32xf32> to vector<1x32xf32>
    %157 = vector.broadcast %156 : vector<1x32xf32> to vector<8x32xf32>
    %158 = arith.addf %154, %157 : vector<8x32xf32>
    %159 = arith.truncf %5 : vector<8x32xf32> to vector<8x32xbf16>
    %c0_60 = arith.constant 0 : index
    %c0_61 = arith.constant 0 : index
    %c0_62 = arith.constant 0 : index
    %160 = vector.load %arg14[%c0_60, %c0_61, %c0_62] : memref<1x32x64xbf16, #tpu.memory_space<vmem>>, vector<1x32x64xbf16>
    %161 = vector.shape_cast %160 : vector<1x32x64xbf16> to vector<32x64xbf16>
    %cst_63 = arith.constant dense<0.000000e+00> : vector<8x64xf32>
    %162 = tpu.matmul %159, %161, %cst_63 {dimension_numbers = #tpu.dot_dimension_numbers<[1], [0], [0], [1], [0, 0, 1, 1], [], []>} : vector<8x32xbf16>, vector<32x64xbf16>, vector<8x64xf32> -> vector<8x64xf32>
    %c0_64 = arith.constant 0 : index
    %c0_65 = arith.constant 0 : index
    %c0_66 = arith.constant 0 : index
    %163 = vector.load %arg15[%c0_64, %c0_65, %c0_66] : memref<1x1x64xf32, #tpu.memory_space<vmem>>, vector<1x1x64xf32>
    %164 = vector.shape_cast %163 : vector<1x1x64xf32> to vector<1x64xf32>
    %165 = vector.broadcast %164 : vector<1x64xf32> to vector<8x64xf32>
    %166 = arith.addf %162, %165 : vector<8x64xf32>
    %167 = vector.extract_strided_slice %166 {offsets = [0, 0], sizes = [8, 32], strides = [1, 1]} : vector<8x64xf32> to vector<8x32xf32>
    %168 = vector.extract_strided_slice %166 {offsets = [0, 32], sizes = [8, 32], strides = [1, 1]} : vector<8x64xf32> to vector<8x32xf32>
    %c0_67 = arith.constant 0 : index
    %c0_68 = arith.constant 0 : index
    %c0_69 = arith.constant 0 : index
    %169 = vector.load %arg5[%c0_67, %c0_68, %c0_69] : memref<1x8x8xf32, #tpu.memory_space<vmem>>, vector<1x8x8xf32>
    %170 = vector.shape_cast %169 : vector<1x8x8xf32> to vector<8x8xf32>
    %c0_70 = arith.constant 0 : index
    %c0_71 = arith.constant 0 : index
    %c0_72 = arith.constant 0 : index
    %171 = vector.load %arg16[%c0_70, %c0_71, %c0_72] : memref<1x32x32xbf16, #tpu.memory_space<vmem>>, vector<1x32x32xbf16>
    %172 = vector.shape_cast %171 : vector<1x32x32xbf16> to vector<32x32xbf16>
    %c0_73 = arith.constant 0 : index
    %c0_74 = arith.constant 0 : index
    %c0_75 = arith.constant 0 : index
    %173 = vector.load %arg17[%c0_73, %c0_74, %c0_75] : memref<1x1x32xf32, #tpu.memory_space<vmem>>, vector<1x1x32xf32>
    %174 = vector.shape_cast %173 : vector<1x1x32xf32> to vector<1x32xf32>
    %cst_76 = arith.constant 0.353553385 : f32
    %175 = vector.broadcast %cst_76 : f32 to vector<8x32xf32>
    %176 = arith.mulf %158, %175 : vector<8x32xf32>
    %cst_77 = arith.constant 0.000000e+00 : f32
    %177 = vector.broadcast %cst_77 : f32 to vector<8x32xf32>
    %178 = vector.extract_strided_slice %176 {offsets = [0, 0], sizes = [8, 8], strides = [1, 1]} : vector<8x32xf32> to vector<8x8xf32>
    %179 = arith.truncf %178 : vector<8x8xf32> to vector<8x8xbf16>
    %180 = vector.extract_strided_slice %167 {offsets = [0, 0], sizes = [8, 8], strides = [1, 1]} : vector<8x32xf32> to vector<8x8xf32>
    %181 = arith.truncf %180 : vector<8x8xf32> to vector<8x8xbf16>
    %182 = vector.extract_strided_slice %168 {offsets = [0, 0], sizes = [8, 8], strides = [1, 1]} : vector<8x32xf32> to vector<8x8xf32>
    %183 = arith.truncf %182 : vector<8x8xf32> to vector<8x8xbf16>
    %cst_78 = arith.constant dense<0.000000e+00> : vector<8x8xf32>
    %184 = tpu.matmul %179, %181, %cst_78 {dimension_numbers = #tpu.dot_dimension_numbers<[1], [1], [0], [0], [0, 0, 1, 0], [], []>} : vector<8x8xbf16>, vector<8x8xbf16>, vector<8x8xf32> -> vector<8x8xf32>
    %185 = arith.addf %184, %170 : vector<8x8xf32>
    %cst_79 = arith.constant dense<0xFF800000> : vector<8xf32>
    %186 = vector.multi_reduction <maximumf>, %185, %cst_79 [1] : vector<8x8xf32> to vector<8xf32>
    %187 = vector.shape_cast %186 : vector<8xf32> to vector<8x1xf32>
    %188 = vector.broadcast %187 : vector<8x1xf32> to vector<8x8xf32>
    %189 = arith.subf %185, %188 : vector<8x8xf32>
    %190 = math.exp %189 : vector<8x8xf32>
    %cst_80 = arith.constant dense<0.000000e+00> : vector<8xf32>
    %191 = vector.multi_reduction <add>, %190, %cst_80 [1] : vector<8x8xf32> to vector<8xf32>
    %192 = vector.shape_cast %191 : vector<8xf32> to vector<8x1xf32>
    %193 = tpu.reciprocal %192 {approx = true} : vector<8x1xf32> -> vector<8x1xf32>
    %194 = vector.broadcast %193 : vector<8x1xf32> to vector<8x8xf32>
    %195 = arith.mulf %190, %194 : vector<8x8xf32>
    %196 = arith.truncf %195 : vector<8x8xf32> to vector<8x8xbf16>
    %cst_81 = arith.constant dense<0.000000e+00> : vector<8x8xf32>
    %197 = tpu.matmul %196, %183, %cst_81 {dimension_numbers = #tpu.dot_dimension_numbers<[1], [0], [0], [1], [0, 0, 1, 1], [], []>} : vector<8x8xbf16>, vector<8x8xbf16>, vector<8x8xf32> -> vector<8x8xf32>
    %198 = arith.truncf %197 : vector<8x8xf32> to vector<8x8xbf16>
    %199 = vector.extract_strided_slice %172 {offsets = [0, 0], sizes = [8, 32], strides = [1, 1]} : vector<32x32xbf16> to vector<8x32xbf16>
    %cst_82 = arith.constant dense<0.000000e+00> : vector<8x32xf32>
    %200 = tpu.matmul %198, %199, %cst_82 {dimension_numbers = #tpu.dot_dimension_numbers<[1], [0], [0], [1], [0, 0, 1, 1], [], []>} : vector<8x8xbf16>, vector<8x32xbf16>, vector<8x32xf32> -> vector<8x32xf32>
    %201 = arith.addf %177, %200 : vector<8x32xf32>
    %202 = vector.extract_strided_slice %176 {offsets = [0, 8], sizes = [8, 8], strides = [1, 1]} : vector<8x32xf32> to vector<8x8xf32>
    %203 = arith.truncf %202 : vector<8x8xf32> to vector<8x8xbf16>
    %204 = vector.extract_strided_slice %167 {offsets = [0, 8], sizes = [8, 8], strides = [1, 1]} : vector<8x32xf32> to vector<8x8xf32>
    %205 = arith.truncf %204 : vector<8x8xf32> to vector<8x8xbf16>
    %206 = vector.extract_strided_slice %168 {offsets = [0, 8], sizes = [8, 8], strides = [1, 1]} : vector<8x32xf32> to vector<8x8xf32>
    %207 = arith.truncf %206 : vector<8x8xf32> to vector<8x8xbf16>
    %cst_83 = arith.constant dense<0.000000e+00> : vector<8x8xf32>
    %208 = tpu.matmul %203, %205, %cst_83 {dimension_numbers = #tpu.dot_dimension_numbers<[1], [1], [0], [0], [0, 0, 1, 0], [], []>} : vector<8x8xbf16>, vector<8x8xbf16>, vector<8x8xf32> -> vector<8x8xf32>
    %209 = arith.addf %208, %170 : vector<8x8xf32>
    %cst_84 = arith.constant dense<0xFF800000> : vector<8xf32>
    %210 = vector.multi_reduction <maximumf>, %209, %cst_84 [1] : vector<8x8xf32> to vector<8xf32>
    %211 = vector.shape_cast %210 : vector<8xf32> to vector<8x1xf32>
    %212 = vector.broadcast %211 : vector<8x1xf32> to vector<8x8xf32>
    %213 = arith.subf %209, %212 : vector<8x8xf32>
    %214 = math.exp %213 : vector<8x8xf32>
    %cst_85 = arith.constant dense<0.000000e+00> : vector<8xf32>
    %215 = vector.multi_reduction <add>, %214, %cst_85 [1] : vector<8x8xf32> to vector<8xf32>
    %216 = vector.shape_cast %215 : vector<8xf32> to vector<8x1xf32>
    %217 = tpu.reciprocal %216 {approx = true} : vector<8x1xf32> -> vector<8x1xf32>
    %218 = vector.broadcast %217 : vector<8x1xf32> to vector<8x8xf32>
    %219 = arith.mulf %214, %218 : vector<8x8xf32>
    %220 = arith.truncf %219 : vector<8x8xf32> to vector<8x8xbf16>
    %cst_86 = arith.constant dense<0.000000e+00> : vector<8x8xf32>
    %221 = tpu.matmul %220, %207, %cst_86 {dimension_numbers = #tpu.dot_dimension_numbers<[1], [0], [0], [1], [0, 0, 1, 1], [], []>} : vector<8x8xbf16>, vector<8x8xbf16>, vector<8x8xf32> -> vector<8x8xf32>
    %222 = arith.truncf %221 : vector<8x8xf32> to vector<8x8xbf16>
    %223 = vector.extract_strided_slice %172 {offsets = [8, 0], sizes = [8, 32], strides = [1, 1]} : vector<32x32xbf16> to vector<8x32xbf16>
    %cst_87 = arith.constant dense<0.000000e+00> : vector<8x32xf32>
    %224 = tpu.matmul %222, %223, %cst_87 {dimension_numbers = #tpu.dot_dimension_numbers<[1], [0], [0], [1], [0, 0, 1, 1], [], []>} : vector<8x8xbf16>, vector<8x32xbf16>, vector<8x32xf32> -> vector<8x32xf32>
    %225 = arith.addf %201, %224 : vector<8x32xf32>
    %226 = vector.extract_strided_slice %176 {offsets = [0, 16], sizes = [8, 8], strides = [1, 1]} : vector<8x32xf32> to vector<8x8xf32>
    %227 = arith.truncf %226 : vector<8x8xf32> to vector<8x8xbf16>
    %228 = vector.extract_strided_slice %167 {offsets = [0, 16], sizes = [8, 8], strides = [1, 1]} : vector<8x32xf32> to vector<8x8xf32>
    %229 = arith.truncf %228 : vector<8x8xf32> to vector<8x8xbf16>
    %230 = vector.extract_strided_slice %168 {offsets = [0, 16], sizes = [8, 8], strides = [1, 1]} : vector<8x32xf32> to vector<8x8xf32>
    %231 = arith.truncf %230 : vector<8x8xf32> to vector<8x8xbf16>
    %cst_88 = arith.constant dense<0.000000e+00> : vector<8x8xf32>
    %232 = tpu.matmul %227, %229, %cst_88 {dimension_numbers = #tpu.dot_dimension_numbers<[1], [1], [0], [0], [0, 0, 1, 0], [], []>} : vector<8x8xbf16>, vector<8x8xbf16>, vector<8x8xf32> -> vector<8x8xf32>
    %233 = arith.addf %232, %170 : vector<8x8xf32>
    %cst_89 = arith.constant dense<0xFF800000> : vector<8xf32>
    %234 = vector.multi_reduction <maximumf>, %233, %cst_89 [1] : vector<8x8xf32> to vector<8xf32>
    %235 = vector.shape_cast %234 : vector<8xf32> to vector<8x1xf32>
    %236 = vector.broadcast %235 : vector<8x1xf32> to vector<8x8xf32>
    %237 = arith.subf %233, %236 : vector<8x8xf32>
    %238 = math.exp %237 : vector<8x8xf32>
    %cst_90 = arith.constant dense<0.000000e+00> : vector<8xf32>
    %239 = vector.multi_reduction <add>, %238, %cst_90 [1] : vector<8x8xf32> to vector<8xf32>
    %240 = vector.shape_cast %239 : vector<8xf32> to vector<8x1xf32>
    %241 = tpu.reciprocal %240 {approx = true} : vector<8x1xf32> -> vector<8x1xf32>
    %242 = vector.broadcast %241 : vector<8x1xf32> to vector<8x8xf32>
    %243 = arith.mulf %238, %242 : vector<8x8xf32>
    %244 = arith.truncf %243 : vector<8x8xf32> to vector<8x8xbf16>
    %cst_91 = arith.constant dense<0.000000e+00> : vector<8x8xf32>
    %245 = tpu.matmul %244, %231, %cst_91 {dimension_numbers = #tpu.dot_dimension_numbers<[1], [0], [0], [1], [0, 0, 1, 1], [], []>} : vector<8x8xbf16>, vector<8x8xbf16>, vector<8x8xf32> -> vector<8x8xf32>
    %246 = arith.truncf %245 : vector<8x8xf32> to vector<8x8xbf16>
    %247 = vector.extract_strided_slice %172 {offsets = [16, 0], sizes = [8, 32], strides = [1, 1]} : vector<32x32xbf16> to vector<8x32xbf16>
    %cst_92 = arith.constant dense<0.000000e+00> : vector<8x32xf32>
    %248 = tpu.matmul %246, %247, %cst_92 {dimension_numbers = #tpu.dot_dimension_numbers<[1], [0], [0], [1], [0, 0, 1, 1], [], []>} : vector<8x8xbf16>, vector<8x32xbf16>, vector<8x32xf32> -> vector<8x32xf32>
    %249 = arith.addf %225, %248 : vector<8x32xf32>
    %250 = vector.extract_strided_slice %176 {offsets = [0, 24], sizes = [8, 8], strides = [1, 1]} : vector<8x32xf32> to vector<8x8xf32>
    %251 = arith.truncf %250 : vector<8x8xf32> to vector<8x8xbf16>
    %252 = vector.extract_strided_slice %167 {offsets = [0, 24], sizes = [8, 8], strides = [1, 1]} : vector<8x32xf32> to vector<8x8xf32>
    %253 = arith.truncf %252 : vector<8x8xf32> to vector<8x8xbf16>
    %254 = vector.extract_strided_slice %168 {offsets = [0, 24], sizes = [8, 8], strides = [1, 1]} : vector<8x32xf32> to vector<8x8xf32>
    %255 = arith.truncf %254 : vector<8x8xf32> to vector<8x8xbf16>
    %cst_93 = arith.constant dense<0.000000e+00> : vector<8x8xf32>
    %256 = tpu.matmul %251, %253, %cst_93 {dimension_numbers = #tpu.dot_dimension_numbers<[1], [1], [0], [0], [0, 0, 1, 0], [], []>} : vector<8x8xbf16>, vector<8x8xbf16>, vector<8x8xf32> -> vector<8x8xf32>
    %257 = arith.addf %256, %170 : vector<8x8xf32>
    %cst_94 = arith.constant dense<0xFF800000> : vector<8xf32>
    %258 = vector.multi_reduction <maximumf>, %257, %cst_94 [1] : vector<8x8xf32> to vector<8xf32>
    %259 = vector.shape_cast %258 : vector<8xf32> to vector<8x1xf32>
    %260 = vector.broadcast %259 : vector<8x1xf32> to vector<8x8xf32>
    %261 = arith.subf %257, %260 : vector<8x8xf32>
    %262 = math.exp %261 : vector<8x8xf32>
    %cst_95 = arith.constant dense<0.000000e+00> : vector<8xf32>
    %263 = vector.multi_reduction <add>, %262, %cst_95 [1] : vector<8x8xf32> to vector<8xf32>
    %264 = vector.shape_cast %263 : vector<8xf32> to vector<8x1xf32>
    %265 = tpu.reciprocal %264 {approx = true} : vector<8x1xf32> -> vector<8x1xf32>
    %266 = vector.broadcast %265 : vector<8x1xf32> to vector<8x8xf32>
    %267 = arith.mulf %262, %266 : vector<8x8xf32>
    %268 = arith.truncf %267 : vector<8x8xf32> to vector<8x8xbf16>
    %cst_96 = arith.constant dense<0.000000e+00> : vector<8x8xf32>
    %269 = tpu.matmul %268, %255, %cst_96 {dimension_numbers = #tpu.dot_dimension_numbers<[1], [0], [0], [1], [0, 0, 1, 1], [], []>} : vector<8x8xbf16>, vector<8x8xbf16>, vector<8x8xf32> -> vector<8x8xf32>
    %270 = arith.truncf %269 : vector<8x8xf32> to vector<8x8xbf16>
    %271 = vector.extract_strided_slice %172 {offsets = [24, 0], sizes = [8, 32], strides = [1, 1]} : vector<32x32xbf16> to vector<8x32xbf16>
    %cst_97 = arith.constant dense<0.000000e+00> : vector<8x32xf32>
    %272 = tpu.matmul %270, %271, %cst_97 {dimension_numbers = #tpu.dot_dimension_numbers<[1], [0], [0], [1], [0, 0, 1, 1], [], []>} : vector<8x8xbf16>, vector<8x32xbf16>, vector<8x32xf32> -> vector<8x32xf32>
    %273 = arith.addf %249, %272 : vector<8x32xf32>
    %274 = vector.broadcast %174 : vector<1x32xf32> to vector<8x32xf32>
    %275 = arith.addf %273, %274 : vector<8x32xf32>
    %276 = arith.addf %275, %150 : vector<8x32xf32>
    %c0_98 = arith.constant 0 : index
    %c0_99 = arith.constant 0 : index
    %c0_100 = arith.constant 0 : index
    %277 = vector.load %arg18[%c0_98, %c0_99, %c0_100] : memref<1x1x32xf32, #tpu.memory_space<vmem>>, vector<1x1x32xf32>
    %278 = vector.shape_cast %277 : vector<1x1x32xf32> to vector<1x32xf32>
    %c0_101 = arith.constant 0 : index
    %c0_102 = arith.constant 0 : index
    %c0_103 = arith.constant 0 : index
    %279 = vector.load %arg19[%c0_101, %c0_102, %c0_103] : memref<1x1x32xf32, #tpu.memory_space<vmem>>, vector<1x1x32xf32>
    %280 = vector.shape_cast %279 : vector<1x1x32xf32> to vector<1x32xf32>
    %cst_104 = arith.constant dense<0.000000e+00> : vector<8xf32>
    %281 = vector.multi_reduction <add>, %276, %cst_104 [1] : vector<8x32xf32> to vector<8xf32>
    %282 = vector.shape_cast %281 : vector<8xf32> to vector<8x1xf32>
    %cst_105 = arith.constant 3.200000e+01 : f32
    %283 = vector.broadcast %cst_105 : f32 to vector<8x1xf32>
    %284 = arith.divf %282, %283 : vector<8x1xf32>
    %285 = vector.broadcast %284 : vector<8x1xf32> to vector<8x32xf32>
    %286 = arith.subf %276, %285 : vector<8x32xf32>
    %287 = arith.mulf %286, %286 : vector<8x32xf32>
    %cst_106 = arith.constant dense<0.000000e+00> : vector<8xf32>
    %288 = vector.multi_reduction <add>, %287, %cst_106 [1] : vector<8x32xf32> to vector<8xf32>
    %289 = vector.shape_cast %288 : vector<8xf32> to vector<8x1xf32>
    %cst_107 = arith.constant 3.200000e+01 : f32
    %290 = vector.broadcast %cst_107 : f32 to vector<8x1xf32>
    %291 = arith.divf %289, %290 : vector<8x1xf32>
    %292 = vector.broadcast %284 : vector<8x1xf32> to vector<8x32xf32>
    %293 = arith.subf %276, %292 : vector<8x32xf32>
    %cst_108 = arith.constant 9.99999996E-13 : f32
    %294 = vector.broadcast %cst_108 : f32 to vector<8x1xf32>
    %295 = arith.addf %291, %294 : vector<8x1xf32>
    %296 = math.rsqrt %295 : vector<8x1xf32>
    %297 = vector.broadcast %296 : vector<8x1xf32> to vector<8x32xf32>
    %298 = arith.mulf %293, %297 : vector<8x32xf32>
    %299 = vector.broadcast %278 : vector<1x32xf32> to vector<8x32xf32>
    %300 = arith.mulf %298, %299 : vector<8x32xf32>
    %301 = vector.broadcast %280 : vector<1x32xf32> to vector<8x32xf32>
    %302 = arith.addf %300, %301 : vector<8x32xf32>
    %303 = arith.truncf %302 : vector<8x32xf32> to vector<8x32xbf16>
    %c0_109 = arith.constant 0 : index
    %c0_110 = arith.constant 0 : index
    %c0_111 = arith.constant 0 : index
    %304 = vector.load %arg20[%c0_109, %c0_110, %c0_111] : memref<1x32x64xbf16, #tpu.memory_space<vmem>>, vector<1x32x64xbf16>
    %305 = vector.shape_cast %304 : vector<1x32x64xbf16> to vector<32x64xbf16>
    %cst_112 = arith.constant dense<0.000000e+00> : vector<8x64xf32>
    %306 = tpu.matmul %303, %305, %cst_112 {dimension_numbers = #tpu.dot_dimension_numbers<[1], [0], [0], [1], [0, 0, 1, 1], [], []>} : vector<8x32xbf16>, vector<32x64xbf16>, vector<8x64xf32> -> vector<8x64xf32>
    %c0_113 = arith.constant 0 : index
    %c0_114 = arith.constant 0 : index
    %c0_115 = arith.constant 0 : index
    %307 = vector.load %arg21[%c0_113, %c0_114, %c0_115] : memref<1x1x64xf32, #tpu.memory_space<vmem>>, vector<1x1x64xf32>
    %308 = vector.shape_cast %307 : vector<1x1x64xf32> to vector<1x64xf32>
    %309 = vector.broadcast %308 : vector<1x64xf32> to vector<8x64xf32>
    %310 = arith.addf %306, %309 : vector<8x64xf32>
    %cst_116 = arith.constant 0.000000e+00 : f32
    %311 = vector.broadcast %cst_116 : f32 to vector<8x64xf32>
    %312 = arith.maximumf %310, %311 : vector<8x64xf32>
    %313 = arith.truncf %312 : vector<8x64xf32> to vector<8x64xbf16>
    %c0_117 = arith.constant 0 : index
    %c0_118 = arith.constant 0 : index
    %c0_119 = arith.constant 0 : index
    %314 = vector.load %arg22[%c0_117, %c0_118, %c0_119] : memref<1x64x32xbf16, #tpu.memory_space<vmem>>, vector<1x64x32xbf16>
    %315 = vector.shape_cast %314 : vector<1x64x32xbf16> to vector<64x32xbf16>
    %cst_120 = arith.constant dense<0.000000e+00> : vector<8x32xf32>
    %316 = tpu.matmul %313, %315, %cst_120 {dimension_numbers = #tpu.dot_dimension_numbers<[1], [0], [0], [1], [0, 0, 1, 1], [], []>} : vector<8x64xbf16>, vector<64x32xbf16>, vector<8x32xf32> -> vector<8x32xf32>
    %c0_121 = arith.constant 0 : index
    %c0_122 = arith.constant 0 : index
    %c0_123 = arith.constant 0 : index
    %317 = vector.load %arg23[%c0_121, %c0_122, %c0_123] : memref<1x1x32xf32, #tpu.memory_space<vmem>>, vector<1x1x32xf32>
    %318 = vector.shape_cast %317 : vector<1x1x32xf32> to vector<1x32xf32>
    %319 = vector.broadcast %318 : vector<1x32xf32> to vector<8x32xf32>
    %320 = arith.addf %316, %319 : vector<8x32xf32>
    %321 = arith.addf %320, %302 : vector<8x32xf32>
    %c0_124 = arith.constant 0 : index
    %c0_125 = arith.constant 0 : index
    %c0_126 = arith.constant 0 : index
    %322 = vector.load %arg24[%c0_124, %c0_125, %c0_126] : memref<1x1x32xf32, #tpu.memory_space<vmem>>, vector<1x1x32xf32>
    %323 = vector.shape_cast %322 : vector<1x1x32xf32> to vector<1x32xf32>
    %c0_127 = arith.constant 0 : index
    %c0_128 = arith.constant 0 : index
    %c0_129 = arith.constant 0 : index
    %324 = vector.load %arg25[%c0_127, %c0_128, %c0_129] : memref<1x1x32xf32, #tpu.memory_space<vmem>>, vector<1x1x32xf32>
    %325 = vector.shape_cast %324 : vector<1x1x32xf32> to vector<1x32xf32>
    %cst_130 = arith.constant dense<0.000000e+00> : vector<8xf32>
    %326 = vector.multi_reduction <add>, %321, %cst_130 [1] : vector<8x32xf32> to vector<8xf32>
    %327 = vector.shape_cast %326 : vector<8xf32> to vector<8x1xf32>
    %cst_131 = arith.constant 3.200000e+01 : f32
    %328 = vector.broadcast %cst_131 : f32 to vector<8x1xf32>
    %329 = arith.divf %327, %328 : vector<8x1xf32>
    %330 = vector.broadcast %329 : vector<8x1xf32> to vector<8x32xf32>
    %331 = arith.subf %321, %330 : vector<8x32xf32>
    %332 = arith.mulf %331, %331 : vector<8x32xf32>
    %cst_132 = arith.constant dense<0.000000e+00> : vector<8xf32>
    %333 = vector.multi_reduction <add>, %332, %cst_132 [1] : vector<8x32xf32> to vector<8xf32>
    %334 = vector.shape_cast %333 : vector<8xf32> to vector<8x1xf32>
    %cst_133 = arith.constant 3.200000e+01 : f32
    %335 = vector.broadcast %cst_133 : f32 to vector<8x1xf32>
    %336 = arith.divf %334, %335 : vector<8x1xf32>
    %337 = vector.broadcast %329 : vector<8x1xf32> to vector<8x32xf32>
    %338 = arith.subf %321, %337 : vector<8x32xf32>
    %cst_134 = arith.constant 9.99999996E-13 : f32
    %339 = vector.broadcast %cst_134 : f32 to vector<8x1xf32>
    %340 = arith.addf %336, %339 : vector<8x1xf32>
    %341 = math.rsqrt %340 : vector<8x1xf32>
    %342 = vector.broadcast %341 : vector<8x1xf32> to vector<8x32xf32>
    %343 = arith.mulf %338, %342 : vector<8x32xf32>
    %344 = vector.broadcast %323 : vector<1x32xf32> to vector<8x32xf32>
    %345 = arith.mulf %343, %344 : vector<8x32xf32>
    %346 = vector.broadcast %325 : vector<1x32xf32> to vector<8x32xf32>
    %347 = arith.addf %345, %346 : vector<8x32xf32>
    %c0_135 = arith.constant 0 : index
    %c0_136 = arith.constant 0 : index
    %348 = vector.load %arg29[%c0_135, %c0_136] : memref<8x32xf32, #tpu.memory_space<vmem>>, vector<8x32xf32>
    tpu.vector_store %arg29[%c0_135, %c0_136], %347 {strides = array<i32>} : memref<8x32xf32, #tpu.memory_space<vmem>>, vector<8x32xf32>,
    %c1_i32 = arith.constant 1 : i32
    %349 = arith.cmpi eq, %arg1, %c1_i32 : i32
    %350 = arith.extui %349 : i1 to i32
    %c0_i32_137 = arith.constant 0 : i32
    %351 = arith.cmpi ne, %350, %c0_i32_137 : i32
    scf.if %351 {
      %352 = arith.truncf %347 : vector<8x32xf32> to vector<8x32xbf16>
      %c0_138 = arith.constant 0 : index
      %c0_139 = arith.constant 0 : index
      %353 = vector.load %arg26[%c0_138, %c0_139] : memref<32x128xbf16, #tpu.memory_space<vmem>>, vector<32x128xbf16>
      %cst_140 = arith.constant dense<0.000000e+00> : vector<8x128xf32>
      %354 = tpu.matmul %352, %353, %cst_140 {dimension_numbers = #tpu.dot_dimension_numbers<[1], [0], [0], [1], [0, 0, 1, 1], [], []>} : vector<8x32xbf16>, vector<32x128xbf16>, vector<8x128xf32> -> vector<8x128xf32>
      %c0_141 = arith.constant 0 : index
      %c0_142 = arith.constant 0 : index
      %355 = vector.load %arg27[%c0_141, %c0_142] : memref<1x128xf32, #tpu.memory_space<vmem>>, vector<1x128xf32>
      %356 = vector.broadcast %355 : vector<1x128xf32> to vector<8x128xf32>
      %357 = arith.addf %354, %356 : vector<8x128xf32>
      %c0_143 = arith.constant 0 : index
      %c0_144 = arith.constant 0 : index
      %c0_145 = arith.constant 0 : index
      %358 = vector.load %arg28[%c0_143, %c0_144, %c0_145] : memref<1x8x128xf32, #tpu.memory_space<vmem>>, vector<1x8x128xf32>
      %359 = vector.shape_cast %358 : vector<1x8x128xf32> to vector<8x128xf32>
      %360 = vector.shape_cast %357 : vector<8x128xf32> to vector<1x8x128xf32>
      tpu.vector_store %arg28[%c0_143, %c0_144, %c0_145], %360 {strides = array<i32>} : memref<1x8x128xf32, #tpu.memory_space<vmem>>, vector<1x8x128xf32>,
    } else {
    }
    return
  }
  func.func @transform_0(%arg0: i32, %arg1: i32) -> (i32, i32, i32) {
    %c0_i32 = arith.constant 0 : i32
    %c0_i32_0 = arith.constant 0 : i32
    %c0_i32_1 = arith.constant 0 : i32
    return %arg0, %c0_i32, %c0_i32_0 : i32, i32, i32
  }
  func.func @transform_1(%arg0: i32, %arg1: i32) -> (i32, i32, i32) {
    %c0_i32 = arith.constant 0 : i32
    %c0_i32_0 = arith.constant 0 : i32
    %c0_i32_1 = arith.constant 0 : i32
    return %arg0, %c0_i32, %c0_i32_0 : i32, i32, i32
  }
  func.func @transform_2(%arg0: i32, %arg1: i32) -> (i32, i32, i32) {
    %c0_i32 = arith.constant 0 : i32
    %c0_i32_0 = arith.constant 0 : i32
    %c0_i32_1 = arith.constant 0 : i32
    return %arg0, %c0_i32, %c0_i32_0 : i32, i32, i32
  }
  func.func @transform_3(%arg0: i32, %arg1: i32) -> (i32, i32, i32) {
    %c0_i32 = arith.constant 0 : i32
    %c0_i32_0 = arith.constant 0 : i32
    %c0_i32_1 = arith.constant 0 : i32
    return %arg0, %c0_i32, %c0_i32_0 : i32, i32, i32
  }
  func.func @transform_4(%arg0: i32, %arg1: i32) -> (i32, i32, i32) {
    %c0_i32 = arith.constant 0 : i32
    %c0_i32_0 = arith.constant 0 : i32
    %c0_i32_1 = arith.constant 0 : i32
    return %arg1, %c0_i32, %c0_i32_0 : i32, i32, i32
  }
  func.func @transform_5(%arg0: i32, %arg1: i32) -> (i32, i32, i32) {
    %c0_i32 = arith.constant 0 : i32
    %c0_i32_0 = arith.constant 0 : i32
    %c0_i32_1 = arith.constant 0 : i32
    return %arg1, %c0_i32, %c0_i32_0 : i32, i32, i32
  }
  func.func @transform_6(%arg0: i32, %arg1: i32) -> (i32, i32, i32) {
    %c0_i32 = arith.constant 0 : i32
    %c0_i32_0 = arith.constant 0 : i32
    %c0_i32_1 = arith.constant 0 : i32
    return %arg1, %c0_i32, %c0_i32_0 : i32, i32, i32
  }
  func.func @transform_7(%arg0: i32, %arg1: i32) -> (i32, i32, i32) {
    %c0_i32 = arith.constant 0 : i32
    %c0_i32_0 = arith.constant 0 : i32
    %c0_i32_1 = arith.constant 0 : i32
    return %arg1, %c0_i32, %c0_i32_0 : i32, i32, i32
  }
  func.func @transform_8(%arg0: i32, %arg1: i32) -> (i32, i32, i32) {
    %c0_i32 = arith.constant 0 : i32
    %c0_i32_0 = arith.constant 0 : i32
    %c0_i32_1 = arith.constant 0 : i32
    return %arg1, %c0_i32, %c0_i32_0 : i32, i32, i32
  }
  func.func @transform_9(%arg0: i32, %arg1: i32) -> (i32, i32, i32) {
    %c0_i32 = arith.constant 0 : i32
    %c0_i32_0 = arith.constant 0 : i32
    %c0_i32_1 = arith.constant 0 : i32
    return %arg1, %c0_i32, %c0_i32_0 : i32, i32, i32
  }
  func.func @transform_10(%arg0: i32, %arg1: i32) -> (i32, i32, i32) {
    %c0_i32 = arith.constant 0 : i32
    %c0_i32_0 = arith.constant 0 : i32
    %c0_i32_1 = arith.constant 0 : i32
    return %arg1, %c0_i32, %c0_i32_0 : i32, i32, i32
  }
  func.func @transform_11(%arg0: i32, %arg1: i32) -> (i32, i32, i32) {
    %c0_i32 = arith.constant 0 : i32
    %c0_i32_0 = arith.constant 0 : i32
    %c0_i32_1 = arith.constant 0 : i32
    return %arg1, %c0_i32, %c0_i32_0 : i32, i32, i32
  }
  func.func @transform_12(%arg0: i32, %arg1: i32) -> (i32, i32, i32) {
    %c0_i32 = arith.constant 0 : i32
    %c0_i32_0 = arith.constant 0 : i32
    %c0_i32_1 = arith.constant 0 : i32
    return %arg1, %c0_i32, %c0_i32_0 : i32, i32, i32
  }
  func.func @transform_13(%arg0: i32, %arg1: i32) -> (i32, i32, i32) {
    %c0_i32 = arith.constant 0 : i32
    %c0_i32_0 = arith.constant 0 : i32
    %c0_i32_1 = arith.constant 0 : i32
    return %arg1, %c0_i32, %c0_i32_0 : i32, i32, i32
  }
  func.func @transform_14(%arg0: i32, %arg1: i32) -> (i32, i32, i32) {
    %c0_i32 = arith.constant 0 : i32
    %c0_i32_0 = arith.constant 0 : i32
    %c0_i32_1 = arith.constant 0 : i32
    return %arg1, %c0_i32, %c0_i32_0 : i32, i32, i32
  }
  func.func @transform_15(%arg0: i32, %arg1: i32) -> (i32, i32, i32) {
    %c0_i32 = arith.constant 0 : i32
    %c0_i32_0 = arith.constant 0 : i32
    %c0_i32_1 = arith.constant 0 : i32
    return %arg1, %c0_i32, %c0_i32_0 : i32, i32, i32
  }
  func.func @transform_16(%arg0: i32, %arg1: i32) -> (i32, i32, i32) {
    %c0_i32 = arith.constant 0 : i32
    %c0_i32_0 = arith.constant 0 : i32
    %c0_i32_1 = arith.constant 0 : i32
    return %arg1, %c0_i32, %c0_i32_0 : i32, i32, i32
  }
  func.func @transform_17(%arg0: i32, %arg1: i32) -> (i32, i32, i32) {
    %c0_i32 = arith.constant 0 : i32
    %c0_i32_0 = arith.constant 0 : i32
    %c0_i32_1 = arith.constant 0 : i32
    return %arg1, %c0_i32, %c0_i32_0 : i32, i32, i32
  }
  func.func @transform_18(%arg0: i32, %arg1: i32) -> (i32, i32, i32) {
    %c0_i32 = arith.constant 0 : i32
    %c0_i32_0 = arith.constant 0 : i32
    %c0_i32_1 = arith.constant 0 : i32
    return %arg1, %c0_i32, %c0_i32_0 : i32, i32, i32
  }
  func.func @transform_19(%arg0: i32, %arg1: i32) -> (i32, i32, i32) {
    %c0_i32 = arith.constant 0 : i32
    %c0_i32_0 = arith.constant 0 : i32
    %c0_i32_1 = arith.constant 0 : i32
    return %arg1, %c0_i32, %c0_i32_0 : i32, i32, i32
  }
  func.func @transform_20(%arg0: i32, %arg1: i32) -> (i32, i32, i32) {
    %c0_i32 = arith.constant 0 : i32
    %c0_i32_0 = arith.constant 0 : i32
    %c0_i32_1 = arith.constant 0 : i32
    return %arg1, %c0_i32, %c0_i32_0 : i32, i32, i32
  }
  func.func @transform_21(%arg0: i32, %arg1: i32) -> (i32, i32, i32) {
    %c0_i32 = arith.constant 0 : i32
    %c0_i32_0 = arith.constant 0 : i32
    %c0_i32_1 = arith.constant 0 : i32
    return %arg1, %c0_i32, %c0_i32_0 : i32, i32, i32
  }
  func.func @transform_22(%arg0: i32, %arg1: i32) -> (i32, i32, i32) {
    %c0_i32 = arith.constant 0 : i32
    %c0_i32_0 = arith.constant 0 : i32
    %c0_i32_1 = arith.constant 0 : i32
    return %arg1, %c0_i32, %c0_i32_0 : i32, i32, i32
  }
  func.func @transform_23(%arg0: i32, %arg1: i32) -> (i32, i32, i32) {
    %c0_i32 = arith.constant 0 : i32
    %c0_i32_0 = arith.constant 0 : i32
    %c0_i32_1 = arith.constant 0 : i32
    return %arg1, %c0_i32, %c0_i32_0 : i32, i32, i32
  }
  func.func @transform_24(%arg0: i32, %arg1: i32) -> (i32, i32) {
    %c0_i32 = arith.constant 0 : i32
    %c0_i32_0 = arith.constant 0 : i32
    %c0_i32_1 = arith.constant 0 : i32
    return %c0_i32, %c0_i32_0 : i32, i32
  }
  func.func @transform_25(%arg0: i32, %arg1: i32) -> (i32, i32) {
    %c0_i32 = arith.constant 0 : i32
    %c0_i32_0 = arith.constant 0 : i32
    %c0_i32_1 = arith.constant 0 : i32
    return %c0_i32, %c0_i32_0 : i32, i32
  }
  func.func @transform_26(%arg0: i32, %arg1: i32) -> (i32, i32, i32) {
    %c0_i32 = arith.constant 0 : i32
    %c0_i32_0 = arith.constant 0 : i32
    %c0_i32_1 = arith.constant 0 : i32
    return %arg0, %c0_i32, %c0_i32_0 : i32, i32, i32
  }
}

</mosaic_0001>

<bundles_post_ra>
// kernel: transformer_forward.2
= control target key start
LH: loop header
LB: loop body
LE: loop exit
PB: predicated region body
PF: predicated region fallthrough
CT: control target
= control target key end

     0   :  { %s2223_s29 = smov 0   ;;  %s2225_s30 = smov 0   ;;  %s2522_s0 = inlined_call_operand.vmem [shape: f32[2,8,32], index: 0, kind: input, shape index: {}]   ;;  %s2523_s1 = inlined_call_operand.vmem [shape: f32[2,8,8], index: 1, kind: input, shape index: {}]   ;;  %s2524_s2 = inlined_call_operand.vmem [shape: bf16[2,32,96], index: 2, kind: input, shape index: {}]   ;;  %s2525_s3 = inlined_call_operand.vmem [shape: f32[2,1,96], index: 3, kind: input, shape index: {}]   ;;  %s2526_s4 = inlined_call_operand.vmem [shape: bf16[2,32,32], index: 4, kind: input, shape index: {}]   ;;  %s2527_s5 = inlined_call_operand.vmem [shape: f32[2,1,32], index: 5, kind: input, shape index: {}]   ;;  %s2528_s6 = inlined_call_operand.vmem [shape: f32[2,1,32], index: 6, kind: input, shape index: {}]   ;;  %s2529_s7 = inlined_call_operand.vmem [shape: f32[2,1,32], index: 7, kind: input, shape index: {}]   ;;  %s2530_s8 = inlined_call_operand.vmem [shape: bf16[2,32,64], index: 8, kind: input, shape index: {}]   ;;  %s2531_s9 = inlined_call_operand.vmem [shape: f32[2,1,64], index: 9, kind: input, shape index: {}]   ;;  %s2532_s10 = inlined_call_operand.vmem [shape: bf16[2,64,32], index: 10, kind: input, shape index: {}]   ;;  %s2533_s11 = inlined_call_operand.vmem [shape: f32[2,1,32], index: 11, kind: input, shape index: {}]   ;;  %s2534_s12 = inlined_call_operand.vmem [shape: f32[2,1,32], index: 12, kind: input, shape index: {}]   ;;  %s2535_s13 = inlined_call_operand.vmem [shape: f32[2,1,32], index: 13, kind: input, shape index: {}]   ;;  %s2536_s14 = inlined_call_operand.vmem [shape: f32[2,8,32], index: 14, kind: output, shape index: {}]  }
   0x1   :  { %2541 = sst [smem:[#allocation9_spill]] %s2522_s0  ;;  %s2227_s15 = smov 0  }
   0x2   :  { %2542 = sst [smem:[#allocation10_spill]] %s2523_s1  ;;  %s2229_s16 = smov 0  }
   0x3   :  { %2543 = sst [smem:[#allocation11_spill]] %s2524_s2  ;;  %s2231_s17 = smov 0  }
   0x4   :  { %2544 = sst [smem:[#allocation12_spill]] %s2526_s4 }
   0x5   :  { %2545 = sst [smem:[#allocation13_spill]] %s2529_s7 }
   0x6   :  { %2546 = sst [smem:[#allocation14_spill]] %s2530_s8 }
   0x7   :  { %2547 = sst [smem:[#allocation15_spill]] %s2531_s9 }
   0x8   :  { %2548 = sst [smem:[#allocation16_spill]] %s2535_s13 }
   0x9   :  { %2549 = sst [smem:[#allocation17_spill]] %s2536_s14 }
   0xa LB: > { %2550 = sst [smem:[#allocation3_spill]] %s2117_s29  ;;  %s33_s18 = sadd.s32 1, %s2125_s15  ;;  %s2133_s17 = sphi %s2231_s17, %s24_s17   ;;  %s2129_s16 = sphi %s2229_s16, %s2582_s16   ;;  %s2125_s15 = sphi %s2227_s15, %s2581_s15   ;;  %s2121_s30 = sphi %s2225_s30, %s2580_s30   ;;  %s2117_s29 = sphi %s2223_s29, %s2579_s29  }
   0xb   : > { %2551 = sst [smem:[#allocation4_spill]] %s2125_s15  ;;  %s36_s19 = sadd.s32 1, %s2129_s16 }
   0xc   : > { %2552 = sst [smem:[#allocation5_spill]] %s2129_s16  ;;  %p34_p0 = scmp.ge.s32.totalorder %s33_s18, 2 }
   0xd   : > { %2553 = sst [smem:[#allocation6_spill]] %s2133_s17  ;;  %p1828_p1 = scmp.ge.s32.totalorder %s2133_s17, 1 }
   0xe   : > { %p536_p2 = scmp.lt.s32.totalorder %s2133_s17, 5  ;;  %s2584_s18 = smov (%p34_p0, %s33_s18), 0 }
   0xf   : > { %2554 = sst [smem:[#allocation7_spill]] %s2584_s18  ;;  %s2586_s19 = smov (!%p34_p0, %s36_s19), %s2129_s16 }
  0x10   : > { %p537_p3 = pnand %p1828_p1, %p536_p2  ;;  %p38_p4 = scmp.ge.s32.totalorder %s2586_s19, 2 }
  0x11   : > { %p628_p5 = scmp.lt.s32.totalorder (!%p537_p3), %s2121_s30, 1  ;;  %p636_p6 = scmp.lt.s32.totalorder (!%p537_p3), %s2117_s29, 1 }
  0x12   : > { %s2588_s19 = smov (%p38_p4, %s2586_s19), 0  ;;  %540 = sbr.rel (%p537_p3) target bundleno = 3713 (0xe81), region = 76 }
  0x13   : > { %2555 = sst [smem:[#allocation8_spill]] %s2588_s19  ;;  %s2556_s0 = sld [smem:[#allocation9_spill]] (!%p537_p3) }
  0x14   : > { %s2558_s2 = sld [smem:[#allocation11_spill]] (!%p537_p3)  ;;  %s2559_s4 = sld [smem:[#allocation12_spill]] (!%p537_p3) }
  0x15   : > { %s2561_s8 = sld [smem:[#allocation14_spill]] (!%p537_p3)  ;;  %s2563_s1 = sld [smem:[#allocation16_spill]] (!%p537_p3) }
  0x16   : > { %s2565_s7 = sld [smem:[#allocation3_spill]] (!%p537_p3) }
  0x19   : > { %s2590_s30 = smov (!%p628_p5, %s2121_s30), 1 }
  0x1a   : > { %s2257_s20 = scalar_select %p636_p6, %s2117_s29, 1 }
  0x1b   : > { %s2259_s21 = sshll.u32 %s2590_s30, 3 }
  0x1c   : > { %s631_s24 = scalar_lea.vmem %s2556_s0, %s2259_s21  ;;  %s1875_s28 = sshll.u32 %s2257_s20, 4 }
  0x1d   : > { %s640_s17 = scalar_lea.vmem %s2558_s2, %s1875_s28  ;;  %s2280_s22 = scalar_lea.vmem %s2559_s4, %s1875_s28 }
  0x1e   : > { %s2297_s30 = scalar_lea.vmem %s2561_s8, %s1875_s28  ;;  %s1878_s4 = sshll.u32 %s2257_s20, 5 }
  0x1f   : > { %s2307_s25 = scalar_lea.vmem %s2532_s10, %s1878_s4  ;;  %s673_s13 = scalar_lea.vmem %s2533_s11, %s2257_s20 }
  0x20   : > { %s676_s16 = scalar_lea.vmem %s2534_s12, %s2257_s20  ;;  %s679_s8 = scalar_lea.vmem %s2563_s1, %s2257_s20 }
  0x21   : > { %s2564_s2 = sld [smem:[#allocation17_spill]]  ;;  %p1840_p7 = scmp.ne.s32.totalorder %s2565_s7, 0 }
  0x22   : > { %v689_v0 = vld [vmem:[%s631_s24] sm:$0xff] (!%p1840_p7)  ;;  %vm690_vm0 = vcmask (!%p1840_p7), 261120  }
  0x23   : > { %688 = sbr.rel (%p1840_p7) target bundleno = 42 (0x2a), region = 80  ;;  %691 = vst.msk [vmem:[#allocation2] sm:$0xff] (!%p1840_p7), %vm690_vm0, %v689_v0 }
  0x27   : > { %s683_s9 = scalar_lea.vmem %s2564_s2, %s2259_s21 }
  0x2a PF: > { %v2067_v1 = vld [vmem:[%s640_s17] sm:$0xff]   ;;  %v2135_v2 = vmov 0.0   ;;  %v2068_v3 = vld [vmem:[%s640_s17 + $0x8] sm:$0xff]   ;;  %vm2136_vm1 = vmmov 0   ;;  %vm718_vm2 = vcmask 261120   ;;  %s2566_s4 = scalar_lea.vmem %s2525_s3, %s2257_s20  ;;  %s2137_s7 = smov 96  }
  0x2b   : > { %1914 = vmatprep.subr.bf16.mxu1 %v2135_v2  ;;  %1928 = vmatprep.subr.bf16.mxu0 %v2135_v2  ;;  %v2330_v4 = vld [vmem:[#allocation2] sm:$0xff]  ;;  %s2138_s17 = smov 120   ;;  %s2139_s24 = smov 88   ;;  %vm773_vm3 = vcmask 64512   ;;  %vm837_vm4 = vcmask 1043456   ;;  %vm1548_vm5 = vcmask 523264  }
  0x2c   : > { %1915 = vmatpush3.bf16.msra.mxu1 %v2067_v1  ;;  %1918 = vmatprep.mubr.msk.bf16.mxu1 %vm2136_vm1, %v2135_v2  ;;  %v694_v5 = vpack.c.bf16 %v2330_v4, %v2330_v4  ;;  %v1841_v6 = vld [vmem:[%s2566_s4] ss:$0 sm:$0xff]  ;;  %s2567_s23 = sld [smem:[#allocation10_spill]]  ;;  %s2140_s26 = smov 64   ;;  %v763_v57 = vld [vmem:[%s2280_s22 + $0x4] sm:$0xf] }
  0x2d   : > { %1916 = vmatprep.subr.bf16.mxu1 %v2135_v2  ;;  %1930 = vmatprep.mubr.msk.bf16.mxu0 %vm2136_vm1, %v2135_v2  ;;  %s2141_s18 = smov 56   ;;  %s2142_s28 = smov 112   ;;  %v762_v55 = vld [vmem:[%s2280_s22] sm:$0xf]  ;;  %v998_v58 = vsel %vm837_vm4, %v763_v57, 0 }
  0x2e   : > { %s2143_s15 = smov 80   ;;  %v1044_v56 = vsel %vm837_vm4, %v762_v55, 0  ;;  %s2144_s14 = smov 72  }
  0x2f   : > { %s2145_s29 = smov 104   ;;  %s2146_s1 = smov 48  }
  0x30   : > { %1917 = vmatpush3.bf16.msra.mxu1 %v2068_v3  ;;  %s2147_s2 = smov 40   ;;  %s2576_s4 = sld [smem:[#allocation3_spill]] }
  0x31   : > { %1922 = vmatprep.subr.bf16.mxu1 %v2135_v2 }
  0x32   : > { %s2568_s27 = scalar_lea.vmem %s2567_s23, %s2259_s21  ;;  %s2571_s23 = sld [smem:[#allocation13_spill]] }
  0x33   : > { %1919 = vmatmul.mubr.msk.bf16.vlgmr.msra.gmra.mrb[0].mxu1 %vm718_vm2, %v694_v5  ;;  %v2369_v20 = vld [vmem:[%s2568_s27] sm:$0xff] }
  0x34   : > { %1924 = vmatprep.mubr.msk.bf16.mxu1 %vm2136_vm1, %v2135_v2 }
  0x36   : > { %p1872_p8 = scmp.ne.s32.totalorder %s2576_s4, 1 }
  0x38   : > { %s2572_s27 = scalar_lea.vmem %s2571_s23, %s2257_s20 }
 0x106   : > { %v756_v7 = vpop.f32.mrb[0].mxu1 }
 0x107   : > { %v757_v8 = vadd.f32 %v1841_v6, %v756_v7  ;;  %v1920_v9 = vpop.f32.mrb[1].mxu1 }
 0x108   : > { %v759_v10 = vpop.f32.mrb[2].mxu1 }
 0x109   : > { %v767_v11 = vmul.f32 0.35355338, %v757_v8  ;;  %v2346_v12 = vpack.c.bf16 %v757_v8, %v757_v8  ;;  %v1921_v13 = vpop.f32.mrb[3].mxu1 }
 0x10b   : > { %v2348_v14 = vpack.c.bf16 %v767_v11, %v767_v11  ;;  %771 = vrot.lane.b32.xlu0 %v2346_v12, %s2137_s7  ;;  %s2569_s7 = scalar_lea.vmem %s2527_s5, %s2257_s20 }
 0x10d   : > { %883 = vrot.lane.b32.xlu1 %v2348_v14, %s2138_s17 }
 0x10f   : > { %885 = vrot.lane.b32.xlu0 %v2346_v12, %s2139_s24  ;;  %s2570_s24 = scalar_lea.vmem %s2528_s6, %s2257_s20 }
 0x17d   : > { %v772_v15 = vpop.permute.xlu0 %771 }
 0x17e   : > { %v778_v16 = vsel %vm773_vm3, %v772_v15, 0 }
 0x17f   : > { %1923 = vmatpush3.bf16.xpose.msra.mxu1 %v778_v16  ;;  %v884_v19 = vpop.permute.xlu1 %883 }
 0x180   : > { %1934 = vmatprep.subr.bf16.mxu1 %v2135_v2 }
 0x181   : > { %v886_v17 = vpop.permute.xlu0 %885 }
 0x182   : > { %v891_v18 = vsel %vm773_vm3, %v886_v17, 0 }
 0x186   : > { %1925 = vmatmul.mubr.msk.bf16.vlgmr.msra.gmra.mrb[4].mxu1 %vm773_vm3, %v2348_v14 }
 0x187   : > { %1935 = vmatpush3.bf16.xpose.msra.mxu1 %v891_v18  ;;  %1936 = vmatprep.mubr.msk.bf16.mxu1 %vm2136_vm1, %v2135_v2 }
 0x188   : > { %1946 = vmatprep.subr.bf16.mxu1 %v2135_v2 }
 0x18e   : > { %1937 = vmatmul.mubr.msk.bf16.vlgmr.msra.gmra.mrb[8].mxu1 %vm773_vm3, %v884_v19 }
 0x18f   : > { %1948 = vmatprep.mubr.msk.bf16.mxu1 %vm2136_vm1, %v2135_v2  ;;  %1947 = vmatpush3.bf16.msra.mxu1 %v998_v58 }
 0x190   : > { %1958 = vmatprep.subr.bf16.mxu1 %v2135_v2 }
 0x259   : > { %v814_v21 = vpop.f32.mrb[4].mxu1 }
 0x25a   : > { %v815_v22 = vadd.f32 %v814_v21, %v2369_v20  ;;  %v1926_v23 = vpop.f32.mrb[5].mxu1 }
 0x25b   : > { %v817_v24 = vpop.f32.mrb[6].mxu1 }
 0x25c   : > { %v1927_v25 = vpop.f32.mrb[7].mxu1  ;;  %v820_v26 = vsel %vm773_vm3, %v815_v22, -inf }
 0x25d   : > { %821 = vmax.xlane.f32.xlu1 %v820_v26 }
 0x261   : > { %v927_v27 = vpop.f32.mrb[8].mxu1 }
 0x262   : > { %v928_v28 = vadd.f32 %v927_v27, %v2369_v20  ;;  %v1938_v29 = vpop.f32.mrb[9].mxu1 }
 0x263   : > { %v930_v30 = vpop.f32.mrb[10].mxu1 }
 0x264   : > { %v1939_v31 = vpop.f32.mrb[11].mxu1  ;;  %v933_v32 = vsel %vm773_vm3, %v928_v28, -inf }
 0x265   : > { %934 = vmax.xlane.f32.xlu0 %v933_v32 }
 0x2ea   : > { %v822_v33 = vpop.xlane.xlu1 %821 }
 0x2eb   : > { %v823_v34 = vsub.f32 %v815_v22, %v822_v33 }
 0x2ed   : > { %v824_v35 = vmul.f32 1.442695, %v823_v34 }
 0x2ef   : > { %2075 = vpow2.f32 %v824_v35 }
 0x2f2   : > { %v935_v36 = vpop.xlane.xlu0 %934 }
 0x2f3   : > { %v936_v37 = vsub.f32 %v928_v28, %v935_v36 }
 0x2f5   : > { %v937_v38 = vmul.f32 1.442695, %v936_v37 }
 0x2f7   : > { %2077 = vpow2.f32 %v937_v38 }
 0x2f9   : > { %v2076_v39 = vpop.eup %2075 }
 0x2fa   : > { %v826_v40 = vsel %vm773_vm3, %v2076_v39, 0.0 }
 0x2fb   : > { %827 = vadd.xlane.f32.xlu0 %v826_v40 }
 0x301   : > { %v2078_v41 = vpop.eup %2077 }
 0x302   : > { %v939_v42 = vsel %vm773_vm3, %v2078_v41, 0.0 }
 0x303   : > { %940 = vadd.xlane.f32.xlu1 %v939_v42 }
 0x311   : > { %832 = vrot.lane.b32.xlu0 %v2346_v12, %s2140_s26 }
 0x314   : > { %945 = vrot.lane.b32.xlu1 %v2346_v12, %s2141_s18 }
 0x315   : > { %1086 = vrot.lane.b32.xlu0 %v2348_v14, %s2142_s28  ;;  %s2573_s28 = sld [smem:[#allocation15_spill]] }
 0x318   : > { %1088 = vrot.lane.b32.xlu1 %v2346_v12, %s2143_s15 }
 0x31b   : > { %s2574_s15 = scalar_lea.vmem %s2573_s28, %s2257_s20 }
 0x388   : > { %v828_v43 = vpop.xlane.xlu0 %827 }
 0x389   : > { %2079 = vrcp.f32 %v828_v43 }
 0x38c   : > { %v833_v44 = vpop.permute.xlu0 %832 }
 0x38d   : > { %v839_v45 = vsel %vm837_vm4, %v833_v44, 0 }
 0x38e   : > { %1929 = vmatpush3.bf16.msra.mxu0 %v839_v45 }
 0x38f   : > { %1940 = vmatprep.subr.bf16.mxu0 %v2135_v2 }
 0x390   : > { %v941_v46 = vpop.xlane.xlu1 %940  ;;  %v1087_v9 = vpop.permute.xlu0 %1086 }
 0x391   : > { %2081 = vrcp.f32 %v941_v46 }
 0x393   : > { %v2080_v47 = vpop.eup %2079 }
 0x394   : > { %v830_v48 = vmul.f32 %v2080_v47, %v2076_v39  ;;  %v946_v49 = vpop.permute.xlu1 %945 }
 0x395   : > { %v951_v51 = vsel %vm837_vm4, %v946_v49, 0 }
 0x396   : > { %v831_v50 = vpack.c.bf16 %v830_v48, %v830_v48 }
 0x398   : > { %1931 = vmatmul.mubr.msk.bf16.vlgmr.msra.gmra.mrb[0].mxu0 %vm773_vm3, %v831_v50  ;;  %v1089_v0 = vpop.permute.xlu1 %1088 }
 0x399   : > { %1941 = vmatpush3.bf16.msra.mxu0 %v951_v51  ;;  %1942 = vmatprep.mubr.msk.bf16.mxu0 %vm2136_vm1, %v2135_v2  ;;  %v1094_v7 = vsel %vm773_vm3, %v1089_v0, 0 }
 0x39a   : > { %1952 = vmatprep.subr.bf16.mxu0 %v2135_v2 }
 0x39b   : > { %v2082_v52 = vpop.eup %2081 }
 0x39c   : > { %v943_v53 = vmul.f32 %v2082_v52, %v2078_v41  ;;  %v764_v41 = vld [vmem:[%s2280_s22 + $0x8] sm:$0xf] }
 0x39d   : > { %v1201_v42 = vsel %vm837_vm4, %v764_v41, 0 }
 0x39e   : > { %v944_v54 = vpack.c.bf16 %v943_v53, %v943_v53 }
 0x3a0   : > { %1943 = vmatmul.mubr.msk.bf16.vlgmr.msra.gmra.mrb[4].mxu0 %vm773_vm3, %v944_v54 }
 0x3a1   : > { %1954 = vmatprep.mubr.msk.bf16.mxu0 %vm2136_vm1, %v2135_v2  ;;  %1953 = vmatpush3.bf16.msra.mxu0 %v1044_v56 }
 0x3a2   : > { %1964 = vmatprep.subr.bf16.mxu0 %v2135_v2 }
 0x46b   : > { %v875_v59 = vpop.f32.mrb[0].mxu0 }
 0x46c   : > { %v881_v60 = vpack.c.bf16 %v875_v59, %v875_v59  ;;  %v1932_v61 = vpop.f32.mrb[1].mxu0 }
 0x46d   : > { %v878_v62 = vpop.f32.mrb[2].mxu0 }
 0x46e   : > { %v1933_v63 = vpop.f32.mrb[3].mxu0  ;;  %1955 = vmatmul.mubr.msk.bf16.vlgmr.msra.gmra.mrb[8].mxu0 %vm773_vm3, %v881_v60  ;;  %v765_v60 = vld [vmem:[%s2280_s22 + $0xc] sm:$0xf] }
 0x46f   : > { %1966 = vmatprep.mubr.msk.bf16.mxu0 %vm2136_vm1, %v2135_v2  ;;  %v1359_v61 = vsel %vm837_vm4, %v765_v60, 0 }
 0x473   : > { %v987_v1 = vpop.f32.mrb[4].mxu0 }
 0x474   : > { %v993_v3 = vpack.c.bf16 %v987_v1, %v987_v1  ;;  %v1944_v5 = vpop.f32.mrb[5].mxu0 }
 0x475   : > { %v990_v6 = vpop.f32.mrb[6].mxu0 }
 0x476   : > { %v1945_v8 = vpop.f32.mrb[7].mxu0  ;;  %1949 = vmatmul.mubr.msk.bf16.vlgmr.msra.gmra.mrb[12].mxu1 %vm773_vm3, %v993_v3 }
 0x477   : > { %1959 = vmatpush3.bf16.xpose.msra.mxu1 %v1094_v7  ;;  %1960 = vmatprep.mubr.msk.bf16.mxu1 %vm2136_vm1, %v2135_v2 }
 0x478   : > { %1970 = vmatprep.subr.bf16.mxu1 %v2135_v2 }
 0x47e   : > { %1961 = vmatmul.mubr.msk.bf16.vlgmr.msra.gmra.mrb[16].mxu1 %vm773_vm3, %v1087_v9 }
 0x47f   : > { %1972 = vmatprep.mubr.msk.bf16.mxu1 %vm2136_vm1, %v2135_v2  ;;  %1971 = vmatpush3.bf16.msra.mxu1 %v1201_v42  ;;  %v2073_v42 = vld [vmem:[%s2307_s25 + $0x10] sm:$0xff]  }
 0x480   : > { %1982 = vmatprep.subr.bf16.mxu1 %v2135_v2 }
 0x541   : > { %v1080_v10 = vpop.f32.mrb[8].mxu0 }
 0x542   : > { %v1956_v11 = vpop.f32.mrb[9].mxu0 }
 0x543   : > { %v1083_v13 = vpop.f32.mrb[10].mxu0 }
 0x544   : > { %v1957_v15 = vpop.f32.mrb[11].mxu0 }
 0x545   : > { %v1857_v15 = vld [vmem:[%s2569_s7] ss:$0 sm:$0xff] }
 0x549   : > { %v1034_v16 = vpop.f32.mrb[12].mxu1 }
 0x54a   : > { %v2408_v17 = vadd.f32 %v1080_v10, %v1034_v16  ;;  %v1950_v18 = vpop.f32.mrb[13].mxu1 }
 0x54b   : > { %v1037_v19 = vpop.f32.mrb[14].mxu1 }
 0x54c   : > { %v1951_v21 = vpop.f32.mrb[15].mxu1 }
 0x551   : > { %v1130_v22 = vpop.f32.mrb[16].mxu1 }
 0x552   : > { %v1131_v23 = vadd.f32 %v1130_v22, %v2369_v20  ;;  %v1962_v24 = vpop.f32.mrb[17].mxu1 }
 0x553   : > { %v1133_v25 = vpop.f32.mrb[18].mxu1 }
 0x554   : > { %v1963_v26 = vpop.f32.mrb[19].mxu1  ;;  %v1136_v27 = vsel %vm773_vm3, %v1131_v23, -inf }
 0x555   : > { %1137 = vmax.xlane.f32.xlu1 %v1136_v27 }
 0x566   : > { %1246 = vrot.lane.b32.xlu1 %v2346_v12, %s2144_s14 }
 0x56a   : > { %1244 = vrot.lane.b32.xlu1 %v2348_v14, %s2145_s29 }
 0x5e2   : > { %v1138_v28 = vpop.xlane.xlu1 %1137 }
 0x5e3   : > { %v1139_v29 = vsub.f32 %v1131_v23, %v1138_v28 }
 0x5e5   : > { %v1140_v30 = vmul.f32 1.442695, %v1139_v29 }
 0x5e6   : > { %v1247_v37 = vpop.permute.xlu1 %1246 }
 0x5e7   : > { %2083 = vpow2.f32 %v1140_v30  ;;  %v1252_v39 = vsel %vm773_vm3, %v1247_v37, 0  ;;  %v2069_v30 = vld [vmem:[%s2297_s30] sm:$0xff]  }
 0x5ea   : > { %v1245_v40 = vpop.permute.xlu1 %1244 }
 0x5f1   : > { %v2084_v31 = vpop.eup %2083 }
 0x5f2   : > { %v1142_v32 = vsel %vm773_vm3, %v2084_v31, 0.0 }
 0x5f3   : > { %1143 = vadd.xlane.f32.xlu0 %v1142_v32  ;;  %v2072_v32 = vld [vmem:[%s2307_s25 + $0x8] sm:$0xff]  }
 0x609   : > { %1148 = vrot.lane.b32.xlu0 %v2346_v12, %s2146_s1 }
 0x680   : > { %v1144_v33 = vpop.xlane.xlu0 %1143 }
 0x681   : > { %2085 = vrcp.f32 %v1144_v33 }
 0x684   : > { %v1149_v34 = vpop.permute.xlu0 %1148 }
 0x685   : > { %v1154_v35 = vsel %vm837_vm4, %v1149_v34, 0 }
 0x686   : > { %1965 = vmatpush3.bf16.msra.mxu0 %v1154_v35 }
 0x687   : > { %1976 = vmatprep.subr.bf16.mxu0 %v2135_v2 }
 0x68b   : > { %v2086_v14 = vpop.eup %2085 }
 0x68c   : > { %v1146_v36 = vmul.f32 %v2086_v14, %v2084_v31  ;;  %v2070_v31 = vld [vmem:[%s2297_s30 + $0x8] sm:$0xff]  }
 0x68e   : > { %v1147_v38 = vpack.c.bf16 %v1146_v36, %v1146_v36  ;;  %v1858_v36 = vld [vmem:[%s2570_s24] ss:$0 sm:$0xff] }
 0x690   : > { %1967 = vmatmul.mubr.msk.bf16.vlgmr.msra.gmra.mrb[12].mxu0 %vm773_vm3, %v1147_v38  ;;  %v1859_v38 = vld [vmem:[%s2572_s27] ss:$0 sm:$0xff] }
 0x691   : > { %1977 = vmatpush3.bf16.xpose.msra.mxu0 %v1252_v39  ;;  %1978 = vmatprep.mubr.msk.bf16.mxu0 %vm2136_vm1, %v2135_v2 }
 0x692   : > { %1988 = vmatprep.subr.bf16.mxu0 %v2135_v2 }
 0x698   : > { %1979 = vmatmul.mubr.msk.bf16.vlgmr.msra.gmra.mrb[16].mxu0 %vm773_vm3, %v1245_v40 }
 0x699   : > { %1990 = vmatprep.mubr.msk.bf16.mxu0 %vm2136_vm1, %v2135_v2  ;;  %1989 = vmatpush3.bf16.msra.mxu0 %v1359_v61 }
 0x69a   : > { %2002 = vmatprep.subr.bf16.mxu0 %v2135_v2 }
 0x763   : > { %v1190_v43 = vpop.f32.mrb[12].mxu0 }
 0x764   : > { %v1196_v44 = vpack.c.bf16 %v1190_v43, %v1190_v43  ;;  %v1968_v45 = vpop.f32.mrb[13].mxu0  ;;  %v2074_v43 = vld [vmem:[%s2307_s25 + $0x18] sm:$0xff]  }
 0x765   : > { %v1193_v46 = vpop.f32.mrb[14].mxu0 }
 0x766   : > { %v1969_v47 = vpop.f32.mrb[15].mxu0  ;;  %1973 = vmatmul.mubr.msk.bf16.vlgmr.msra.gmra.mrb[20].mxu1 %vm773_vm3, %v1196_v44  ;;  %v1860_v44 = vld [vmem:[%s2574_s15] ss:$0 sm:$0xff] }
 0x767   : > { %1984 = vmatprep.mubr.msk.bf16.mxu1 %vm2136_vm1, %v2135_v2 }
 0x76b   : > { %v1288_v48 = vpop.f32.mrb[16].mxu0 }
 0x76c   : > { %v1289_v49 = vadd.f32 %v1288_v48, %v2369_v20  ;;  %v1980_v50 = vpop.f32.mrb[17].mxu0 }
 0x76d   : > { %v1291_v51 = vpop.f32.mrb[18].mxu0 }
 0x76e   : > { %v1981_v52 = vpop.f32.mrb[19].mxu0  ;;  %v1294_v53 = vsel %vm773_vm3, %v1289_v49, -inf }
 0x76f   : > { %1295 = vmax.xlane.f32.xlu0 %v1294_v53 }
 0x785   : > { %1306 = vrot.lane.b32.xlu0 %v2346_v12, %s2147_s2 }
 0x7fc   : > { %v1296_v54 = vpop.xlane.xlu0 %1295 }
 0x7fd   : > { %v1297_v55 = vsub.f32 %v1289_v49, %v1296_v54 }
 0x7ff   : > { %v1298_v56 = vmul.f32 1.442695, %v1297_v55 }
 0x800   : > { %v1307_v57 = vpop.permute.xlu0 %1306 }
 0x801   : > { %2087 = vpow2.f32 %v1298_v56  ;;  %v1312_v58 = vsel %vm837_vm4, %v1307_v57, 0 }
 0x802   : > { %1983 = vmatpush3.bf16.msra.mxu1 %v1312_v58 }
 0x803   : > { %1994 = vmatprep.subr.bf16.mxu1 %v2135_v2 }
 0x80b   : > { %v2088_v20 = vpop.eup %2087 }
 0x80c   : > { %v1300_v59 = vsel %vm773_vm3, %v2088_v20, 0.0 }
 0x80d   : > { %1301 = vadd.xlane.f32.xlu1 %v1300_v59 }
 0x839   : > { %v1237_v12 = vpop.f32.mrb[20].mxu1 }
 0x83a   : > { %v1243_v62 = vadd.f32 %v1237_v12, %v2408_v17  ;;  %v1974_v63 = vpop.f32.mrb[21].mxu1 }
 0x83b   : > { %v1240_v0 = vpop.f32.mrb[22].mxu1 }
 0x83c   : > { %v1975_v1 = vpop.f32.mrb[23].mxu1 }
 0x89a   : > { %v1302_v3 = vpop.xlane.xlu1 %1301 }
 0x89b   : > { %2089 = vrcp.f32 %v1302_v3  ;;  %v1870_v3 = vld [vmem:[%s676_s16] ss:$0 sm:$0xff] }
 0x8a5   : > { %v2090_v5 = vpop.eup %2089 }
 0x8a6   : > { %v1304_v6 = vmul.f32 %v2090_v5, %v2088_v20 }
 0x8a8   : > { %v1305_v7 = vpack.c.bf16 %v1304_v6, %v1304_v6  ;;  %v1871_v6 = vld [vmem:[%s679_s8] ss:$0 sm:$0xff] }
 0x8aa   : > { %1985 = vmatmul.mubr.msk.bf16.vlgmr.msra.gmra.mrb[24].mxu1 %vm773_vm3, %v1305_v7 }
 0x8ab   : > { %1998 = vmatprep.mubr.msk.bf16.mxu1 %vm2136_vm1, %v2135_v2  ;;  %1995 = vmatpush3.bf16.msra.mxu1 %v2069_v30 }
 0x8ac   : > { %1996 = vmatprep.subr.bf16.mxu1 %v2135_v2 }
 0x8af   : > { %1997 = vmatpush3.bf16.msra.mxu1 %v2070_v31 }
 0x97d   : > { %v1348_v8 = vpop.f32.mrb[24].mxu1 }
 0x97e   : > { %v1354_v9 = vpack.c.bf16 %v1348_v8, %v1348_v8  ;;  %v1986_v10 = vpop.f32.mrb[25].mxu1 }
 0x97f   : > { %v1351_v11 = vpop.f32.mrb[26].mxu1 }
 0x980   : > { %v1987_v13 = vpop.f32.mrb[27].mxu1  ;;  %1991 = vmatmul.mubr.msk.bf16.vlgmr.msra.gmra.mrb[20].mxu0 %vm773_vm3, %v1354_v9 }
 0x981   : > { %2010 = vmatprep.mubr.msk.bf16.mxu0 %vm2136_vm1, %v2135_v2 }
 0xa53   : > { %v1395_v16 = vpop.f32.mrb[20].mxu0 }
 0xa54   : > { %v1401_v17 = vadd.f32 %v1395_v16, %v1243_v62  ;;  %v1992_v18 = vpop.f32.mrb[21].mxu0 }
 0xa55   : > { %v1398_v19 = vpop.f32.mrb[22].mxu0 }
 0xa56   : > { %v1408_v21 = vadd.f32 %v1857_v15, %v1401_v17  ;;  %v1993_v22 = vpop.f32.mrb[23].mxu0 }
 0xa58   : > { %v1409_v23 = vadd.f32 %v1408_v21, %v2330_v4  ;;  %v2071_v4 = vld [vmem:[%s2307_s25] sm:$0xff]  }
 0xa59   : > { %2003 = vmatpush3.bf16.msra.mxu0 %v2071_v4 }
 0xa5a   : > { %v1412_v24 = vsel %vm718_vm2, %v1409_v23, 0.0  ;;  %2004 = vmatprep.subr.bf16.mxu0 %v2135_v2 }
 0xa5b   : > { %1413 = vadd.xlane.f32.xlu1 %v1412_v24 }
 0xa5d   : > { %2005 = vmatpush3.bf16.msra.mxu0 %v2072_v32 }
 0xa5e   : > { %2006 = vmatprep.subr.bf16.mxu0 %v2135_v2 }
 0xa61   : > { %2007 = vmatpush3.bf16.msra.mxu0 %v2073_v42 }
 0xa62   : > { %2008 = vmatprep.subr.bf16.mxu0 %v2135_v2  ;;  %v1864_v2 = vld [vmem:[%s673_s13] ss:$0 sm:$0xff] }
 0xa65   : > { %2009 = vmatpush3.bf16.msra.mxu0 %v2074_v43 }
 0xae8   : > { %v1414_v25 = vpop.xlane.xlu1 %1413 }
 0xae9   : > { %v1416_v26 = vmul.f32 0.03125, %v1414_v25 }
 0xaeb   : > { %v1417_v27 = vsub.f32 %v1409_v23, %v1416_v26 }
 0xaed   : > { %v1418_v28 = vmul.f32 %v1417_v27, %v1417_v27 }
 0xaef   : > { %v1419_v29 = vsel %vm718_vm2, %v1418_v28, 0.0 }
 0xaf0   : > { %1420 = vadd.xlane.f32.xlu1 %v1419_v29 }
 0xb7d   : > { %v1421_v33 = vpop.xlane.xlu1 %1420 }
 0xb7e   : > { %v1422_v34 = vmul.f32 0.03125, %v1421_v33 }
 0xb80   : > { %v1423_v35 = vadd.f32 1e-12, %v1422_v34 }
 0xb82   : > { %2091 = vrsqrt.f32 %v1423_v35 }
 0xb8c   : > { %v2092_v14 = vpop.eup %2091 }
 0xb8d   : > { %v1425_v37 = vmul.f32 %v2092_v14, %v1417_v27 }
 0xb8f   : > { %v1432_v39 = vmul.f32 %v1858_v36, %v1425_v37 }
 0xb91   : > { %v1439_v40 = vadd.f32 %v1859_v38, %v1432_v39 }
 0xb93   : > { %v1440_v41 = vpack.c.bf16 %v1439_v40, %v1439_v40 }
 0xb95   : > { %1999 = vmatmul.mubr.msk.bf16.vlgmr.msra.gmra.mrb[28].mxu1 %vm718_vm2, %v1440_v41 }
 0xc68   : > { %v1501_v45 = vpop.f32.mrb[28].mxu1 }
 0xc69   : > { %v1502_v46 = vadd.f32 %v1860_v44, %v1501_v45  ;;  %v2000_v47 = vpop.f32.mrb[29].mxu1 }
 0xc6a   : > { %v1504_v48 = vpop.f32.mrb[30].mxu1 }
 0xc6b   : > { %v1507_v49 = vmax.f32 %v1502_v46, 0.0  ;;  %v2001_v50 = vpop.f32.mrb[31].mxu1 }
 0xc6d   : > { %v1508_v51 = vpack.c.bf16 %v1507_v49, %v1507_v49 }
 0xc6f   : > { %2011 = vmatmul.mubr.msk.bf16.vlgmr.msra.gmra.mrb[24].mxu0 %vm1548_vm5, %v1508_v51 }
 0xd42   : > { %v1586_v52 = vpop.f32.mrb[24].mxu0 }
 0xd43   : > { %v1587_v53 = vadd.f32 %v1864_v2, %v1586_v52  ;;  %v2012_v54 = vpop.f32.mrb[25].mxu0 }
 0xd44   : > { %v1589_v55 = vpop.f32.mrb[26].mxu0 }
 0xd45   : > { %v2013_v56 = vpop.f32.mrb[27].mxu0  ;;  %v1592_v57 = vadd.f32 %v1587_v53, %v1439_v40 }
 0xd47   : > { %v1595_v58 = vsel %vm718_vm2, %v1592_v57, 0.0 }
 0xd48   : > { %1596 = vadd.xlane.f32.xlu1 %v1595_v58 }
 0xdd5   : > { %v1597_v20 = vpop.xlane.xlu1 %1596 }
 0xdd6   : > { %v1598_v59 = vmul.f32 0.03125, %v1597_v20 }
 0xdd8   : > { %v1599_v60 = vsub.f32 %v1592_v57, %v1598_v59 }
 0xdda   : > { %v1600_v61 = vmul.f32 %v1599_v60, %v1599_v60 }
 0xddc   : > { %v1601_v12 = vsel %vm718_vm2, %v1600_v61, 0.0 }
 0xddd   : > { %1602 = vadd.xlane.f32.xlu1 %v1601_v12 }
 0xe6a   : > { %v1603_v62 = vpop.xlane.xlu1 %1602 }
 0xe6b   : > { %v1604_v63 = vmul.f32 0.03125, %v1603_v62 }
 0xe6d   : > { %v1605_v0 = vadd.f32 1e-12, %v1604_v63 }
 0xe6f   : > { %2093 = vrsqrt.f32 %v1605_v0 }
 0xe79   : > { %v2094_v1 = vpop.eup %2093 }
 0xe7a   : > { %v1607_v5 = vmul.f32 %v2094_v1, %v1599_v60  ;;  %1626 = sbr.rel (%p1872_p8) target bundleno = 3713 (0xe81), region = 84 }
 0xe7c   : > { %v1614_v7 = vmul.f32 %v1870_v3, %v1607_v5 }
 0xe7e   : > { %v1621_v8 = vadd.f32 %v1871_v6, %v1614_v7 }
 0xe80   : > { %1622 = vst.msk [vmem:[#allocation2] sm:$0xff] %vm718_vm2, %v1621_v8  ;;  %1627 = vst.msk [vmem:[%s683_s9] sm:$0xff] (!%p1872_p8), %vm718_vm2, %v1621_v8 }
 0xe81 PF: > { %s2578_s16 = sld [smem:[#allocation6_spill]]  ;;  %s2579_s29 = sld [smem:[#allocation4_spill]] }
 0xe82   : > { %s2580_s30 = sld [smem:[#allocation5_spill]]  ;;  %s2581_s15 = sld [smem:[#allocation7_spill]] }
 0xe87   : > { %s24_s17 = sadd.s32 1, %s2578_s16   ;;  %s2582_s16 = sld [smem:[#allocation8_spill]] }
 0xe88   : > { %p21_p9 = scmp.ge.s32.totalorder %s24_s17, 6  }
 0xe8a   :  { %23 = sbr.rel (!%p21_p9) target bundleno = 10 (0xa), region = 153 }

// kernel: transformer_forward.3
= control target key start
LH: loop header
LB: loop body
LE: loop exit
PB: predicated region body
PF: predicated region fallthrough
CT: control target
= control target key end

     0   :  { %s4660_s0 = inlined_call_operand.vmem [shape: f32[2,8,32], index: 0, kind: input, shape index: {}]   ;;  %s4661_s1 = inlined_call_operand.vmem [shape: f32[2,8,32], index: 1, kind: input, shape index: {}]   ;;  %s4662_s2 = inlined_call_operand.vmem [shape: f32[2,8,8], index: 2, kind: input, shape index: {}]   ;;  %s4663_s3 = inlined_call_operand.vmem [shape: f32[2,8,8], index: 3, kind: input, shape index: {}]   ;;  %s4664_s4 = inlined_call_operand.vmem [shape: bf16[2,32,96], index: 4, kind: input, shape index: {}]   ;;  %s4665_s5 = inlined_call_operand.vmem [shape: f32[2,1,96], index: 5, kind: input, shape index: {}]   ;;  %s4666_s6 = inlined_call_operand.vmem [shape: bf16[2,32,32], index: 6, kind: input, shape index: {}]   ;;  %s4667_s7 = inlined_call_operand.vmem [shape: f32[2,1,32], index: 7, kind: input, shape index: {}]   ;;  %s4668_s8 = inlined_call_operand.vmem [shape: f32[2,1,32], index: 8, kind: input, shape index: {}]   ;;  %s4669_s9 = inlined_call_operand.vmem [shape: f32[2,1,32], index: 9, kind: input, shape index: {}]   ;;  %s4670_s10 = inlined_call_operand.vmem [shape: bf16[2,32,32], index: 10, kind: input, shape index: {}]   ;;  %s4671_s11 = inlined_call_operand.vmem [shape: f32[2,1,32], index: 11, kind: input, shape index: {}]   ;;  %s4672_s12 = inlined_call_operand.vmem [shape: bf16[2,32,64], index: 12, kind: input, shape index: {}]   ;;  %s4673_s13 = inlined_call_operand.vmem [shape: f32[2,1,64], index: 13, kind: input, shape index: {}]   ;;  %s4674_s14 = inlined_call_operand.vmem [shape: bf16[2,32,32], index: 14, kind: input, shape index: {}]   ;;  %s4675_s15 = inlined_call_operand.vmem [shape: f32[2,1,32], index: 15, kind: input, shape index: {}]   ;;  %s4676_s16 = inlined_call_operand.vmem [shape: f32[2,1,32], index: 16, kind: input, shape index: {}]   ;;  %s4677_s17 = inlined_call_operand.vmem [shape: f32[2,1,32], index: 17, kind: input, shape index: {}]   ;;  %s4678_s18 = inlined_call_operand.vmem [shape: bf16[2,32,64], index: 18, kind: input, shape index: {}]   ;;  %s4679_s19 = inlined_call_operand.vmem [shape: f32[2,1,64], index: 19, kind: input, shape index: {}]   ;;  %s4680_s20 = inlined_call_operand.vmem [shape: bf16[2,64,32], index: 20, kind: input, shape index: {}]   ;;  %s4681_s21 = inlined_call_operand.vmem [shape: f32[2,1,32], index: 21, kind: input, shape index: {}]   ;;  %s4682_s22 = inlined_call_operand.vmem [shape: f32[2,1,32], index: 22, kind: input, shape index: {}]   ;;  %s4683_s23 = inlined_call_operand.vmem [shape: f32[2,1,32], index: 23, kind: input, shape index: {}]   ;;  %s4684_s24 = inlined_call_operand.vmem [shape: bf16[32,128], index: 24, kind: input, shape index: {}]   ;;  %s4685_s25 = inlined_call_operand.vmem [shape: f32[1,128], index: 25, kind: input, shape index: {}]   ;;  %s4686_s26 = inlined_call_operand.hbm [shape: f32[2,8,128], index: 26, kind: output, shape index: {}]  }
   0x1   :  { %4706 = sst [smem:[#allocation21_spill]] %s4660_s0 }
   0x2   :  { %4707 = sst [smem:[#allocation22_spill]] %s4661_s1 }
   0x3   :  { %4708 = sst [smem:[#allocation23_spill]] %s4662_s2 }
   0x4   :  { %4709 = sst [smem:[#allocation24_spill]] %s4663_s3 }
   0x5   :  { %4710 = sst [smem:[#allocation25_spill]] %s4664_s4 }
   0x6   :  { %4711 = sst [smem:[#allocation26_spill]] %s4665_s5 }
   0x7   :  { %4712 = sst [smem:[#allocation27_spill]] %s4666_s6 }
   0x8   :  { %4713 = sst [smem:[#allocation28_spill]] %s4667_s7 }
   0x9   :  { %4714 = sst [smem:[#allocation29_spill]] %s4668_s8 }
   0xa   :  { %4715 = sst [smem:[#allocation30_spill]] %s4669_s9 }
   0xb   :  { %4716 = sst [smem:[#allocation31_spill]] %s4670_s10 }
   0xc   :  { %4717 = sst [smem:[#allocation32_spill]] %s4672_s12 }
   0xd   :  { %4718 = sst [smem:[#allocation33_spill]] %s4674_s14 }
   0xe   :  { %4719 = sst [smem:[#allocation34_spill]] %s4675_s15 }
   0xf   :  { %4720 = sst [smem:[#allocation35_spill]] %s4676_s16 }
  0x10   :  { %4721 = sst [smem:[#allocation36_spill]] %s4677_s17 }
  0x11   :  { %4722 = sst [smem:[#allocation37_spill]] %s4678_s18 }
  0x12   :  { %4723 = sst [smem:[#allocation38_spill]] %s4680_s20 }
  0x13   :  { %4724 = sst [smem:[#allocation39_spill]] %s4681_s21 }
  0x14   :  { %4725 = sst [smem:[#allocation40_spill]] %s4682_s22 }
  0x15   :  { %4726 = sst [smem:[#allocation41_spill]] %s4683_s23 }
  0x16   :  { %4727 = sst [smem:[#allocation42_spill]] %s4684_s24 }
  0x17   :  { %4728 = sst [smem:[#allocation43_spill]] %s4685_s25 }
  0x18   :  { %4729 = sst [smem:[#allocation44_spill]] %s4686_s26 }
  0x19   :  { %31 = vsyncpa [#allocation4], 0 }
  0x1a   :  { %33 = vsyncpa [#allocation4 + $0x1], 0  ;;  %s4057_s27 = smov 0   ;;  %s4059_s3 = smov 0  }
  0x1b   :  { %s4061_s7 = smov 0   ;;  %s4063_s28 = smov 0  }
  0x1c   :  { %s4065_s8 = smov 0   ;;  %s4067_s4 = smov 0  }
  0x1d   :  { %s4069_s29 = smov 0   ;;  %s4071_s0 = smov 0  }
  0x1e LB: > { %4730 = sst [smem:[#allocation6_spill]] %s3876_s27  ;;  %s3313_s9 = sadd.s32 4294967295, %s3904_s0   ;;  %s3904_s0 = sphi %s4071_s0, %s39_s0   ;;  %s3900_s29 = sphi %s4069_s29, %s4814_s29   ;;  %s3896_s4 = sphi %s4067_s4, %s4813_s4   ;;  %s3892_s8 = sphi %s4065_s8, %s4812_s8   ;;  %s3888_s28 = sphi %s4063_s28, %s4811_s28   ;;  %s3884_s7 = sphi %s4061_s7, %s4810_s7   ;;  %s3880_s3 = sphi %s4059_s3, %s4809_s3   ;;  %s3876_s27 = sphi %s4057_s27, %s4808_s27  }
  0x1f   : > { %4731 = sst [smem:[#allocation7_spill]] %s3880_s3  ;;  %s3314_s30 = sadd.s32 4294967294, %s3904_s0  }
  0x20   : > { %4732 = sst [smem:[#allocation8_spill]] %s3884_s7  ;;  %s48_s2 = sadd.s32 1, %s3896_s4 }
  0x21   : > { %4733 = sst [smem:[#allocation9_spill]] %s3888_s28  ;;  %p49_p0 = scmp.ge.s32.totalorder %s48_s2, 2 }
  0x22   : > { %4734 = sst [smem:[#allocation10_spill]] %s3892_s8  ;;  %s51_s5 = sadd.s32 1, %s3900_s29 }
  0x23   : > { %4735 = sst [smem:[#allocation11_spill]] %s3896_s4  ;;  %p734_p1 = scmp.ne.s32.totalorder %s3884_s7, %s3880_s3 }
  0x24   : > { %4736 = sst [smem:[#allocation12_spill]] %s3900_s29  ;;  %p735_p2 = scmp.eq.s32.totalorder %s3313_s9, 3 }
  0x25   : > { %4737 = sst [smem:[#allocation13_spill]] %s3904_s0  ;;  %s4816_s2 = smov (%p49_p0, %s48_s2), 0 }
  0x26   : > { %4738 = sst [smem:[#allocation14_spill]] %s4816_s2  ;;  %s4818_s5 = smov (!%p49_p0, %s51_s5), %s3900_s29 }
  0x27   : > { %p4106_p3 = por %p735_p2, %p734_p1  ;;  %p740_p4 = scmp.ne.s32.totalorder %s3880_s3, %s3876_s27 }
  0x28   : > { %p53_p5 = scmp.ge.s32.totalorder %s4818_s5, 2  ;;  %p741_p6 = scmp.eq.s32.totalorder %s3314_s30, 3 }
  0x29   : > { %s4739_s10 = scalar_select %p4106_p3, 1, 0 }
  0x2a   : > { %p3317_p7 = scmp.ge.s32.totalorder %s3904_s0, 1  ;;  %p927_p8 = scmp.lt.s32.totalorder %s3904_s0, 5 }
  0x2b   : > { %4740 = sst [smem:[#allocation15_spill]] %s4739_s10  ;;  %s4820_s5 = smov (%p53_p5, %s4818_s5), 0 }
  0x2c   : > { %4741 = sst [smem:[#allocation16_spill]] %s4820_s5  ;;  %p4116_p9 = por %p741_p6, %p740_p4 }
  0x2d   : > { %p928_p10 = pnand %p3317_p7, %p927_p8  ;;  %s721_s1 = ssub.s32 %s3900_s29, %s4820_s5 }
  0x2e   : > { %s4742_s6 = scalar_select %p4116_p9, 1, 0 }
  0x2f   : > { %s724_s9 = sadd.s32 1, %s3884_s7  ;;  %p722_p11 = scmp.eq.s32.totalorder %s721_s1, 0 }
  0x30   : > { %4743 = sst [smem:[#allocation17_spill]] %s4742_s6  ;;  %931 = sbr.rel (%p928_p10) target bundleno = 6900 (0x1af4), region = 124 }
  0x31   : > { %s4124_s2 = scalar_select %p722_p11, %s3884_s7, %s724_s9  }
  0x33   : > { %4744 = sst [smem:[#allocation18_spill]] %s4124_s2 }
  0x37   : > { %s4692_s30 = sand.u32 1, %s3880_s3   ;;  %p1082_p12 = scmp.lt.s32.totalorder %s3892_s8, 1 }
  0x38   : > { %s4130_s4 = sshll.u32 %s4692_s30, 3  ;;  %p1098_p13 = scmp.lt.s32.totalorder %s3888_s28, 1 }
  0x39   : > { %s1083_s6 = scalar_select %p1082_p12, %s3892_s8, 1 }
  0x3a   : > { %s4135_s27 = scalar_select %p1098_p13, %s3888_s28, 1 }
  0x3b   : > { %s4137_s1 = sshll.u32 %s1083_s6, 3  ;;  %s4746_s29 = sld [smem:[#allocation21_spill]] }
  0x3c   : > { %4745 = sst [smem:[#allocation19_spill]] %s4137_s1  ;;  %s3401_s5 = sshll.u32 %s4135_s27, 4 }
  0x3d   : > { %s4751_s2 = sld [smem:[#allocation25_spill]]  ;;  %s4753_s8 = sld [smem:[#allocation27_spill]] }
  0x3e   : > { %s4757_s3 = sld [smem:[#allocation31_spill]]  ;;  %s4758_s12 = sld [smem:[#allocation32_spill]] }
  0x3f   : > { %s4759_s14 = sld [smem:[#allocation33_spill]]  ;;  %s4763_s18 = sld [smem:[#allocation37_spill]] }
  0x40   : > { %s4765_s6 = sld [smem:[#allocation39_spill]]  ;;  %s4766_s17 = sld [smem:[#allocation40_spill]] }
  0x41   : > { %s1085_s30 = scalar_lea.vmem %s4746_s29, %s4137_s1  ;;  %s1157_s29 = scalar_lea.vmem %s4679_s19, %s4135_s27 }
  0x42   : > { %s1081_s20 = scalar_lea.vmem [#allocation3], %s4130_s4  ;;  %s4768_s7 = sld [smem:[#allocation9_spill]] }
  0x43   : > { %s4163_s0 = scalar_lea.vmem %s4751_s2, %s3401_s5  ;;  %s4168_s26 = scalar_lea.vmem %s4753_s8, %s3401_s5 }
  0x44   : > { %4752 = sst [smem:[#allocation20_spill]] %s4163_s0  ;;  %s4185_s10 = scalar_lea.vmem %s4757_s3, %s3401_s5 }
  0x45   : > { %s4194_s25 = scalar_lea.vmem %s4758_s12, %s3401_s5  ;;  %s4203_s1 = scalar_lea.vmem %s4759_s14, %s3401_s5 }
  0x46   : > { %s4220_s9 = scalar_lea.vmem %s4763_s18, %s3401_s5  ;;  %s3407_s14 = sshll.u32 %s4135_s27, 5 }
  0x47   : > { %s4764_s2 = sld [smem:[#allocation38_spill]]  ;;  %s1165_s23 = scalar_lea.vmem %s4765_s6, %s4135_s27 }
  0x48   : > { %s1168_s12 = scalar_lea.vmem %s4766_s17, %s4135_s27  ;;  %s4767_s18 = sld [smem:[#allocation41_spill]] }
  0x49   : > { %p3337_p0 = scmp.ne.s32.totalorder %s4768_s7, 0 }
  0x4a   : > { %v1177_v0 = vld [vmem:[%s1085_s30] sm:$0xff] (!%p3337_p0)  ;;  %vm1178_vm0 = vcmask (!%p3337_p0), 261120  }
  0x4b   : > { %1176 = sbr.rel (%p3337_p0) target bundleno = 82 (0x52), region = 128  ;;  %1179 = vst.msk [vmem:[#allocation2] sm:$0xff] (!%p3337_p0), %vm1178_vm0, %v1177_v0 }
  0x4d   : > { %s4230_s15 = scalar_lea.vmem %s4764_s2, %s3407_s14 }
  0x4e   : > { %s1171_s16 = scalar_lea.vmem %s4767_s18, %s4135_s27 }
  0x52 PF: > { %s4769_s14 = sld [smem:[#allocation20_spill]]  ;;  %v3906_v2 = vmov 0.0   ;;  %vm3907_vm1 = vmmov 0   ;;  %v4252_v4 = vld [vmem:[#allocation2] sm:$0xff]  ;;  %vm1206_vm2 = vcmask 261120   ;;  %s4770_s30 = sld [smem:[#allocation26_spill]] }
  0x53   : > { %3476 = vmatprep.subr.bf16.mxu1 %v3906_v2  ;;  %3490 = vmatprep.subr.bf16.mxu0 %v3906_v2  ;;  %v1182_v5 = vpack.c.bf16 %v4252_v4, %v4252_v4  ;;  %s3908_s2 = smov 96   ;;  %s3909_s6 = smov 120   ;;  %vm1262_vm3 = vcmask 64512   ;;  %vm1326_vm4 = vcmask 1043456   ;;  %v1251_v55 = vld [vmem:[%s4168_s26] sm:$0xf] }
  0x54   : > { %3480 = vmatprep.mubr.msk.bf16.mxu1 %vm3907_vm1, %v3906_v2  ;;  %3492 = vmatprep.mubr.msk.bf16.mxu0 %vm3907_vm1, %v3906_v2  ;;  %s3910_s0 = smov 88   ;;  %s4772_s3 = sld [smem:[#allocation19_spill]]  ;;  %v1533_v56 = vsel %vm1326_vm4, %v1251_v55, 0  ;;  %v1252_v57 = vld [vmem:[%s4168_s26 + $0x4] sm:$0xf]  ;;  %vm2845_vm5 = vcmask 523264  }
  0x55   : > { %s4773_s28 = sld [smem:[#allocation23_spill]]  ;;  %s3911_s22 = smov 64   ;;  %v1487_v58 = vsel %vm1326_vm4, %v1252_v57, 0 }
  0x56   : > { %s3912_s7 = smov 56   ;;  %s3914_s17 = smov 80  }
  0x57   : > { %s3915_s18 = smov 72   ;;  %s3918_s8 = smov 40  }
  0x58   : > { %v3758_v1 = vld [vmem:[%s4769_s14] sm:$0xff]   ;;  %v3759_v3 = vld [vmem:[%s4769_s14 + $0x8] sm:$0xff]   ;;  %s4771_s21 = scalar_lea.vmem %s4770_s30, %s4135_s27  ;;  %s3913_s14 = smov 112  }
  0x59   : > { %3477 = vmatpush3.bf16.msra.mxu1 %v3758_v1  ;;  %v3338_v6 = vld [vmem:[%s4771_s21] ss:$0 sm:$0xff]  ;;  %s3916_s30 = smov 104   ;;  %s3917_s21 = smov 48  }
  0x5a   : > { %3478 = vmatprep.subr.bf16.mxu1 %v3906_v2 }
  0x5b   : > { %s4774_s5 = scalar_lea.vmem %s4773_s28, %s4772_s3  ;;  %s4779_s28 = sld [smem:[#allocation29_spill]] }
  0x5c   : > { %v4294_v20 = vld [vmem:[%s4774_s5] sm:$0xff]  ;;  %s4775_s5 = sld [smem:[#allocation28_spill]] }
  0x5d   : > { %3479 = vmatpush3.bf16.msra.mxu1 %v3759_v3 }
  0x5e   : > { %3484 = vmatprep.subr.bf16.mxu1 %v3906_v2 }
  0x60   : > { %3481 = vmatmul.mubr.msk.bf16.vlgmr.msra.gmra.mrb[0].mxu1 %vm1206_vm2, %v1182_v5 }
  0x61   : > { %3486 = vmatprep.mubr.msk.bf16.mxu1 %vm3907_vm1, %v3906_v2 }
 0x133   : > { %v1244_v7 = vpop.f32.mrb[0].mxu1 }
 0x134   : > { %v1245_v8 = vadd.f32 %v3338_v6, %v1244_v7  ;;  %v3482_v9 = vpop.f32.mrb[1].mxu1 }
 0x135   : > { %v1247_v10 = vpop.f32.mrb[2].mxu1 }
 0x136   : > { %v1256_v11 = vmul.f32 0.35355338, %v1245_v8  ;;  %v4268_v12 = vpack.c.bf16 %v1245_v8, %v1245_v8  ;;  %v3483_v13 = vpop.f32.mrb[3].mxu1 }
 0x138   : > { %v4270_v14 = vpack.c.bf16 %v1256_v11, %v1256_v11  ;;  %1260 = vrot.lane.b32.xlu0 %v4268_v12, %s3908_s2 }
 0x13a   : > { %1372 = vrot.lane.b32.xlu1 %v4270_v14, %s3909_s6 }
 0x13c   : > { %1374 = vrot.lane.b32.xlu0 %v4268_v12, %s3910_s0 }
 0x1aa   : > { %v1261_v15 = vpop.permute.xlu0 %1260 }
 0x1ab   : > { %v1267_v16 = vsel %vm1262_vm3, %v1261_v15, 0 }
 0x1ac   : > { %3485 = vmatpush3.bf16.xpose.msra.mxu1 %v1267_v16  ;;  %v1373_v19 = vpop.permute.xlu1 %1372 }
 0x1ad   : > { %3496 = vmatprep.subr.bf16.mxu1 %v3906_v2 }
 0x1ae   : > { %v1375_v17 = vpop.permute.xlu0 %1374 }
 0x1af   : > { %v1380_v18 = vsel %vm1262_vm3, %v1375_v17, 0 }
 0x1b3   : > { %3487 = vmatmul.mubr.msk.bf16.vlgmr.msra.gmra.mrb[4].mxu1 %vm1262_vm3, %v4270_v14 }
 0x1b4   : > { %3497 = vmatpush3.bf16.xpose.msra.mxu1 %v1380_v18  ;;  %3498 = vmatprep.mubr.msk.bf16.mxu1 %vm3907_vm1, %v3906_v2 }
 0x1b5   : > { %3508 = vmatprep.subr.bf16.mxu1 %v3906_v2 }
 0x1bb   : > { %3499 = vmatmul.mubr.msk.bf16.vlgmr.msra.gmra.mrb[8].mxu1 %vm1262_vm3, %v1373_v19 }
 0x1bc   : > { %3510 = vmatprep.mubr.msk.bf16.mxu1 %vm3907_vm1, %v3906_v2  ;;  %3509 = vmatpush3.bf16.msra.mxu1 %v1487_v58 }
 0x1bd   : > { %3520 = vmatprep.subr.bf16.mxu1 %v3906_v2 }
 0x286   : > { %v1303_v21 = vpop.f32.mrb[4].mxu1 }
 0x287   : > { %v1304_v22 = vadd.f32 %v1303_v21, %v4294_v20  ;;  %v3488_v23 = vpop.f32.mrb[5].mxu1 }
 0x288   : > { %v1306_v24 = vpop.f32.mrb[6].mxu1 }
 0x289   : > { %v3489_v25 = vpop.f32.mrb[7].mxu1  ;;  %v1309_v26 = vsel %vm1262_vm3, %v1304_v22, -inf }
 0x28a   : > { %1310 = vmax.xlane.f32.xlu1 %v1309_v26 }
 0x28e   : > { %v1416_v27 = vpop.f32.mrb[8].mxu1 }
 0x28f   : > { %v1417_v28 = vadd.f32 %v1416_v27, %v4294_v20  ;;  %v3500_v29 = vpop.f32.mrb[9].mxu1 }
 0x290   : > { %v1419_v30 = vpop.f32.mrb[10].mxu1 }
 0x291   : > { %v3501_v31 = vpop.f32.mrb[11].mxu1  ;;  %v1422_v32 = vsel %vm1262_vm3, %v1417_v28, -inf }
 0x292   : > { %1423 = vmax.xlane.f32.xlu0 %v1422_v32 }
 0x317   : > { %v1311_v33 = vpop.xlane.xlu1 %1310 }
 0x318   : > { %v1312_v34 = vsub.f32 %v1304_v22, %v1311_v33 }
 0x31a   : > { %v1313_v35 = vmul.f32 1.442695, %v1312_v34 }
 0x31c   : > { %3770 = vpow2.f32 %v1313_v35 }
 0x31f   : > { %v1424_v36 = vpop.xlane.xlu0 %1423 }
 0x320   : > { %v1425_v37 = vsub.f32 %v1417_v28, %v1424_v36 }
 0x322   : > { %v1426_v38 = vmul.f32 1.442695, %v1425_v37 }
 0x324   : > { %3772 = vpow2.f32 %v1426_v38 }
 0x326   : > { %v3771_v39 = vpop.eup %3770 }
 0x327   : > { %v1315_v40 = vsel %vm1262_vm3, %v3771_v39, 0.0 }
 0x328   : > { %1316 = vadd.xlane.f32.xlu0 %v1315_v40 }
 0x32e   : > { %v3773_v41 = vpop.eup %3772 }
 0x32f   : > { %v1428_v42 = vsel %vm1262_vm3, %v3773_v41, 0.0 }
 0x330   : > { %1429 = vadd.xlane.f32.xlu1 %v1428_v42 }
 0x33e   : > { %1321 = vrot.lane.b32.xlu0 %v4268_v12, %s3911_s22  ;;  %s4776_s22 = scalar_lea.vmem %s4775_s5, %s4135_s27  ;;  %s4780_s5 = scalar_lea.vmem %s4779_s28, %s4135_s27 }
 0x341   : > { %1434 = vrot.lane.b32.xlu1 %v4268_v12, %s3912_s7 }
 0x342   : > { %1575 = vrot.lane.b32.xlu0 %v4270_v14, %s3913_s14 }
 0x345   : > { %1577 = vrot.lane.b32.xlu1 %v4268_v12, %s3914_s17 }
 0x3b5   : > { %v1317_v43 = vpop.xlane.xlu0 %1316 }
 0x3b6   : > { %3774 = vrcp.f32 %v1317_v43 }
 0x3b9   : > { %v1322_v44 = vpop.permute.xlu0 %1321 }
 0x3ba   : > { %v1328_v45 = vsel %vm1326_vm4, %v1322_v44, 0 }
 0x3bb   : > { %3491 = vmatpush3.bf16.msra.mxu0 %v1328_v45 }
 0x3bc   : > { %3502 = vmatprep.subr.bf16.mxu0 %v3906_v2 }
 0x3bd   : > { %v1430_v46 = vpop.xlane.xlu1 %1429  ;;  %v1576_v9 = vpop.permute.xlu0 %1575 }
 0x3be   : > { %3776 = vrcp.f32 %v1430_v46 }
 0x3c0   : > { %v3775_v47 = vpop.eup %3774 }
 0x3c1   : > { %v1319_v48 = vmul.f32 %v3775_v47, %v3771_v39  ;;  %v1435_v49 = vpop.permute.xlu1 %1434 }
 0x3c2   : > { %v1440_v51 = vsel %vm1326_vm4, %v1435_v49, 0 }
 0x3c3   : > { %v1320_v50 = vpack.c.bf16 %v1319_v48, %v1319_v48 }
 0x3c5   : > { %3493 = vmatmul.mubr.msk.bf16.vlgmr.msra.gmra.mrb[0].mxu0 %vm1262_vm3, %v1320_v50  ;;  %v1578_v0 = vpop.permute.xlu1 %1577 }
 0x3c6   : > { %3503 = vmatpush3.bf16.msra.mxu0 %v1440_v51  ;;  %3504 = vmatprep.mubr.msk.bf16.mxu0 %vm3907_vm1, %v3906_v2  ;;  %v1583_v7 = vsel %vm1262_vm3, %v1578_v0, 0 }
 0x3c7   : > { %3514 = vmatprep.subr.bf16.mxu0 %v3906_v2 }
 0x3c8   : > { %v3777_v52 = vpop.eup %3776 }
 0x3c9   : > { %v1432_v53 = vmul.f32 %v3777_v52, %v3773_v41  ;;  %v1253_v41 = vld [vmem:[%s4168_s26 + $0x8] sm:$0xf] }
 0x3ca   : > { %v1690_v42 = vsel %vm1326_vm4, %v1253_v41, 0 }
 0x3cb   : > { %v1433_v54 = vpack.c.bf16 %v1432_v53, %v1432_v53 }
 0x3cd   : > { %3505 = vmatmul.mubr.msk.bf16.vlgmr.msra.gmra.mrb[4].mxu0 %vm1262_vm3, %v1433_v54 }
 0x3ce   : > { %3516 = vmatprep.mubr.msk.bf16.mxu0 %vm3907_vm1, %v3906_v2  ;;  %3515 = vmatpush3.bf16.msra.mxu0 %v1533_v56 }
 0x3cf   : > { %3526 = vmatprep.subr.bf16.mxu0 %v3906_v2 }
 0x498   : > { %v1364_v59 = vpop.f32.mrb[0].mxu0 }
 0x499   : > { %v1370_v60 = vpack.c.bf16 %v1364_v59, %v1364_v59  ;;  %v3494_v61 = vpop.f32.mrb[1].mxu0 }
 0x49a   : > { %v1367_v62 = vpop.f32.mrb[2].mxu0 }
 0x49b   : > { %v3495_v63 = vpop.f32.mrb[3].mxu0  ;;  %3517 = vmatmul.mubr.msk.bf16.vlgmr.msra.gmra.mrb[8].mxu0 %vm1262_vm3, %v1370_v60 }
 0x49c   : > { %3528 = vmatprep.mubr.msk.bf16.mxu0 %vm3907_vm1, %v3906_v2 }
 0x4a0   : > { %v1476_v1 = vpop.f32.mrb[4].mxu0 }
 0x4a1   : > { %v1482_v3 = vpack.c.bf16 %v1476_v1, %v1476_v1  ;;  %v3506_v5 = vpop.f32.mrb[5].mxu0 }
 0x4a2   : > { %v1479_v6 = vpop.f32.mrb[6].mxu0 }
 0x4a3   : > { %v3507_v8 = vpop.f32.mrb[7].mxu0  ;;  %3511 = vmatmul.mubr.msk.bf16.vlgmr.msra.gmra.mrb[12].mxu1 %vm1262_vm3, %v1482_v3  ;;  %v1254_v6 = vld [vmem:[%s4168_s26 + $0xc] sm:$0xf] }
 0x4a4   : > { %3521 = vmatpush3.bf16.xpose.msra.mxu1 %v1583_v7  ;;  %3522 = vmatprep.mubr.msk.bf16.mxu1 %vm3907_vm1, %v3906_v2  ;;  %v1848_v7 = vsel %vm1326_vm4, %v1254_v6, 0 }
 0x4a5   : > { %3532 = vmatprep.subr.bf16.mxu1 %v3906_v2 }
 0x4ab   : > { %3523 = vmatmul.mubr.msk.bf16.vlgmr.msra.gmra.mrb[16].mxu1 %vm1262_vm3, %v1576_v9 }
 0x4ac   : > { %3534 = vmatprep.mubr.msk.bf16.mxu1 %vm3907_vm1, %v3906_v2  ;;  %3533 = vmatpush3.bf16.msra.mxu1 %v1690_v42 }
 0x4ad   : > { %3544 = vmatprep.subr.bf16.mxu1 %v3906_v2 }
 0x56e   : > { %v1569_v10 = vpop.f32.mrb[8].mxu0 }
 0x56f   : > { %v3518_v11 = vpop.f32.mrb[9].mxu0 }
 0x570   : > { %v1572_v13 = vpop.f32.mrb[10].mxu0 }
 0x571   : > { %v3519_v15 = vpop.f32.mrb[11].mxu0 }
 0x572   : > { %v3354_v15 = vld [vmem:[%s4776_s22] ss:$0 sm:$0xff] }
 0x576   : > { %v1523_v16 = vpop.f32.mrb[12].mxu1 }
 0x577   : > { %v4335_v17 = vadd.f32 %v1569_v10, %v1523_v16  ;;  %v3512_v18 = vpop.f32.mrb[13].mxu1 }
 0x578   : > { %v1526_v19 = vpop.f32.mrb[14].mxu1 }
 0x579   : > { %v3513_v21 = vpop.f32.mrb[15].mxu1 }
 0x57e   : > { %v1619_v22 = vpop.f32.mrb[16].mxu1 }
 0x57f   : > { %v1620_v23 = vadd.f32 %v1619_v22, %v4294_v20  ;;  %v3524_v24 = vpop.f32.mrb[17].mxu1 }
 0x580   : > { %v1622_v25 = vpop.f32.mrb[18].mxu1 }
 0x581   : > { %v3525_v26 = vpop.f32.mrb[19].mxu1  ;;  %v1625_v27 = vsel %vm1262_vm3, %v1620_v23, -inf }
 0x582   : > { %1626 = vmax.xlane.f32.xlu1 %v1625_v27 }
 0x593   : > { %1735 = vrot.lane.b32.xlu1 %v4268_v12, %s3915_s18 }
 0x597   : > { %1733 = vrot.lane.b32.xlu1 %v4270_v14, %s3916_s30 }
 0x60f   : > { %v1627_v28 = vpop.xlane.xlu1 %1626 }
 0x610   : > { %v1628_v29 = vsub.f32 %v1620_v23, %v1627_v28 }
 0x612   : > { %v1629_v30 = vmul.f32 1.442695, %v1628_v29 }
 0x613   : > { %v1736_v37 = vpop.permute.xlu1 %1735 }
 0x614   : > { %3778 = vpow2.f32 %v1629_v30  ;;  %v1741_v39 = vsel %vm1262_vm3, %v1736_v37, 0  ;;  %v3760_v30 = vld [vmem:[%s4194_s25] sm:$0xff]  }
 0x617   : > { %v1734_v40 = vpop.permute.xlu1 %1733 }
 0x61e   : > { %v3779_v31 = vpop.eup %3778 }
 0x61f   : > { %v1631_v32 = vsel %vm1262_vm3, %v3779_v31, 0.0 }
 0x620   : > { %1632 = vadd.xlane.f32.xlu0 %v1631_v32 }
 0x636   : > { %1637 = vrot.lane.b32.xlu0 %v4268_v12, %s3917_s21  ;;  %s4777_s21 = sld [smem:[#allocation22_spill]] }
 0x6ad   : > { %v1633_v33 = vpop.xlane.xlu0 %1632 }
 0x6ae   : > { %3780 = vrcp.f32 %v1633_v33  ;;  %v3762_v33 = vld [vmem:[%s4185_s10] sm:$0xff]  }
 0x6b1   : > { %v1638_v34 = vpop.permute.xlu0 %1637 }
 0x6b2   : > { %v1643_v35 = vsel %vm1326_vm4, %v1638_v34, 0  ;;  %v3763_v34 = vld [vmem:[%s4185_s10 + $0x8] sm:$0xff]   ;;  %s4781_s10 = sld [smem:[#allocation30_spill]] }
 0x6b3   : > { %3527 = vmatpush3.bf16.msra.mxu0 %v1643_v35 }
 0x6b4   : > { %3538 = vmatprep.subr.bf16.mxu0 %v3906_v2 }
 0x6b8   : > { %v3781_v14 = vpop.eup %3780  ;;  %s4782_s7 = scalar_lea.vmem %s4781_s10, %s4135_s27  ;;  %s4785_s10 = sld [smem:[#allocation24_spill]] }
 0x6b9   : > { %v1635_v36 = vmul.f32 %v3781_v14, %v3779_v31  ;;  %v3761_v31 = vld [vmem:[%s4194_s25 + $0x8] sm:$0xff]   ;;  %s4783_s25 = scalar_lea.vmem %s4673_s13, %s4135_s27 }
 0x6bb   : > { %v1636_v38 = vpack.c.bf16 %v1635_v36, %v1635_v36 }
 0x6bd   : > { %3529 = vmatmul.mubr.msk.bf16.vlgmr.msra.gmra.mrb[12].mxu0 %vm1262_vm3, %v1636_v38  ;;  %v3355_v38 = vld [vmem:[%s4780_s5] ss:$0 sm:$0xff]  ;;  %s4784_s5 = scalar_lea.vmem %s4671_s11, %s4135_s27 }
 0x6be   : > { %3539 = vmatpush3.bf16.xpose.msra.mxu0 %v1741_v39  ;;  %3540 = vmatprep.mubr.msk.bf16.mxu0 %vm3907_vm1, %v3906_v2 }
 0x6bf   : > { %3550 = vmatprep.subr.bf16.mxu0 %v3906_v2 }
 0x6c5   : > { %3541 = vmatmul.mubr.msk.bf16.vlgmr.msra.gmra.mrb[16].mxu0 %vm1262_vm3, %v1734_v40  ;;  %v3356_v40 = vld [vmem:[%s4782_s7] ss:$0 sm:$0xff]  ;;  %s4786_s7 = scalar_lea.vmem %s4785_s10, %s4772_s3 }
 0x6c6   : > { %3552 = vmatprep.mubr.msk.bf16.mxu0 %vm3907_vm1, %v3906_v2  ;;  %3551 = vmatpush3.bf16.msra.mxu0 %v1848_v7 }
 0x6c7   : > { %3564 = vmatprep.subr.bf16.mxu0 %v3906_v2 }
 0x790   : > { %v1679_v43 = vpop.f32.mrb[12].mxu0 }
 0x791   : > { %v1685_v44 = vpack.c.bf16 %v1679_v43, %v1679_v43  ;;  %v3530_v45 = vpop.f32.mrb[13].mxu0 }
 0x792   : > { %v1682_v46 = vpop.f32.mrb[14].mxu0 }
 0x793   : > { %v3531_v47 = vpop.f32.mrb[15].mxu0  ;;  %3535 = vmatmul.mubr.msk.bf16.vlgmr.msra.gmra.mrb[20].mxu1 %vm1262_vm3, %v1685_v44  ;;  %v3361_v44 = vld [vmem:[%s4783_s25] ss:$0 sm:$0xff] }
 0x794   : > { %3546 = vmatprep.mubr.msk.bf16.mxu1 %vm3907_vm1, %v3906_v2 }
 0x798   : > { %v1777_v48 = vpop.f32.mrb[16].mxu0 }
 0x799   : > { %v1778_v49 = vadd.f32 %v1777_v48, %v4294_v20  ;;  %v3542_v50 = vpop.f32.mrb[17].mxu0 }
 0x79a   : > { %v1780_v51 = vpop.f32.mrb[18].mxu0 }
 0x79b   : > { %v3543_v52 = vpop.f32.mrb[19].mxu0  ;;  %v1783_v53 = vsel %vm1262_vm3, %v1778_v49, -inf }
 0x79c   : > { %1784 = vmax.xlane.f32.xlu0 %v1783_v53  ;;  %v3357_v52 = vld [vmem:[%s4784_s5] ss:$0 sm:$0xff] }
 0x7b2   : > { %1795 = vrot.lane.b32.xlu0 %v4268_v12, %s3918_s8  ;;  %s4778_s8 = scalar_lea.vmem %s4777_s21, %s4772_s3  ;;  %s4791_s21 = sld [smem:[#allocation36_spill]] }
 0x829   : > { %v1785_v54 = vpop.xlane.xlu0 %1784 }
 0x82a   : > { %v1786_v55 = vsub.f32 %v1778_v49, %v1785_v54 }
 0x82c   : > { %v1787_v56 = vmul.f32 1.442695, %v1786_v55 }
 0x82d   : > { %v1796_v57 = vpop.permute.xlu0 %1795 }
 0x82e   : > { %3782 = vpow2.f32 %v1787_v56  ;;  %v1801_v58 = vsel %vm1326_vm4, %v1796_v57, 0 }
 0x82f   : > { %3545 = vmatpush3.bf16.msra.mxu1 %v1801_v58 }
 0x830   : > { %3556 = vmatprep.subr.bf16.mxu1 %v3906_v2 }
 0x838   : > { %v3783_v20 = vpop.eup %3782 }
 0x839   : > { %v1789_v59 = vsel %vm1262_vm3, %v3783_v20, 0.0 }
 0x83a   : > { %1790 = vadd.xlane.f32.xlu1 %v1789_v59 }
 0x866   : > { %v1726_v60 = vpop.f32.mrb[20].mxu1 }
 0x867   : > { %v1732_v61 = vadd.f32 %v1726_v60, %v4335_v17  ;;  %v3536_v62 = vpop.f32.mrb[21].mxu1 }
 0x868   : > { %v1729_v12 = vpop.f32.mrb[22].mxu1  ;;  %v4453_v62 = vld [vmem:[%s4786_s7] sm:$0xff] }
 0x869   : > { %v3537_v63 = vpop.f32.mrb[23].mxu1 }
 0x8c7   : > { %v1791_v0 = vpop.xlane.xlu1 %1790 }
 0x8c8   : > { %3784 = vrcp.f32 %v1791_v0 }
 0x8d2   : > { %v3785_v1 = vpop.eup %3784 }
 0x8d3   : > { %v1793_v3 = vmul.f32 %v3785_v1, %v3783_v20 }
 0x8d5   : > { %v1794_v5 = vpack.c.bf16 %v1793_v3, %v1793_v3 }
 0x8d7   : > { %3547 = vmatmul.mubr.msk.bf16.vlgmr.msra.gmra.mrb[24].mxu1 %vm1262_vm3, %v1794_v5 }
 0x8d8   : > { %3560 = vmatprep.mubr.msk.bf16.mxu1 %vm3907_vm1, %v3906_v2  ;;  %3557 = vmatpush3.bf16.msra.mxu1 %v3762_v33 }
 0x8d9   : > { %3558 = vmatprep.subr.bf16.mxu1 %v3906_v2 }
 0x8dc   : > { %3559 = vmatpush3.bf16.msra.mxu1 %v3763_v34 }
 0x8dd   : > { %3572 = vmatprep.subr.bf16.mxu1 %v3906_v2 }
 0x9aa   : > { %v1837_v8 = vpop.f32.mrb[24].mxu1 }
 0x9ab   : > { %v1843_v9 = vpack.c.bf16 %v1837_v8, %v1837_v8  ;;  %v3548_v10 = vpop.f32.mrb[25].mxu1 }
 0x9ac   : > { %v1840_v11 = vpop.f32.mrb[26].mxu1 }
 0x9ad   : > { %v3549_v13 = vpop.f32.mrb[27].mxu1  ;;  %3553 = vmatmul.mubr.msk.bf16.vlgmr.msra.gmra.mrb[20].mxu0 %vm1262_vm3, %v1843_v9 }
 0x9ae   : > { %3568 = vmatprep.mubr.msk.bf16.mxu0 %vm3907_vm1, %v3906_v2  ;;  %3565 = vmatpush3.bf16.msra.mxu0 %v3760_v30 }
 0x9af   : > { %3566 = vmatprep.subr.bf16.mxu0 %v3906_v2 }
 0x9b2   : > { %3567 = vmatpush3.bf16.msra.mxu0 %v3761_v31 }
 0x9b3   : > { %3578 = vmatprep.subr.bf16.mxu0 %v3906_v2 }
 0xa80   : > { %v1884_v16 = vpop.f32.mrb[20].mxu0 }
 0xa81   : > { %v1890_v17 = vadd.f32 %v1884_v16, %v1732_v61  ;;  %v3554_v18 = vpop.f32.mrb[21].mxu0 }
 0xa82   : > { %v1887_v19 = vpop.f32.mrb[22].mxu0 }
 0xa83   : > { %v1897_v21 = vadd.f32 %v3354_v15, %v1890_v17  ;;  %v3555_v22 = vpop.f32.mrb[23].mxu0 }
 0xa85   : > { %v1898_v23 = vadd.f32 %v1897_v21, %v4252_v4  ;;  %v1181_v4 = vld [vmem:[%s4778_s8] sm:$0xff]  ;;  %s4792_s8 = scalar_lea.vmem %s4791_s21, %s4135_s27 }
 0xa86   : > { %v1996_v32 = vpack.c.bf16 %v1181_v4, %v1181_v4 }
 0xa87   : > { %v1901_v24 = vsel %vm1206_vm2, %v1898_v23, 0.0 }
 0xa88   : > { %1902 = vadd.xlane.f32.xlu1 %v1901_v24  ;;  %3569 = vmatmul.mubr.msk.bf16.vlgmr.msra.gmra.mrb[24].mxu0 %vm1206_vm2, %v1996_v32 }
 0xa89   : > { %3580 = vmatprep.mubr.msk.bf16.mxu0 %vm3907_vm1, %v3906_v2 }
 0xb15   : > { %v1903_v25 = vpop.xlane.xlu1 %1902 }
 0xb16   : > { %v1905_v26 = vmul.f32 0.03125, %v1903_v25 }
 0xb18   : > { %v1906_v27 = vsub.f32 %v1898_v23, %v1905_v26 }
 0xb1a   : > { %v1907_v28 = vmul.f32 %v1906_v27, %v1906_v27 }
 0xb1c   : > { %v1908_v29 = vsel %vm1206_vm2, %v1907_v28, 0.0 }
 0xb1d   : > { %1909 = vadd.xlane.f32.xlu1 %v1908_v29 }
 0xb5b   : > { %v2057_v45 = vpop.f32.mrb[24].mxu0 }
 0xb5c   : > { %v2058_v46 = vadd.f32 %v3361_v44, %v2057_v45  ;;  %v3570_v47 = vpop.f32.mrb[25].mxu0 }
 0xb5d   : > { %v2060_v48 = vpop.f32.mrb[26].mxu0 }
 0xb5e   : > { %v4423_v49 = vpack.c.bf16 %v2058_v46, %v2058_v46  ;;  %v3571_v50 = vpop.f32.mrb[27].mxu0 }
 0xb60   : > { %2183 = vrot.lane.b32.xlu1 %v4423_v49, %s3909_s6  ;;  %v2076_v51 = vsel %vm1262_vm3, %v4423_v49, 0 }
 0xbaa   : > { %v1910_v35 = vpop.xlane.xlu1 %1909 }
 0xbab   : > { %v1911_v14 = vmul.f32 0.03125, %v1910_v35 }
 0xbad   : > { %v1912_v36 = vadd.f32 1e-12, %v1911_v14  ;;  %v2064_v14 = vld [vmem:[%s4203_s1] sm:$0xf] }
 0xbaf   : > { %3786 = vrsqrt.f32 %v1912_v36  ;;  %v2342_v36 = vsel %vm1326_vm4, %v2064_v14, 0 }
 0xbb9   : > { %v3787_v37 = vpop.eup %3786 }
 0xbba   : > { %v1914_v39 = vmul.f32 %v3787_v37, %v1906_v27  ;;  %v2065_v37 = vld [vmem:[%s4203_s1 + $0x4] sm:$0xf] }
 0xbbc   : > { %v1921_v41 = vmul.f32 %v3355_v38, %v1914_v39  ;;  %v2296_v38 = vsel %vm1326_vm4, %v2065_v37, 0 }
 0xbbe   : > { %v4411_v42 = vadd.f32 %v3356_v40, %v1921_v41 }
 0xbc0   : > { %v1929_v43 = vpack.c.bf16 %v4411_v42, %v4411_v42 }
 0xbc2   : > { %3561 = vmatmul.mubr.msk.bf16.vlgmr.msra.gmra.mrb[28].mxu1 %vm1206_vm2, %v1929_v43 }
 0xbc3   : > { %3574 = vmatprep.mubr.msk.bf16.mxu1 %vm3907_vm1, %v3906_v2  ;;  %3573 = vmatpush3.bf16.xpose.msra.mxu1 %v2076_v51 }
 0xbc4   : > { %3584 = vmatprep.subr.bf16.mxu1 %v3906_v2 }
 0xbd2   : > { %v2184_v57 = vpop.permute.xlu1 %2183 }
 0xbd3   : > { %v2189_v60 = vsel %vm1262_vm3, %v2184_v57, 0 }
 0xc95   : > { %v1990_v53 = vpop.f32.mrb[28].mxu1 }
 0xc96   : > { %v1991_v54 = vadd.f32 %v3357_v52, %v1990_v53  ;;  %v3562_v55 = vpop.f32.mrb[29].mxu1 }
 0xc97   : > { %v1993_v56 = vpop.f32.mrb[30].mxu1 }
 0xc98   : > { %v2069_v58 = vmul.f32 0.35355338, %v1991_v54  ;;  %v3563_v20 = vpop.f32.mrb[31].mxu1 }
 0xc9a   : > { %v4435_v59 = vpack.c.bf16 %v2069_v58, %v2069_v58 }
 0xc9c   : > { %2181 = vrot.lane.b32.xlu0 %v4435_v59, %s3909_s6  ;;  %3575 = vmatmul.mubr.msk.bf16.vlgmr.msra.gmra.mrb[32].mxu1 %vm1262_vm3, %v4435_v59 }
 0xc9d   : > { %3585 = vmatpush3.bf16.xpose.msra.mxu1 %v2189_v60  ;;  %3586 = vmatprep.mubr.msk.bf16.mxu1 %vm3907_vm1, %v3906_v2 }
 0xc9e   : > { %3596 = vmatprep.subr.bf16.mxu1 %v3906_v2 }
 0xd0e   : > { %v2182_v61 = vpop.permute.xlu0 %2181 }
 0xd0f   : > { %3587 = vmatmul.mubr.msk.bf16.vlgmr.msra.gmra.mrb[36].mxu1 %vm1262_vm3, %v2182_v61 }
 0xd10   : > { %3598 = vmatprep.mubr.msk.bf16.mxu1 %vm3907_vm1, %v3906_v2  ;;  %3597 = vmatpush3.bf16.msra.mxu1 %v2296_v38 }
 0xd11   : > { %3608 = vmatprep.subr.bf16.mxu1 %v3906_v2 }
 0xd6f   : > { %v2112_v12 = vpop.f32.mrb[32].mxu1 }
 0xd70   : > { %v2113_v63 = vadd.f32 %v2112_v12, %v4453_v62  ;;  %v3576_v0 = vpop.f32.mrb[33].mxu1 }
 0xd71   : > { %v2115_v1 = vpop.f32.mrb[34].mxu1 }
 0xd72   : > { %v3577_v3 = vpop.f32.mrb[35].mxu1  ;;  %v2118_v5 = vsel %vm1262_vm3, %v2113_v63, -inf }
 0xd73   : > { %2119 = vmax.xlane.f32.xlu0 %v2118_v5 }
 0xde2   : > { %v2225_v6 = vpop.f32.mrb[36].mxu1 }
 0xde3   : > { %v2226_v7 = vadd.f32 %v2225_v6, %v4453_v62  ;;  %v3588_v8 = vpop.f32.mrb[37].mxu1 }
 0xde4   : > { %v2228_v9 = vpop.f32.mrb[38].mxu1 }
 0xde5   : > { %v3589_v10 = vpop.f32.mrb[39].mxu1  ;;  %v2231_v11 = vsel %vm1262_vm3, %v2226_v7, -inf }
 0xde6   : > { %2232 = vmax.xlane.f32.xlu1 %v2231_v11 }
 0xdf7   : > { %2243 = vrot.lane.b32.xlu1 %v4423_v49, %s3910_s0  ;;  %s4787_s0 = sld [smem:[#allocation34_spill]] }
 0xdfb   : > { %2386 = vrot.lane.b32.xlu1 %v4423_v49, %s3913_s14 }
 0xdfd   : > { %s4788_s3 = scalar_lea.vmem %s4787_s0, %s4135_s27 }
 0xe00   : > { %v2120_v13 = vpop.xlane.xlu0 %2119 }
 0xe01   : > { %v2121_v15 = vsub.f32 %v2113_v63, %v2120_v13 }
 0xe03   : > { %v2122_v16 = vmul.f32 1.442695, %v2121_v15 }
 0xe05   : > { %3788 = vpow2.f32 %v2122_v16 }
 0xe0f   : > { %v3789_v17 = vpop.eup %3788 }
 0xe10   : > { %v2124_v18 = vsel %vm1262_vm3, %v3789_v17, 0.0 }
 0xe11   : > { %2125 = vadd.xlane.f32.xlu0 %v2124_v18 }
 0xe73   : > { %v2233_v19 = vpop.xlane.xlu1 %2232 }
 0xe74   : > { %v2234_v21 = vsub.f32 %v2226_v7, %v2233_v19 }
 0xe76   : > { %v2235_v22 = vmul.f32 1.442695, %v2234_v21 }
 0xe77   : > { %v2244_v31 = vpop.permute.xlu1 %2243 }
 0xe78   : > { %3790 = vpow2.f32 %v2235_v22  ;;  %v2249_v32 = vsel %vm1326_vm4, %v2244_v31, 0 }
 0xe7b   : > { %v2387_v45 = vpop.permute.xlu1 %2386 }
 0xe7c   : > { %v2392_v51 = vsel %vm1262_vm3, %v2387_v45, 0 }
 0xe82   : > { %v3791_v23 = vpop.eup %3790 }
 0xe83   : > { %v2237_v24 = vsel %vm1262_vm3, %v3791_v23, 0.0 }
 0xe84   : > { %2238 = vadd.xlane.f32.xlu0 %v2237_v24 }
 0xe9a   : > { %2131 = vrot.lane.b32.xlu0 %v4423_v49, %s3908_s2  ;;  %s4796_s2 = sld [smem:[#allocation9_spill]] }
 0xe9e   : > { %2384 = vrot.lane.b32.xlu0 %v4435_v59, %s3913_s14  ;;  %v2126_v25 = vpop.xlane.xlu0 %2125  ;;  %s4789_s14 = sld [smem:[#allocation35_spill]] }
 0xe9f   : > { %3792 = vrcp.f32 %v2126_v25 }
 0xea0   : > { %p3392_p1 = scmp.ne.s32.totalorder %s4796_s2, 1 }
 0xea1   : > { %vm3920_vm6 = vmmov (!%p3392_p1), 0  }
 0xea9   : > { %v3793_v26 = vpop.eup %3792 }
 0xeaa   : > { %v2128_v28 = vmul.f32 %v3793_v26, %v3789_v17 }
 0xeac   : > { %v2129_v4 = vpack.c.bf16 %v2128_v28, %v2128_v28 }
 0xf11   : > { %v2239_v27 = vpop.xlane.xlu0 %2238 }
 0xf12   : > { %3794 = vrcp.f32 %v2239_v27 }
 0xf15   : > { %v2132_v29 = vpop.permute.xlu0 %2131 }
 0xf16   : > { %v2137_v30 = vsel %vm1326_vm4, %v2132_v29, 0 }
 0xf17   : > { %3579 = vmatpush3.bf16.msra.mxu0 %v2137_v30 }
 0xf18   : > { %3590 = vmatprep.subr.bf16.mxu0 %v3906_v2 }
 0xf19   : > { %v2385_v53 = vpop.permute.xlu0 %2384 }
 0xf1a   : > { %3581 = vmatmul.mubr.msk.bf16.vlgmr.msra.gmra.mrb[28].mxu0 %vm1262_vm3, %v2129_v4 }
 0xf1b   : > { %3591 = vmatpush3.bf16.msra.mxu0 %v2249_v32  ;;  %3592 = vmatprep.mubr.msk.bf16.mxu0 %vm3907_vm1, %v3906_v2 }
 0xf1c   : > { %v3795_v33 = vpop.eup %3794  ;;  %3602 = vmatprep.subr.bf16.mxu0 %v3906_v2 }
 0xf1d   : > { %v2241_v34 = vmul.f32 %v3795_v33, %v3791_v23  ;;  %v2066_v23 = vld [vmem:[%s4203_s1 + $0x8] sm:$0xf] }
 0xf1e   : > { %v2499_v24 = vsel %vm1326_vm4, %v2066_v23, 0 }
 0xf1f   : > { %v2242_v35 = vpack.c.bf16 %v2241_v34, %v2241_v34 }
 0xf22   : > { %3593 = vmatmul.mubr.msk.bf16.vlgmr.msra.gmra.mrb[32].mxu0 %vm1262_vm3, %v2242_v35 }
 0xf23   : > { %3604 = vmatprep.mubr.msk.bf16.mxu0 %vm3907_vm1, %v3906_v2  ;;  %3603 = vmatpush3.bf16.msra.mxu0 %v2342_v36 }
 0xf24   : > { %3614 = vmatprep.subr.bf16.mxu0 %v3906_v2 }
 0xfed   : > { %v2173_v39 = vpop.f32.mrb[28].mxu0 }
 0xfee   : > { %v2179_v40 = vpack.c.bf16 %v2173_v39, %v2173_v39  ;;  %v3582_v41 = vpop.f32.mrb[29].mxu0 }
 0xfef   : > { %v2176_v43 = vpop.f32.mrb[30].mxu0 }
 0xff0   : > { %v3583_v44 = vpop.f32.mrb[31].mxu0  ;;  %3605 = vmatmul.mubr.msk.bf16.vlgmr.msra.gmra.mrb[36].mxu0 %vm1262_vm3, %v2179_v40 }
 0xff1   : > { %3616 = vmatprep.mubr.msk.bf16.mxu0 %vm3907_vm1, %v3906_v2 }
 0xff5   : > { %v2285_v46 = vpop.f32.mrb[32].mxu0 }
 0xff6   : > { %v2291_v47 = vpack.c.bf16 %v2285_v46, %v2285_v46  ;;  %v3594_v48 = vpop.f32.mrb[33].mxu0 }
 0xff7   : > { %v2288_v50 = vpop.f32.mrb[34].mxu0 }
 0xff8   : > { %v3595_v52 = vpop.f32.mrb[35].mxu0  ;;  %3599 = vmatmul.mubr.msk.bf16.vlgmr.msra.gmra.mrb[40].mxu1 %vm1262_vm3, %v2291_v47  ;;  %v2067_v50 = vld [vmem:[%s4203_s1 + $0xc] sm:$0xf] }
 0xff9   : > { %3609 = vmatpush3.bf16.xpose.msra.mxu1 %v2392_v51  ;;  %3610 = vmatprep.mubr.msk.bf16.mxu1 %vm3907_vm1, %v3906_v2  ;;  %v2657_v51 = vsel %vm1326_vm4, %v2067_v50, 0  ;;  %v3391_v50 = vld [vmem:[%s1171_s16] ss:$0 sm:$0xff] }
 0xffa   : > { %3620 = vmatprep.subr.bf16.mxu1 %v3906_v2 }
0x1000   : > { %3611 = vmatmul.mubr.msk.bf16.vlgmr.msra.gmra.mrb[44].mxu1 %vm1262_vm3, %v2385_v53 }
0x1001   : > { %3622 = vmatprep.mubr.msk.bf16.mxu1 %vm3907_vm1, %v3906_v2  ;;  %3621 = vmatpush3.bf16.msra.mxu1 %v2499_v24  ;;  %v3768_v24 = vld [vmem:[%s4230_s15 + $0x10] sm:$0xff]  }
0x1002   : > { %3632 = vmatprep.subr.bf16.mxu1 %v3906_v2 }
0x10c3   : > { %v2378_v54 = vpop.f32.mrb[36].mxu0 }
0x10c4   : > { %v3606_v55 = vpop.f32.mrb[37].mxu0 }
0x10c5   : > { %v2381_v56 = vpop.f32.mrb[38].mxu0 }
0x10c6   : > { %v3607_v57 = vpop.f32.mrb[39].mxu0 }
0x10c7   : > { %v3377_v57 = vld [vmem:[%s4788_s3] ss:$0 sm:$0xff]  ;;  %s4797_s3 = sld [smem:[#allocation42_spill]] (!%p3392_p1) }
0x10cb   : > { %v2332_v58 = vpop.f32.mrb[40].mxu1 }
0x10cc   : > { %v4496_v20 = vadd.f32 %v2378_v54, %v2332_v58  ;;  %v3600_v60 = vpop.f32.mrb[41].mxu1 }
0x10cd   : > { %v2335_v61 = vpop.f32.mrb[42].mxu1  ;;  %s4798_s1 = smov (!%p3392_p1), %s4797_s3 }
0x10ce   : > { %v3601_v12 = vpop.f32.mrb[43].mxu1 }
0x10d3   : > { %v2428_v63 = vpop.f32.mrb[44].mxu1 }
0x10d4   : > { %v2429_v0 = vadd.f32 %v2428_v63, %v4453_v62  ;;  %v3612_v1 = vpop.f32.mrb[45].mxu1 }
0x10d5   : > { %v2431_v3 = vpop.f32.mrb[46].mxu1 }
0x10d6   : > { %v3613_v5 = vpop.f32.mrb[47].mxu1  ;;  %v2434_v6 = vsel %vm1262_vm3, %v2429_v0, -inf }
0x10d7   : > { %2435 = vmax.xlane.f32.xlu1 %v2434_v6 }
0x10e8   : > { %2544 = vrot.lane.b32.xlu1 %v4423_v49, %s3916_s30 }
0x10ec   : > { %2542 = vrot.lane.b32.xlu1 %v4435_v59, %s3916_s30 }
0x1164   : > { %v2436_v7 = vpop.xlane.xlu1 %2435 }
0x1165   : > { %v2437_v8 = vsub.f32 %v2429_v0, %v2436_v7 }
0x1167   : > { %v2438_v9 = vmul.f32 1.442695, %v2437_v8 }
0x1168   : > { %v2545_v18 = vpop.permute.xlu1 %2544 }
0x1169   : > { %3796 = vpow2.f32 %v2438_v9  ;;  %v2550_v21 = vsel %vm1262_vm3, %v2545_v18, 0  ;;  %v3764_v9 = vld [vmem:[%s4220_s9] sm:$0xff]  }
0x116c   : > { %v2543_v22 = vpop.permute.xlu1 %2542 }
0x1173   : > { %v3797_v10 = vpop.eup %3796 }
0x1174   : > { %v2440_v11 = vsel %vm1262_vm3, %v3797_v10, 0.0 }
0x1175   : > { %2441 = vadd.xlane.f32.xlu0 %v2440_v11  ;;  %v3767_v11 = vld [vmem:[%s4230_s15 + $0x8] sm:$0xff]  }
0x118b   : > { %2446 = vrot.lane.b32.xlu0 %v4423_v49, %s3914_s17  ;;  %s4790_s17 = scalar_lea.vmem %s4789_s14, %s4135_s27  ;;  %s4799_s14 = sld [smem:[#allocation43_spill]] (!%p3392_p1) }
0x1202   : > { %v2442_v13 = vpop.xlane.xlu0 %2441 }
0x1203   : > { %3798 = vrcp.f32 %v2442_v13 }
0x1206   : > { %v2447_v15 = vpop.permute.xlu0 %2446 }
0x1207   : > { %v2452_v16 = vsel %vm1326_vm4, %v2447_v15, 0 }
0x1208   : > { %3615 = vmatpush3.bf16.msra.mxu0 %v2452_v16 }
0x1209   : > { %3626 = vmatprep.subr.bf16.mxu0 %v3906_v2 }
0x120d   : > { %v3799_v59 = vpop.eup %3798 }
0x120e   : > { %v2444_v17 = vmul.f32 %v3799_v59, %v3797_v10  ;;  %v3765_v10 = vld [vmem:[%s4220_s9 + $0x8] sm:$0xff]  }
0x1210   : > { %v2445_v19 = vpack.c.bf16 %v2444_v17, %v2444_v17  ;;  %v3378_v17 = vld [vmem:[%s4790_s17] ss:$0 sm:$0xff] }
0x1212   : > { %3617 = vmatmul.mubr.msk.bf16.vlgmr.msra.gmra.mrb[40].mxu0 %vm1262_vm3, %v2445_v19  ;;  %v3379_v19 = vld [vmem:[%s4792_s8] ss:$0 sm:$0xff] }
0x1213   : > { %3627 = vmatpush3.bf16.xpose.msra.mxu0 %v2550_v21  ;;  %3628 = vmatprep.mubr.msk.bf16.mxu0 %vm3907_vm1, %v3906_v2 }
0x1214   : > { %3638 = vmatprep.subr.bf16.mxu0 %v3906_v2 }
0x121a   : > { %3629 = vmatmul.mubr.msk.bf16.vlgmr.msra.gmra.mrb[44].mxu0 %vm1262_vm3, %v2543_v22 }
0x121b   : > { %3640 = vmatprep.mubr.msk.bf16.mxu0 %vm3907_vm1, %v3906_v2  ;;  %3639 = vmatpush3.bf16.msra.mxu0 %v2657_v51 }
0x121c   : > { %3652 = vmatprep.subr.bf16.mxu0 %v3906_v2 }
0x12e5   : > { %v2488_v25 = vpop.f32.mrb[40].mxu0 }
0x12e6   : > { %v2494_v26 = vpack.c.bf16 %v2488_v25, %v2488_v25  ;;  %v3618_v27 = vpop.f32.mrb[41].mxu0  ;;  %v3769_v25 = vld [vmem:[%s4230_s15 + $0x18] sm:$0xff]  }
0x12e7   : > { %v2491_v28 = vpop.f32.mrb[42].mxu0 }
0x12e8   : > { %v3619_v29 = vpop.f32.mrb[43].mxu0  ;;  %3623 = vmatmul.mubr.msk.bf16.vlgmr.msra.gmra.mrb[48].mxu1 %vm1262_vm3, %v2494_v26  ;;  %v3380_v26 = vld [vmem:[%s1157_s29] ss:$0 sm:$0xff] }
0x12e9   : > { %3634 = vmatprep.mubr.msk.bf16.mxu1 %vm3907_vm1, %v3906_v2 }
0x12ed   : > { %v2586_v30 = vpop.f32.mrb[44].mxu0 }
0x12ee   : > { %v2587_v31 = vadd.f32 %v2586_v30, %v4453_v62  ;;  %v3630_v4 = vpop.f32.mrb[45].mxu0 }
0x12ef   : > { %v2589_v32 = vpop.f32.mrb[46].mxu0 }
0x12f0   : > { %v3631_v33 = vpop.f32.mrb[47].mxu0  ;;  %v2592_v34 = vsel %vm1262_vm3, %v2587_v31, -inf }
0x12f1   : > { %2593 = vmax.xlane.f32.xlu0 %v2592_v34 }
0x1307   : > { %2604 = vrot.lane.b32.xlu0 %v4423_v49, %s3915_s18 }
0x137e   : > { %v2594_v35 = vpop.xlane.xlu0 %2593 }
0x137f   : > { %v2595_v14 = vsub.f32 %v2587_v31, %v2594_v35 }
0x1381   : > { %v2596_v36 = vmul.f32 1.442695, %v2595_v14 }
0x1382   : > { %v2605_v37 = vpop.permute.xlu0 %2604 }
0x1383   : > { %3800 = vpow2.f32 %v2596_v36  ;;  %v2610_v38 = vsel %vm1326_vm4, %v2605_v37, 0 }
0x1384   : > { %3633 = vmatpush3.bf16.msra.mxu1 %v2610_v38 }
0x1385   : > { %3644 = vmatprep.subr.bf16.mxu1 %v3906_v2 }
0x138d   : > { %v3801_v62 = vpop.eup %3800 }
0x138e   : > { %v2598_v39 = vsel %vm1262_vm3, %v3801_v62, 0.0 }
0x138f   : > { %2599 = vadd.xlane.f32.xlu1 %v2598_v39 }
0x13bb   : > { %v2535_v40 = vpop.f32.mrb[48].mxu1 }
0x13bc   : > { %v2541_v41 = vadd.f32 %v2535_v40, %v4496_v20  ;;  %v3624_v43 = vpop.f32.mrb[49].mxu1 }
0x13bd   : > { %v2538_v49 = vpop.f32.mrb[50].mxu1 }
0x13be   : > { %v3625_v44 = vpop.f32.mrb[51].mxu1 }
0x141c   : > { %v2600_v45 = vpop.xlane.xlu1 %2599 }
0x141d   : > { %3802 = vrcp.f32 %v2600_v45 }
0x1427   : > { %v3803_v46 = vpop.eup %3802 }
0x1428   : > { %v2602_v47 = vmul.f32 %v3803_v46, %v3801_v62 }
0x142a   : > { %v2603_v48 = vpack.c.bf16 %v2602_v47, %v2602_v47  ;;  %v3390_v47 = vld [vmem:[%s1168_s12] ss:$0 sm:$0xff] }
0x142c   : > { %3635 = vmatmul.mubr.msk.bf16.vlgmr.msra.gmra.mrb[52].mxu1 %vm1262_vm3, %v2603_v48 }
0x142d   : > { %3648 = vmatprep.mubr.msk.bf16.mxu1 %vm3907_vm1, %v3906_v2  ;;  %3645 = vmatpush3.bf16.msra.mxu1 %v3764_v9 }
0x142e   : > { %3646 = vmatprep.subr.bf16.mxu1 %v3906_v2 }
0x1431   : > { %3647 = vmatpush3.bf16.msra.mxu1 %v3765_v10 }
0x14ff   : > { %v2646_v52 = vpop.f32.mrb[52].mxu1 }
0x1500   : > { %v2652_v53 = vpack.c.bf16 %v2646_v52, %v2646_v52  ;;  %v3636_v54 = vpop.f32.mrb[53].mxu1 }
0x1501   : > { %v2649_v55 = vpop.f32.mrb[54].mxu1  ;;  %v3919_v54 = vmov (!%p3392_p1), 0.0  }
0x1502   : > { %v3637_v56 = vpop.f32.mrb[55].mxu1  ;;  %3641 = vmatmul.mubr.msk.bf16.vlgmr.msra.gmra.mrb[48].mxu0 %vm1262_vm3, %v2652_v53  ;;  %v3808_v53 = vld [vmem:[%s4797_s3] sm:$0xff] (!%p3392_p1)   ;;  %v3809_v55 = vld [vmem:[%s4798_s1 + $0x8] sm:$0xff] (!%p3392_p1)  }
0x1503   : > { %3660 = vmatprep.mubr.msk.bf16.mxu0 %vm3907_vm1, %v3906_v2 }
0x15d5   : > { %v2693_v58 = vpop.f32.mrb[48].mxu0 }
0x15d6   : > { %v2699_v20 = vadd.f32 %v2693_v58, %v2541_v41  ;;  %v3642_v60 = vpop.f32.mrb[49].mxu0 }
0x15d7   : > { %v2696_v61 = vpop.f32.mrb[50].mxu0 }
0x15d8   : > { %v2706_v12 = vadd.f32 %v3377_v57, %v2699_v20  ;;  %v3643_v63 = vpop.f32.mrb[51].mxu0  ;;  %v3393_v57 = vld [vmem:[%s4799_s14] ss:$0 sm:$0xff] (!%p3392_p1) }
0x15da   : > { %v2707_v0 = vadd.f32 %v2706_v12, %v4411_v42  ;;  %v3766_v42 = vld [vmem:[%s4230_s15] sm:$0xff]  }
0x15db   : > { %3653 = vmatpush3.bf16.msra.mxu0 %v3766_v42 }
0x15dc   : > { %v2710_v1 = vsel %vm1206_vm2, %v2707_v0, 0.0  ;;  %3654 = vmatprep.subr.bf16.mxu0 %v3906_v2 }
0x15dd   : > { %2711 = vadd.xlane.f32.xlu1 %v2710_v1 }
0x15df   : > { %3655 = vmatpush3.bf16.msra.mxu0 %v3767_v11 }
0x15e0   : > { %3656 = vmatprep.subr.bf16.mxu0 %v3906_v2 }
0x15e3   : > { %3657 = vmatpush3.bf16.msra.mxu0 %v3768_v24 }
0x15e4   : > { %3658 = vmatprep.subr.bf16.mxu0 %v3906_v2  ;;  %v3384_v2 = vld [vmem:[%s1165_s23] ss:$0 sm:$0xff] }
0x15e7   : > { %3659 = vmatpush3.bf16.msra.mxu0 %v3769_v25 }
0x15e8   : > { %3664 = vmatprep.subr.bf16.mxu0 (!%p3392_p1), %v3919_v54 }
0x166a   : > { %v2712_v3 = vpop.xlane.xlu1 %2711 }
0x166b   : > { %v2713_v5 = vmul.f32 0.03125, %v2712_v3 }
0x166d   : > { %v2714_v6 = vsub.f32 %v2707_v0, %v2713_v5 }
0x166f   : > { %v2715_v7 = vmul.f32 %v2714_v6, %v2714_v6 }
0x1671   : > { %v2716_v8 = vsel %vm1206_vm2, %v2715_v7, 0.0 }
0x1672   : > { %2717 = vadd.xlane.f32.xlu1 %v2716_v8 }
0x16ff   : > { %v2718_v13 = vpop.xlane.xlu1 %2717 }
0x1700   : > { %v2719_v15 = vmul.f32 0.03125, %v2718_v13 }
0x1702   : > { %v2720_v16 = vadd.f32 1e-12, %v2719_v15 }
0x1704   : > { %3804 = vrsqrt.f32 %v2720_v16 }
0x170e   : > { %v3805_v59 = vpop.eup %3804 }
0x170f   : > { %v2722_v18 = vmul.f32 %v3805_v59, %v2714_v6 }
0x1711   : > { %v2729_v21 = vmul.f32 %v3378_v17, %v2722_v18 }
0x1713   : > { %v2736_v22 = vadd.f32 %v3379_v19, %v2729_v21 }
0x1715   : > { %v2737_v23 = vpack.c.bf16 %v2736_v22, %v2736_v22 }
0x1717   : > { %3649 = vmatmul.mubr.msk.bf16.vlgmr.msra.gmra.mrb[56].mxu1 %vm1206_vm2, %v2737_v23 }
0x17ea   : > { %v2798_v27 = vpop.f32.mrb[56].mxu1 }
0x17eb   : > { %v2799_v28 = vadd.f32 %v3380_v26, %v2798_v27  ;;  %v3650_v29 = vpop.f32.mrb[57].mxu1 }
0x17ec   : > { %v2801_v30 = vpop.f32.mrb[58].mxu1 }
0x17ed   : > { %v2804_v31 = vmax.f32 %v2799_v28, 0.0  ;;  %v3651_v4 = vpop.f32.mrb[59].mxu1 }
0x17ef   : > { %v2805_v32 = vpack.c.bf16 %v2804_v31, %v2804_v31 }
0x17f1   : > { %3661 = vmatmul.mubr.msk.bf16.vlgmr.msra.gmra.mrb[52].mxu0 %vm2845_vm5, %v2805_v32 }
0x17f2   : > { %3665 = vmatpush3.bf16.msra.mxu0 (!%p3392_p1), %v3808_v53  ;;  %3668 = vmatprep.mubr.msk.bf16.mxu0 (!%p3392_p1), %vm3920_vm6, %v3919_v54 }
0x17f3   : > { %3666 = vmatprep.subr.bf16.mxu0 (!%p3392_p1), %v3919_v54 }
0x17f6   : > { %3667 = vmatpush3.bf16.msra.mxu0 (!%p3392_p1), %v3809_v55 }
0x18c4   : > { %v2883_v33 = vpop.f32.mrb[52].mxu0 }
0x18c5   : > { %v2884_v34 = vadd.f32 %v3384_v2, %v2883_v33  ;;  %v3662_v35 = vpop.f32.mrb[53].mxu0 }
0x18c6   : > { %v2886_v14 = vpop.f32.mrb[54].mxu0 }
0x18c7   : > { %v3663_v36 = vpop.f32.mrb[55].mxu0  ;;  %v2889_v37 = vadd.f32 %v2884_v34, %v2736_v22 }
0x18c9   : > { %v2892_v38 = vsel %vm1206_vm2, %v2889_v37, 0.0 }
0x18ca   : > { %2893 = vadd.xlane.f32.xlu1 %v2892_v38 }
0x1957   : > { %v2894_v62 = vpop.xlane.xlu1 %2893 }
0x1958   : > { %v2895_v39 = vmul.f32 0.03125, %v2894_v62 }
0x195a   : > { %v2896_v40 = vsub.f32 %v2889_v37, %v2895_v39 }
0x195c   : > { %v2897_v41 = vmul.f32 %v2896_v40, %v2896_v40 }
0x195e   : > { %v2898_v43 = vsel %vm1206_vm2, %v2897_v41, 0.0 }
0x195f   : > { %2899 = vadd.xlane.f32.xlu1 %v2898_v43 }
0x19ec   : > { %v2900_v49 = vpop.xlane.xlu1 %2899 }
0x19ed   : > { %v2901_v44 = vmul.f32 0.03125, %v2900_v49 }
0x19ef   : > { %v2902_v45 = vadd.f32 1e-12, %v2901_v44 }
0x19f1   : > { %3806 = vrsqrt.f32 %v2902_v45 }
0x19fb   : > { %v3807_v46 = vpop.eup %3806 }
0x19fc   : > { %v2904_v48 = vmul.f32 %v3807_v46, %v2896_v40  ;;  %2923 = sbr.rel (%p3392_p1) target bundleno = 6875 (0x1adb), region = 132 }
0x19fe   : > { %v2911_v51 = vmul.f32 %v3390_v47, %v2904_v48 }
0x1a00   : > { %v2918_v52 = vadd.f32 %v3391_v50, %v2911_v51 }
0x1a02   : > { %2919 = vst.msk [vmem:[#allocation2] sm:$0xff] %vm1206_vm2, %v2918_v52  ;;  %v2924_v56 = vpack.c.bf16 (!%p3392_p1), %v2918_v52, %v2918_v52 }
0x1a04   : > { %3669 = vmatmul.mubr.msk.bf16.vlgmr.msra.gmra.mrb[0].mxu0 %vm1206_vm2, %v2924_v56 }
0x1ad7   : > { %v2985_v58 = vpop.f32.mrb[0].mxu0 }
0x1ad8   : > { %v2986_v20 = vadd.f32 %v3393_v57, %v2985_v58  ;;  %v3670_v60 = vpop.f32.mrb[1].mxu0 }
0x1ad9   : > { %v2988_v61 = vpop.f32.mrb[2].mxu0 }
0x1ada   : > { %2991 = vst [vmem:[%s1081_s20] sm:$0xff] %v2986_v20  ;;  %v3671_v12 = vpop.f32.mrb[3].mxu0 }
0x1adb PF: > { %s4800_s17 = sld [smem:[#allocation10_spill]]  ;;  %s4801_s18 = sld [smem:[#allocation7_spill]] }
0x1adc   : > { %s4803_s24 = sld [smem:[#allocation44_spill]]  ;;  %s3006_s5 = sshll.u32 %s1081_s20, 4  ;;  %s3007_s5 = int_to_ptr.vmem [resolvable:$true] %s3006_s5 }
0x1add   : > { %s3810_s29 = scalar_lea.vmem %s3007_s5, 128  ;;  %s3921_s23 = smov [#allocation3]  }
0x1ade   : > { %p3811_p2 = scmp.ne.s32.totalorder %s3007_s5, %s3810_s29  ;;  %s3814_s26 = sshll.u32 %s3921_s23, 4  ;;  %s3815_s26 = int_to_ptr.vmem [resolvable:$false] %s3814_s26 }
0x1adf   : > { %s3816_s10 = scalar_lea.vmem %s3815_s26, 256  ;;  %p3817_p6 = scmp.lt.s32.totalorder %s3007_s5, %s3815_s26 }
0x1ae0   : > { %p3812_p4 = pnand %p3811_p2, %p4106_p3  ;;  %p3818_p7 = scmp.lt.s32.totalorder %s3816_s10, %s3810_s29 }
0x1ae1   : > { %s3398_s21 = sshll.u32 %s4800_s17, 7  ;;  %s4804_s22 = sand.u32 1, %s4801_s18  }
0x1ae2   : > { %s4609_s28 = scalar_lea.hbm %s4803_s24, %s3398_s21  ;;  %s2993_s15 = scalar_lea.sflag [#allocation4], %s4804_s22 }
0x1ae3   : > { %p3813_p5 = pneg %p3812_p4  ;;  %p3819_p8 = por %p3818_p7, %p3817_p6 }
0x1ae5   : > { %p3820_p10 = pnand %p3819_p8, %p3813_p5 }
0x1ae7   : > { %3823 = shalt.err (!%p3820_p10)
}
0x1ae8   : > { %s3824_s4 = scalar_lea.hbm %s4609_s28, 128  ;;  %s3828_s2 = scalar_lea.hbm %s4803_s24, 256 }
0x1ae9   : > { %p3825_p11 = scmp.ne.s32.totalorder %s4609_s28, %s3824_s4  ;;  %p3829_p0 = scmp.lt.u32.totalorder %s4609_s28, %s4803_s24 }
0x1aea   : > { %p3830_p1 = scmp.lt.u32.totalorder %s3828_s2, %s3824_s4  ;;  %p3832_p4 = scmp.lt.u32.totalorder %s3824_s4, %s4609_s28 }
0x1aeb   : > { %p3826_p12 = pnand %p3825_p11, %p4106_p3 }
0x1aec   : > { %p3831_p2 = por %p3830_p1, %p3829_p0 }
0x1aed   : > { %p3827_p13 = pneg %p3826_p12 }
0x1aee   : > { %p3833_p5 = por %p3832_p4, %p3831_p2 }
0x1af0   : > { %p3834_p6 = pnand %p3833_p5, %p3827_p13 }
0x1af2   : > { %3837 = shalt.err (!%p3834_p6)
}
0x1af3   : > { %3672 = dma.vmem_to_hbm [thread:$0]  (%p4106_p3), %s3007_s5, 128, %s4609_s28, %s2993_s15  }
0x1af4 PF: > { %s4805_s3 = sld [smem:[#allocation13_spill]]  ;;  %s4806_s12 = sld [smem:[#allocation6_spill]] }
0x1afa   : > { %p3678_p7 = scmp.ge.s32.totalorder %s4805_s3, 2  ;;  %s3018_s16 = sand.u32 1, %s4806_s12  }
0x1afb   : > { %s3019_s27 = scalar_lea.sflag [#allocation4], %s3018_s16 }
0x1afc   : > { %p3675_p8 = pnand %p3678_p7, %p4116_p9 }
0x1afe   : > { %3871 = dma.done.wait (!%p3675_p8), %s3019_s27, 128  }
0x1aff   : > { %3873 = vsyncadd (!%p3675_p8), %s3019_s27, 4294967168  ;;  %s39_s0 = sadd.s32 1, %s4805_s3   ;;  %s4808_s27 = sld [smem:[#allocation7_spill]] }
0x1b00   : > { %p36_p10 = scmp.ge.s32.totalorder %s39_s0, 6   ;;  %s4809_s3 = sld [smem:[#allocation8_spill]] }
0x1b01   : > { %s4810_s7 = sld [smem:[#allocation18_spill]]  ;;  %s4811_s28 = sld [smem:[#allocation11_spill]] }
0x1b02   : > { %s4812_s8 = sld [smem:[#allocation12_spill]]  ;;  %s4813_s4 = sld [smem:[#allocation14_spill]] }
0x1b03   : > { %s4814_s29 = sld [smem:[#allocation16_spill]]  ;;  %38 = sbr.rel (!%p36_p10) target bundleno = 30 (0x1e), region = 236 }
0x1b0a   :  { %3024 = vsyncpa [#allocation4], 1 }
0x1b0b   :  { %3026 = vsyncpa [#allocation4 + $0x1], 1 }

</bundles_post_ra>
